<compile_context>
chip_gen: v7x
topology: tpu7x:2x2x1
jax: 0.10.0
libtpu: 0.0.40
codegen_flags: <defaults>
</compile_context>

<pallas_src>
import jax
import jax.numpy as jnp
from jax.experimental import pallas as pl
from jax.experimental.pallas import tpu as pltpu

LANE = 128


def _round_up(v, m):
    return (v + m - 1) // m * m


# ------------------------------------------------------------------ parameter packing

def _pack_w(w_in_out, k_pad, m_pad, dtype):
    """w_in_out: (in, out) layout -> zero-padded (k_pad, m_pad) in compute dtype."""
    k, m = w_in_out.shape
    return jnp.zeros((k_pad, m_pad), dtype).at[:k, :m].set(w_in_out.astype(dtype))


def _pack_b(b, m_pad):
    m = b.shape[0]
    return jnp.zeros((1, m_pad), jnp.float32).at[0, :m].set(b.astype(jnp.float32))


def prepare_ae_params(params, *, compute_dtype=jnp.float32):
    """One-time packing of AE parameters (torch (out,in) Linear layout) for the fused kernel.

    - transposes every weight to (in, out) and zero-pads to multiples of 128,
    - splits the first encoder weight by input rows at the [uni_vec | sp] boundary
      (folds the concat into two matmuls),
    - splits the last decoder weight by output columns at the same boundary
      (x_rec comes out pre-split for the in-kernel MSE against uni_vec and sp).
    """
    cdt = compute_dtype

    def pack_layer(w, b):
        wt = jnp.asarray(w).T                                   # (in, out)
        k_pad = _round_up(wt.shape[0], LANE)
        m_pad = _round_up(wt.shape[1], LANE)
        return _pack_w(wt, k_pad, m_pad, cdt), _pack_b(jnp.asarray(b), m_pad)

    spatial = [pack_layer(w, b) for (w, b, _) in params['spatial']]
    sp_relu = tuple(bool(r) for (_, _, r) in params['spatial'])

    enc_layers = params['encoder']
    enc_relu = tuple(bool(r) for (_, _, r) in enc_layers)
    w1, b1, _ = enc_layers[0]
    enc_in = int(jnp.asarray(w1).shape[1])
    sp_dim = int(jnp.asarray(params['spatial'][-1][0]).shape[0])
    uni_dim = enc_in - sp_dim
    w1t = jnp.asarray(w1).T                                     # (enc_in, enc_h1)
    m_pad = _round_up(w1t.shape[1], LANE)
    enc1 = (_pack_w(w1t[:uni_dim], _round_up(uni_dim, LANE), m_pad, cdt),
            _pack_w(w1t[uni_dim:], _round_up(sp_dim, LANE), m_pad, cdt),
            _pack_b(jnp.asarray(b1), m_pad))
    enc_rest = [pack_layer(w, b) for (w, b, _) in enc_layers[1:]]

    dec_layers = params['decoder']
    dec_relu = tuple(bool(r) for (_, _, r) in dec_layers)
    dec_rest = [pack_layer(w, b) for (w, b, _) in dec_layers[:-1]]
    wl, bl, _ = dec_layers[-1]
    wlt = jnp.asarray(wl).T                                     # (dec_h_last, uni_dim+sp_dim)
    bl = jnp.asarray(bl)
    k_pad = _round_up(wlt.shape[0], LANE)
    dec_last = (_pack_w(wlt[:, :uni_dim], k_pad, _round_up(uni_dim, LANE), cdt),
                _pack_b(bl[:uni_dim], _round_up(uni_dim, LANE)),
                _pack_w(wlt[:, uni_dim:], k_pad, _round_up(sp_dim, LANE), cdt),
                _pack_b(bl[uni_dim:], _round_up(sp_dim, LANE)))

    cls_wt = jnp.asarray(params['classifier_w']).T              # (z_dim, num_classes)
    cls = (_pack_w(cls_wt, _round_up(cls_wt.shape[0], LANE),
                   _round_up(cls_wt.shape[1], LANE), cdt),
           _pack_b(jnp.asarray(params['classifier_b']), _round_up(cls_wt.shape[1], LANE)))

    z_dim = int(jnp.asarray(enc_layers[-1][0]).shape[0])
    num_classes = int(jnp.asarray(params['classifier_w']).shape[0])
    return {
        'compute_dtype': cdt,
        'spatial': spatial, 'sp_relu': sp_relu,
        'enc1': enc1, 'enc_rest': enc_rest, 'enc_relu': enc_relu,
        'dec_rest': dec_rest, 'dec_relu': dec_relu, 'dec_last': dec_last,
        'cls': cls,
        'uni_dim': uni_dim, 'sp_dim': sp_dim, 'x_dim': uni_dim + sp_dim,
        'z_dim': z_dim, 'num_classes': num_classes,
        'spatial_in_pad': _round_up(int(jnp.asarray(params['spatial'][0][0]).shape[1]), LANE),
        'uni_pad': _round_up(uni_dim, LANE),
        'z_pad': _round_up(z_dim, LANE),
        'cls_pad': _round_up(num_classes, LANE),
        'hoi_weight': jnp.asarray(params['hoi_weight'], jnp.float32),
    }


# ------------------------------------------------------------------ fused kernel

def _make_ae_kernel(n_wb, n_sp, n_enc_rest, n_dec_rest, sp_relu, enc_relu, dec_relu,
                    n_rows, tile_m, compute_dtype):
    dt = compute_dtype

    def dense(h, w_ref, b_ref, relu):
        # bf16 (or f32) operands straight into the MXU, f32 accumulation + f32 bias/ReLU.
        y = jnp.dot(h.astype(dt), w_ref[...],
                    preferred_element_type=jnp.float32) + b_ref[...]
        return jnp.maximum(y, 0.0) if relu else y

    def kernel(spatial_ref, uni_ref, *refs):
        wb = refs[:n_wb]
        z_ref, s_ref, p_ref, sse_ref = refs[n_wb:]
        idx = 0

        # ---- spatial MLP (all intermediates stay in vregs/VMEM) ----
        h = spatial_ref[...]
        for li in range(n_sp):
            h = dense(h, wb[idx], wb[idx + 1], sp_relu[li]); idx += 2
        sp = h                                             # (tm, 128) f32, real cols 0:sp_dim

        uni = uni_ref[...].astype(jnp.float32)             # (tm, 128), real cols 0:uni_dim

        # ---- encoder; concat([uni, sp]) folded into split first-layer weights ----
        w_eu, w_es, b_e1 = wb[idx], wb[idx + 1], wb[idx + 2]; idx += 3
        h = (jnp.dot(uni.astype(dt), w_eu[...], preferred_element_type=jnp.float32)
             + jnp.dot(sp.astype(dt), w_es[...], preferred_element_type=jnp.float32)
             + b_e1[...])
        if enc_relu[0]:
            h = jnp.maximum(h, 0.0)
        for li in range(n_enc_rest):
            h = dense(h, wb[idx], wb[idx + 1], enc_relu[li + 1]); idx += 2
        z = h
        z_ref[...] = z.astype(z_ref.dtype)

        # ---- decoder; last layer split into the uni / sp output halves ----
        h = z
        for li in range(n_dec_rest):
            h = dense(h, wb[idx], wb[idx + 1], dec_relu[li]); idx += 2
        w_du, b_du, w_ds, b_ds = wb[idx], wb[idx + 1], wb[idx + 2], wb[idx + 3]; idx += 4
        x_rec_uni = dense(h, w_du, b_du, dec_relu[-1])      # reconstruction of uni_vec cols
        x_rec_sp = dense(h, w_ds, b_ds, dec_relu[-1])       # reconstruction of sp cols

        # ---- classifier + sigmoid ----
        w_c, b_c = wb[idx], wb[idx + 1]; idx += 2
        s = dense(z, w_c, b_c, False)
        s_ref[...] = s.astype(s_ref.dtype)
        p_ref[...] = (1.0 / (1.0 + jnp.exp(-s))).astype(p_ref.dtype)   # EUP exp

        # ---- per-tile reconstruction SSE (row-masked; padded lanes are exactly zero) ----
        row = (pl.program_id(0) * tile_m
               + jax.lax.broadcasted_iota(jnp.int32, (tile_m, 1), 0))
        valid = (row < n_rows).astype(jnp.float32)
        d_u = (x_rec_uni - uni) * valid
        d_s = (x_rec_sp - sp) * valid
        sse = jnp.sum(d_u * d_u) + jnp.sum(d_s * d_s)
        sse_ref[...] = jnp.broadcast_to(sse, sse_ref.shape)

    return kernel


# ------------------------------------------------------------------ losses (plain JAX)

def _bce_with_logits(s, y, pos_weight):
    # torch BCEWithLogitsLoss(pos_weight), mean reduction, stable softplus form.
    return jnp.mean(pos_weight * y * jax.nn.softplus(-s)
                    + (1.0 - y) * jax.nn.softplus(s))


def _semihard_loss(p, label, pos_weight):
    score_ = p * pos_weight
    pos = score_ * label
    neg = score_ * (1.0 - label)
    l_inter = jnp.mean(jnp.sum(neg, axis=1) / (jnp.sum(1.0 - label, axis=1) + 1.0)
                       - jnp.sum(pos, axis=1) / (jnp.sum(label, axis=1) + 1.0))
    l_intra = jnp.mean(jnp.sum(neg, axis=0) / (jnp.sum(1.0 - label, axis=0) + 1.0)
                       - jnp.sum(pos, axis=0) / (jnp.sum(label, axis=0) + 1.0))
    return l_inter + l_intra


# ------------------------------------------------------------------ forward

def ae_forward(packed, batch, *, classification_fac=1.0, reconstruction_fac=1.0,
               tile_m=256, core_parallel=False, single_buffer_weights=False):
    """Fused AE forward.  `packed` comes from prepare_ae_params (weights packed once).

    core_parallel=True: dimension_semantics=(CORE_PARALLEL,) to split the batch grid axis
    across v7x's 2 TensorCores (keep >= 2 grid steps).  single_buffer_weights=True: mark the
    constant-index weight specs pl.Buffered(1) to halve resident-weight VMEM at production
    widths.  Both default False for portability.
    """
    cdt = packed['compute_dtype']
    spatial, uni, labels = batch['spatial'], batch['uni_vec'], batch['labels']
    n = spatial.shape[0]
    assert uni.shape[1] == packed['uni_dim']

    sub = 16 if cdt == jnp.bfloat16 else 8       # bf16 packs 2 rows/sublane
    tm = min(tile_m, _round_up(n, sub))
    n_pad = _round_up(n, tm)
    n_grid = n_pad // tm

    def pad_in(x, lane_pad):
        x = x.astype(cdt)
        pr, pc = n_pad - x.shape[0], lane_pad - x.shape[1]
        return jnp.pad(x, ((0, pr), (0, pc))) if (pr or pc) else x

    spatial_p = pad_in(spatial, packed['spatial_in_pad'])
    uni_p = pad_in(uni, packed['uni_pad'])

    # Constant-index (VMEM-resident) weight/bias operands, in the order the kernel consumes.
    wb_arrays, wb_specs = [], []

    def add_const(arr):
        kw = {'pipeline_mode': pl.Buffered(1)} if single_buffer_weights else {}
        wb_arrays.append(arr)
        wb_specs.append(pl.BlockSpec(arr.shape, lambda i: (0, 0), **kw))

    for w_p, b_p in packed['spatial']:
        add_const(w_p); add_const(b_p)
    for a in packed['enc1']:
        add_const(a)
    for w_p, b_p in packed['enc_rest']:
        add_const(w_p); add_const(b_p)
    for w_p, b_p in packed['dec_rest']:
        add_const(w_p); add_const(b_p)
    for a in packed['dec_last']:
        add_const(a)
    for a in packed['cls']:
        add_const(a)
    n_wb = len(wb_arrays)

    kernel = _make_ae_kernel(
        n_wb=n_wb, n_sp=len(packed['spatial']),
        n_enc_rest=len(packed['enc_rest']), n_dec_rest=len(packed['dec_rest']),
        sp_relu=packed['sp_relu'], enc_relu=packed['enc_relu'], dec_relu=packed['dec_relu'],
        n_rows=n, tile_m=tm, compute_dtype=cdt)

    z_pad, s_pad = packed['z_pad'], packed['cls_pad']
    out_shape = (jax.ShapeDtypeStruct((n_pad, z_pad), jnp.float32),
                 jax.ShapeDtypeStruct((n_pad, s_pad), jnp.float32),
                 jax.ShapeDtypeStruct((n_pad, s_pad), jnp.float32),
                 jax.ShapeDtypeStruct((n_grid, 8, LANE), jnp.float32))
    dim_sem = (pltpu.CORE_PARALLEL,) if core_parallel else ("parallel",)

    z_o, s_o, p_o, sse_o = pl.pallas_call(
        kernel,
        out_shape=out_shape,
        grid_spec=pltpu.PrefetchScalarGridSpec(
            num_scalar_prefetch=0,
            grid=(n_grid,),
            in_specs=[pl.BlockSpec((tm, packed['spatial_in_pad']), lambda i: (i, 0)),
                      pl.BlockSpec((tm, packed['uni_pad']), lambda i: (i, 0))] + wb_specs,
            out_specs=[pl.BlockSpec((tm, z_pad), lambda i: (i, 0)),
                       pl.BlockSpec((tm, s_pad), lambda i: (i, 0)),
                       pl.BlockSpec((tm, s_pad), lambda i: (i, 0)),
                       pl.BlockSpec((1, 8, LANE), lambda i: (i, 0, 0))],
        ),
        compiler_params=pltpu.CompilerParams(dimension_semantics=dim_sem),
    )(spatial_p, uni_p, *wb_arrays)

    z = z_o[:n, :packed['z_dim']]
    s = s_o[:n, :packed['num_classes']]
    p = p_o[:n, :packed['num_classes']]
    pw = packed['hoi_weight']

    L_cls = classification_fac * _bce_with_logits(s, labels, pw)
    L_rec = reconstruction_fac * (jnp.sum(sse_o[:, 0, 0]) / (n * packed['x_dim']))
    loss = L_cls + L_rec + _semihard_loss(p, labels, pw)
    return {'z': z, 's': s, 'p': p, 'L_cls': L_cls, 'L_rec': L_rec, 'loss': loss}


# ------------------------------------------------------------------ demo / check

if __name__ == "__main__":
    key = jax.random.PRNGKey(0)

    SPATIAL_LAYER_SIZE = [16, 32, 32]      # spatial MLP: 16 -> 32 -> 32 (ReLU each)
    ENCODER_LAYER_SIZE = [64, 48, 24]      # encoder: 64 -> 48(ReLU) -> 24; decoder mirrors
    NUM_CLASSES = 29
    UNI_VEC_DIM = ENCODER_LAYER_SIZE[0] - SPATIAL_LAYER_SIZE[-1]   # 32
    N = 200                                # not a multiple of 128: exercises row masking

    def linear_init(k, out_f, in_f):
        kw, kb = jax.random.split(k)
        bound = 1.0 / (in_f ** 0.5)
        w = jax.random.uniform(kw, (out_f, in_f), minval=-bound, maxval=bound,
                               dtype=jnp.float32)
        b = jax.random.uniform(kb, (out_f,), minval=-bound, maxval=bound,
                               dtype=jnp.float32)
        return w, b

    keys = iter(jax.random.split(key, 16))

    spatial_layers = []
    for i in range(1, len(SPATIAL_LAYER_SIZE)):
        w, b = linear_init(next(keys), SPATIAL_LAYER_SIZE[i], SPATIAL_LAYER_SIZE[i - 1])
        spatial_layers.append((w, b, True))

    encoder_layers = []
    for i in range(1, len(ENCODER_LAYER_SIZE)):
        w, b = linear_init(next(keys), ENCODER_LAYER_SIZE[i], ENCODER_LAYER_SIZE[i - 1])
        encoder_layers.append((w, b, i < len(ENCODER_LAYER_SIZE) - 1))

    decoder_layers = []
    for i in reversed(range(1, len(ENCODER_LAYER_SIZE))):
        w, b = linear_init(next(keys), ENCODER_LAYER_SIZE[i - 1], ENCODER_LAYER_SIZE[i])
        decoder_layers.append((w, b, i > 1))

    cls_w, cls_b = linear_init(next(keys), NUM_CLASSES, ENCODER_LAYER_SIZE[-1])
    hoi_weight = jax.random.uniform(next(keys), (1, NUM_CLASSES),
                                    minval=0.5, maxval=2.0, dtype=jnp.float32)

    batch = {
        'spatial': jax.random.normal(next(keys), (N, SPATIAL_LAYER_SIZE[0]), jnp.float32),
        'uni_vec': jax.random.normal(next(keys), (N, UNI_VEC_DIM), jnp.float32),
        'labels': (jax.random.uniform(next(keys), (N, NUM_CLASSES)) < 0.2).astype(jnp.float32),
    }

    raw_params = {
        'spatial': spatial_layers, 'encoder': encoder_layers, 'decoder': decoder_layers,
        'classifier_w': cls_w, 'classifier_b': cls_b, 'hoi_weight': hoi_weight,
    }

    # One-time packing (hoisted out of the hot path); f32 compute for exact checking,
    # pass compute_dtype=jnp.bfloat16 for v5e/v6e/v7x MXU peak in production.
    packed = prepare_ae_params(raw_params, compute_dtype=jnp.float32)

    # tile_m=128 here to exercise the multi-tile grid + masked tail rows; the default
    # tile_m=256 runs the whole batch in a single grid step (preferred for latency).
    out = ae_forward(packed, batch, tile_m=128)
    out = jax.block_until_ready(out)

    # ---- plain-JAX reference ----------------------------------------------------
    hp = jax.lax.Precision.HIGHEST

    def ref_mlp(x, layers):
        h = x
        for w, b, relu in layers:
            h = jnp.dot(h, w.T, precision=hp) + b
            if relu:
                h = jnp.maximum(h, 0.0)
        return h

    sp_r = ref_mlp(batch['spatial'], spatial_layers)
    x_r = jnp.concatenate([batch['uni_vec'], sp_r], axis=1)
    z_r = ref_mlp(x_r, encoder_layers)
    xr_r = ref_mlp(z_r, decoder_layers)
    s_r = jnp.dot(z_r, cls_w.T, precision=hp) + cls_b
    p_r = jax.nn.sigmoid(s_r)
    L_cls_r = _bce_with_logits(s_r, batch['labels'], hoi_weight)
    L_rec_r = jnp.mean((x_r - xr_r) ** 2)
    loss_r = L_cls_r + L_rec_r + _semihard_loss(p_r, batch['labels'], hoi_weight)

    tol = dict(atol=5e-3, rtol=5e-3)
    assert out['z'].shape == (N, ENCODER_LAYER_SIZE[-1])
    assert out['s'].shape == (N, NUM_CLASSES)
    assert out['p'].shape == (N, NUM_CLASSES)
    assert jnp.allclose(out['z'], z_r, **tol)
    assert jnp.allclose(out['s'], s_r, **tol)
    assert jnp.allclose(out['p'], p_r, **tol)
    assert jnp.allclose(out['L_cls'], L_cls_r, **tol)
    assert jnp.allclose(out['L_rec'], L_rec_r, **tol)
    assert jnp.allclose(out['loss'], loss_r, **tol)

    print("KERNEL_OK")
</pallas_src>

<mosaic_0001>
module attributes {stable_mosaic.version = 11 : i64} {
  func.func @kernel(%arg0: i32, %arg1: memref<128x128xf32, #tpu.memory_space<vmem>>, %arg2: memref<128x128xf32, #tpu.memory_space<vmem>>, %arg3: memref<128x128xf32, #tpu.memory_space<vmem>>, %arg4: memref<1x128xf32, #tpu.memory_space<vmem>>, %arg5: memref<128x128xf32, #tpu.memory_space<vmem>>, %arg6: memref<1x128xf32, #tpu.memory_space<vmem>>, %arg7: memref<128x128xf32, #tpu.memory_space<vmem>>, %arg8: memref<128x128xf32, #tpu.memory_space<vmem>>, %arg9: memref<1x128xf32, #tpu.memory_space<vmem>>, %arg10: memref<128x128xf32, #tpu.memory_space<vmem>>, %arg11: memref<1x128xf32, #tpu.memory_space<vmem>>, %arg12: memref<128x128xf32, #tpu.memory_space<vmem>>, %arg13: memref<1x128xf32, #tpu.memory_space<vmem>>, %arg14: memref<128x128xf32, #tpu.memory_space<vmem>>, %arg15: memref<1x128xf32, #tpu.memory_space<vmem>>, %arg16: memref<128x128xf32, #tpu.memory_space<vmem>>, %arg17: memref<1x128xf32, #tpu.memory_space<vmem>>, %arg18: memref<128x128xf32, #tpu.memory_space<vmem>>, %arg19: memref<1x128xf32, #tpu.memory_space<vmem>>, %arg20: memref<128x128xf32, #tpu.memory_space<vmem>>, %arg21: memref<128x128xf32, #tpu.memory_space<vmem>>, %arg22: memref<128x128xf32, #tpu.memory_space<vmem>>, %arg23: memref<1x8x128xf32, #tpu.memory_space<vmem>>) attributes {dimension_semantics = [#tpu.dimension_semantics<parallel>], iteration_bounds = array<i64: 2>, scalar_prefetch = 0 : i64, scratch_operands = 0 : i64, tpu.core_type = #tpu.core_type<tc>, window_params = [{transform_indices = @transform_0, window_bounds = array<i64: 128, 128>}, {transform_indices = @transform_1, window_bounds = array<i64: 128, 128>}, {pipeline_mode = #tpu.pipeline_mode<synchronous>, transform_indices = @transform_2, window_bounds = array<i64: 128, 128>}, {pipeline_mode = #tpu.pipeline_mode<synchronous>, transform_indices = @transform_3, window_bounds = array<i64: 1, 128>}, {pipeline_mode = #tpu.pipeline_mode<synchronous>, transform_indices = @transform_4, window_bounds = array<i64: 128, 128>}, {pipeline_mode = #tpu.pipeline_mode<synchronous>, transform_indices = @transform_5, window_bounds = array<i64: 1, 128>}, {pipeline_mode = #tpu.pipeline_mode<synchronous>, transform_indices = @transform_6, window_bounds = array<i64: 128, 128>}, {pipeline_mode = #tpu.pipeline_mode<synchronous>, transform_indices = @transform_7, window_bounds = array<i64: 128, 128>}, {pipeline_mode = #tpu.pipeline_mode<synchronous>, transform_indices = @transform_8, window_bounds = array<i64: 1, 128>}, {pipeline_mode = #tpu.pipeline_mode<synchronous>, transform_indices = @transform_9, window_bounds = array<i64: 128, 128>}, {pipeline_mode = #tpu.pipeline_mode<synchronous>, transform_indices = @transform_10, window_bounds = array<i64: 1, 128>}, {pipeline_mode = #tpu.pipeline_mode<synchronous>, transform_indices = @transform_11, window_bounds = array<i64: 128, 128>}, {pipeline_mode = #tpu.pipeline_mode<synchronous>, transform_indices = @transform_12, window_bounds = array<i64: 1, 128>}, {pipeline_mode = #tpu.pipeline_mode<synchronous>, transform_indices = @transform_13, window_bounds = array<i64: 128, 128>}, {pipeline_mode = #tpu.pipeline_mode<synchronous>, transform_indices = @transform_14, window_bounds = array<i64: 1, 128>}, {pipeline_mode = #tpu.pipeline_mode<synchronous>, transform_indices = @transform_15, window_bounds = array<i64: 128, 128>}, {pipeline_mode = #tpu.pipeline_mode<synchronous>, transform_indices = @transform_16, window_bounds = array<i64: 1, 128>}, {pipeline_mode = #tpu.pipeline_mode<synchronous>, transform_indices = @transform_17, window_bounds = array<i64: 128, 128>}, {pipeline_mode = #tpu.pipeline_mode<synchronous>, transform_indices = @transform_18, window_bounds = array<i64: 1, 128>}, {transform_indices = @transform_19, window_bounds = array<i64: 128, 128>}, {transform_indices = @transform_20, window_bounds = array<i64: 128, 128>}, {transform_indices = @transform_21, window_bounds = array<i64: 128, 128>}, {transform_indices = @transform_22, window_bounds = array<i64: 1, 8, 128>}]} {
    %c0 = arith.constant 0 : index
    %c0_0 = arith.constant 0 : index
    %0 = vector.load %arg1[%c0, %c0_0] : memref<128x128xf32, #tpu.memory_space<vmem>>, vector<128x128xf32>
    %c0_1 = arith.constant 0 : index
    %c0_2 = arith.constant 0 : index
    %1 = vector.load %arg3[%c0_1, %c0_2] : memref<128x128xf32, #tpu.memory_space<vmem>>, vector<128x128xf32>
    %cst = arith.constant dense<0.000000e+00> : vector<128x128xf32>
    %2 = tpu.matmul %0, %1, %cst {dimension_numbers = #tpu.dot_dimension_numbers<[1], [0], [0], [1], [0, 0, 1, 1], [], []>} : vector<128x128xf32>, vector<128x128xf32>, vector<128x128xf32> -> vector<128x128xf32>
    %c0_3 = arith.constant 0 : index
    %c0_4 = arith.constant 0 : index
    %3 = vector.load %arg4[%c0_3, %c0_4] : memref<1x128xf32, #tpu.memory_space<vmem>>, vector<1x128xf32>
    %4 = vector.broadcast %3 : vector<1x128xf32> to vector<128x128xf32>
    %5 = arith.addf %2, %4 : vector<128x128xf32>
    %cst_5 = arith.constant 0.000000e+00 : f32
    %6 = vector.broadcast %cst_5 : f32 to vector<128x128xf32>
    %7 = arith.maximumf %5, %6 : vector<128x128xf32>
    %c0_6 = arith.constant 0 : index
    %c0_7 = arith.constant 0 : index
    %8 = vector.load %arg5[%c0_6, %c0_7] : memref<128x128xf32, #tpu.memory_space<vmem>>, vector<128x128xf32>
    %cst_8 = arith.constant dense<0.000000e+00> : vector<128x128xf32>
    %9 = tpu.matmul %7, %8, %cst_8 {dimension_numbers = #tpu.dot_dimension_numbers<[1], [0], [0], [1], [0, 0, 1, 1], [], []>} : vector<128x128xf32>, vector<128x128xf32>, vector<128x128xf32> -> vector<128x128xf32>
    %c0_9 = arith.constant 0 : index
    %c0_10 = arith.constant 0 : index
    %10 = vector.load %arg6[%c0_9, %c0_10] : memref<1x128xf32, #tpu.memory_space<vmem>>, vector<1x128xf32>
    %11 = vector.broadcast %10 : vector<1x128xf32> to vector<128x128xf32>
    %12 = arith.addf %9, %11 : vector<128x128xf32>
    %cst_11 = arith.constant 0.000000e+00 : f32
    %13 = vector.broadcast %cst_11 : f32 to vector<128x128xf32>
    %14 = arith.maximumf %12, %13 : vector<128x128xf32>
    %c0_12 = arith.constant 0 : index
    %c0_13 = arith.constant 0 : index
    %15 = vector.load %arg2[%c0_12, %c0_13] : memref<128x128xf32, #tpu.memory_space<vmem>>, vector<128x128xf32>
    %c0_14 = arith.constant 0 : index
    %c0_15 = arith.constant 0 : index
    %16 = vector.load %arg7[%c0_14, %c0_15] : memref<128x128xf32, #tpu.memory_space<vmem>>, vector<128x128xf32>
    %cst_16 = arith.constant dense<0.000000e+00> : vector<128x128xf32>
    %17 = tpu.matmul %15, %16, %cst_16 {dimension_numbers = #tpu.dot_dimension_numbers<[1], [0], [0], [1], [0, 0, 1, 1], [], []>} : vector<128x128xf32>, vector<128x128xf32>, vector<128x128xf32> -> vector<128x128xf32>
    %c0_17 = arith.constant 0 : index
    %c0_18 = arith.constant 0 : index
    %18 = vector.load %arg8[%c0_17, %c0_18] : memref<128x128xf32, #tpu.memory_space<vmem>>, vector<128x128xf32>
    %cst_19 = arith.constant dense<0.000000e+00> : vector<128x128xf32>
    %19 = tpu.matmul %14, %18, %cst_19 {dimension_numbers = #tpu.dot_dimension_numbers<[1], [0], [0], [1], [0, 0, 1, 1], [], []>} : vector<128x128xf32>, vector<128x128xf32>, vector<128x128xf32> -> vector<128x128xf32>
    %20 = arith.addf %17, %19 : vector<128x128xf32>
    %c0_20 = arith.constant 0 : index
    %c0_21 = arith.constant 0 : index
    %21 = vector.load %arg9[%c0_20, %c0_21] : memref<1x128xf32, #tpu.memory_space<vmem>>, vector<1x128xf32>
    %22 = vector.broadcast %21 : vector<1x128xf32> to vector<128x128xf32>
    %23 = arith.addf %20, %22 : vector<128x128xf32>
    %cst_22 = arith.constant 0.000000e+00 : f32
    %24 = vector.broadcast %cst_22 : f32 to vector<128x128xf32>
    %25 = arith.maximumf %23, %24 : vector<128x128xf32>
    %c0_23 = arith.constant 0 : index
    %c0_24 = arith.constant 0 : index
    %26 = vector.load %arg10[%c0_23, %c0_24] : memref<128x128xf32, #tpu.memory_space<vmem>>, vector<128x128xf32>
    %cst_25 = arith.constant dense<0.000000e+00> : vector<128x128xf32>
    %27 = tpu.matmul %25, %26, %cst_25 {dimension_numbers = #tpu.dot_dimension_numbers<[1], [0], [0], [1], [0, 0, 1, 1], [], []>} : vector<128x128xf32>, vector<128x128xf32>, vector<128x128xf32> -> vector<128x128xf32>
    %c0_26 = arith.constant 0 : index
    %c0_27 = arith.constant 0 : index
    %28 = vector.load %arg11[%c0_26, %c0_27] : memref<1x128xf32, #tpu.memory_space<vmem>>, vector<1x128xf32>
    %29 = vector.broadcast %28 : vector<1x128xf32> to vector<128x128xf32>
    %30 = arith.addf %27, %29 : vector<128x128xf32>
    %c0_28 = arith.constant 0 : index
    %c0_29 = arith.constant 0 : index
    %31 = vector.load %arg20[%c0_28, %c0_29] : memref<128x128xf32, #tpu.memory_space<vmem>>, vector<128x128xf32>
    tpu.vector_store %arg20[%c0_28, %c0_29], %30 {strides = array<i32>} : memref<128x128xf32, #tpu.memory_space<vmem>>, vector<128x128xf32>,
    %c0_30 = arith.constant 0 : index
    %c0_31 = arith.constant 0 : index
    %32 = vector.load %arg12[%c0_30, %c0_31] : memref<128x128xf32, #tpu.memory_space<vmem>>, vector<128x128xf32>
    %cst_32 = arith.constant dense<0.000000e+00> : vector<128x128xf32>
    %33 = tpu.matmul %30, %32, %cst_32 {dimension_numbers = #tpu.dot_dimension_numbers<[1], [0], [0], [1], [0, 0, 1, 1], [], []>} : vector<128x128xf32>, vector<128x128xf32>, vector<128x128xf32> -> vector<128x128xf32>
    %c0_33 = arith.constant 0 : index
    %c0_34 = arith.constant 0 : index
    %34 = vector.load %arg13[%c0_33, %c0_34] : memref<1x128xf32, #tpu.memory_space<vmem>>, vector<1x128xf32>
    %35 = vector.broadcast %34 : vector<1x128xf32> to vector<128x128xf32>
    %36 = arith.addf %33, %35 : vector<128x128xf32>
    %cst_35 = arith.constant 0.000000e+00 : f32
    %37 = vector.broadcast %cst_35 : f32 to vector<128x128xf32>
    %38 = arith.maximumf %36, %37 : vector<128x128xf32>
    %c0_36 = arith.constant 0 : index
    %c0_37 = arith.constant 0 : index
    %39 = vector.load %arg14[%c0_36, %c0_37] : memref<128x128xf32, #tpu.memory_space<vmem>>, vector<128x128xf32>
    %cst_38 = arith.constant dense<0.000000e+00> : vector<128x128xf32>
    %40 = tpu.matmul %38, %39, %cst_38 {dimension_numbers = #tpu.dot_dimension_numbers<[1], [0], [0], [1], [0, 0, 1, 1], [], []>} : vector<128x128xf32>, vector<128x128xf32>, vector<128x128xf32> -> vector<128x128xf32>
    %c0_39 = arith.constant 0 : index
    %c0_40 = arith.constant 0 : index
    %41 = vector.load %arg15[%c0_39, %c0_40] : memref<1x128xf32, #tpu.memory_space<vmem>>, vector<1x128xf32>
    %42 = vector.broadcast %41 : vector<1x128xf32> to vector<128x128xf32>
    %43 = arith.addf %40, %42 : vector<128x128xf32>
    %c0_41 = arith.constant 0 : index
    %c0_42 = arith.constant 0 : index
    %44 = vector.load %arg16[%c0_41, %c0_42] : memref<128x128xf32, #tpu.memory_space<vmem>>, vector<128x128xf32>
    %cst_43 = arith.constant dense<0.000000e+00> : vector<128x128xf32>
    %45 = tpu.matmul %38, %44, %cst_43 {dimension_numbers = #tpu.dot_dimension_numbers<[1], [0], [0], [1], [0, 0, 1, 1], [], []>} : vector<128x128xf32>, vector<128x128xf32>, vector<128x128xf32> -> vector<128x128xf32>
    %c0_44 = arith.constant 0 : index
    %c0_45 = arith.constant 0 : index
    %46 = vector.load %arg17[%c0_44, %c0_45] : memref<1x128xf32, #tpu.memory_space<vmem>>, vector<1x128xf32>
    %47 = vector.broadcast %46 : vector<1x128xf32> to vector<128x128xf32>
    %48 = arith.addf %45, %47 : vector<128x128xf32>
    %c0_46 = arith.constant 0 : index
    %c0_47 = arith.constant 0 : index
    %49 = vector.load %arg18[%c0_46, %c0_47] : memref<128x128xf32, #tpu.memory_space<vmem>>, vector<128x128xf32>
    %cst_48 = arith.constant dense<0.000000e+00> : vector<128x128xf32>
    %50 = tpu.matmul %30, %49, %cst_48 {dimension_numbers = #tpu.dot_dimension_numbers<[1], [0], [0], [1], [0, 0, 1, 1], [], []>} : vector<128x128xf32>, vector<128x128xf32>, vector<128x128xf32> -> vector<128x128xf32>
    %c0_49 = arith.constant 0 : index
    %c0_50 = arith.constant 0 : index
    %51 = vector.load %arg19[%c0_49, %c0_50] : memref<1x128xf32, #tpu.memory_space<vmem>>, vector<1x128xf32>
    %52 = vector.broadcast %51 : vector<1x128xf32> to vector<128x128xf32>
    %53 = arith.addf %50, %52 : vector<128x128xf32>
    %c0_51 = arith.constant 0 : index
    %c0_52 = arith.constant 0 : index
    %54 = vector.load %arg21[%c0_51, %c0_52] : memref<128x128xf32, #tpu.memory_space<vmem>>, vector<128x128xf32>
    tpu.vector_store %arg21[%c0_51, %c0_52], %53 {strides = array<i32>} : memref<128x128xf32, #tpu.memory_space<vmem>>, vector<128x128xf32>,
    %cst_53 = arith.constant 0.000000e+00 : f32
    %55 = vector.broadcast %cst_53 : f32 to vector<128x128xf32>
    %56 = arith.subf %55, %53 : vector<128x128xf32>
    %57 = math.exp %56 : vector<128x128xf32>
    %cst_54 = arith.constant 1.000000e+00 : f32
    %58 = vector.broadcast %cst_54 : f32 to vector<128x128xf32>
    %59 = arith.addf %58, %57 : vector<128x128xf32>
    %cst_55 = arith.constant 1.000000e+00 : f32
    %60 = vector.broadcast %cst_55 : f32 to vector<128x128xf32>
    %61 = arith.divf %60, %59 : vector<128x128xf32>
    %c0_56 = arith.constant 0 : index
    %c0_57 = arith.constant 0 : index
    %62 = vector.load %arg22[%c0_56, %c0_57] : memref<128x128xf32, #tpu.memory_space<vmem>>, vector<128x128xf32>
    tpu.vector_store %arg22[%c0_56, %c0_57], %61 {strides = array<i32>} : memref<128x128xf32, #tpu.memory_space<vmem>>, vector<128x128xf32>,
    %c128_i32 = arith.constant 128 : i32
    %63 = arith.muli %arg0, %c128_i32 : i32
    %64 = tpu.iota {dimensions = array<i32: 0>} : vector<128x1xi32>
    %65 = vector.broadcast %63 : i32 to vector<128x1xi32>
    %66 = arith.addi %65, %64 : vector<128x1xi32>
    %c200_i32 = arith.constant 200 : i32
    %67 = vector.broadcast %c200_i32 : i32 to vector<128x1xi32>
    %68 = arith.cmpi slt, %66, %67 : vector<128x1xi32>
    %69 = arith.extui %68 : vector<128x1xi1> to vector<128x1xi32>
    %70 = arith.sitofp %69 : vector<128x1xi32> to vector<128x1xf32>
    %71 = arith.subf %43, %15 : vector<128x128xf32>
    %72 = vector.broadcast %70 : vector<128x1xf32> to vector<128x128xf32>
    %73 = arith.mulf %71, %72 : vector<128x128xf32>
    %74 = arith.subf %48, %14 : vector<128x128xf32>
    %75 = vector.broadcast %70 : vector<128x1xf32> to vector<128x128xf32>
    %76 = arith.mulf %74, %75 : vector<128x128xf32>
    %77 = arith.mulf %73, %73 : vector<128x128xf32>
    %78 = vector.shape_cast %77 : vector<128x128xf32> to vector<1x128x128xf32>
    %cst_58 = arith.constant dense<0.000000e+00> : vector<1xf32>
    %79 = vector.multi_reduction <add>, %78, %cst_58 [1, 2] : vector<1x128x128xf32> to vector<1xf32>
    %80 = vector.shape_cast %79 : vector<1xf32> to vector<1x1x1xf32>
    %81 = vector.extract %80[0, 0, 0] : f32 from vector<1x1x1xf32>
    %82 = arith.mulf %76, %76 : vector<128x128xf32>
    %83 = vector.shape_cast %82 : vector<128x128xf32> to vector<1x128x128xf32>
    %cst_59 = arith.constant dense<0.000000e+00> : vector<1xf32>
    %84 = vector.multi_reduction <add>, %83, %cst_59 [1, 2] : vector<1x128x128xf32> to vector<1xf32>
    %85 = vector.shape_cast %84 : vector<1xf32> to vector<1x1x1xf32>
    %86 = vector.extract %85[0, 0, 0] : f32 from vector<1x1x1xf32>
    %87 = arith.addf %81, %86 : f32
    %88 = vector.broadcast %87 : f32 to vector<1x8x128xf32>
    %c0_60 = arith.constant 0 : index
    %c0_61 = arith.constant 0 : index
    %c0_62 = arith.constant 0 : index
    %89 = vector.load %arg23[%c0_60, %c0_61, %c0_62] : memref<1x8x128xf32, #tpu.memory_space<vmem>>, vector<1x8x128xf32>
    tpu.vector_store %arg23[%c0_60, %c0_61, %c0_62], %88 {strides = array<i32>} : memref<1x8x128xf32, #tpu.memory_space<vmem>>, vector<1x8x128xf32>,
    return
  }
  func.func @transform_0(%arg0: i32) -> (i32, i32) {
    %c0_i32 = arith.constant 0 : i32
    %c0_i32_0 = arith.constant 0 : i32
    return %arg0, %c0_i32 : i32, i32
  }
  func.func @transform_1(%arg0: i32) -> (i32, i32) {
    %c0_i32 = arith.constant 0 : i32
    %c0_i32_0 = arith.constant 0 : i32
    return %arg0, %c0_i32 : i32, i32
  }
  func.func @transform_2(%arg0: i32) -> (i32, i32) {
    %c0_i32 = arith.constant 0 : i32
    %c0_i32_0 = arith.constant 0 : i32
    %c0_i32_1 = arith.constant 0 : i32
    return %c0_i32, %c0_i32_0 : i32, i32
  }
  func.func @transform_3(%arg0: i32) -> (i32, i32) {
    %c0_i32 = arith.constant 0 : i32
    %c0_i32_0 = arith.constant 0 : i32
    %c0_i32_1 = arith.constant 0 : i32
    return %c0_i32, %c0_i32_0 : i32, i32
  }
  func.func @transform_4(%arg0: i32) -> (i32, i32) {
    %c0_i32 = arith.constant 0 : i32
    %c0_i32_0 = arith.constant 0 : i32
    %c0_i32_1 = arith.constant 0 : i32
    return %c0_i32, %c0_i32_0 : i32, i32
  }
  func.func @transform_5(%arg0: i32) -> (i32, i32) {
    %c0_i32 = arith.constant 0 : i32
    %c0_i32_0 = arith.constant 0 : i32
    %c0_i32_1 = arith.constant 0 : i32
    return %c0_i32, %c0_i32_0 : i32, i32
  }
  func.func @transform_6(%arg0: i32) -> (i32, i32) {
    %c0_i32 = arith.constant 0 : i32
    %c0_i32_0 = arith.constant 0 : i32
    %c0_i32_1 = arith.constant 0 : i32
    return %c0_i32, %c0_i32_0 : i32, i32
  }
  func.func @transform_7(%arg0: i32) -> (i32, i32) {
    %c0_i32 = arith.constant 0 : i32
    %c0_i32_0 = arith.constant 0 : i32
    %c0_i32_1 = arith.constant 0 : i32
    return %c0_i32, %c0_i32_0 : i32, i32
  }
  func.func @transform_8(%arg0: i32) -> (i32, i32) {
    %c0_i32 = arith.constant 0 : i32
    %c0_i32_0 = arith.constant 0 : i32
    %c0_i32_1 = arith.constant 0 : i32
    return %c0_i32, %c0_i32_0 : i32, i32
  }
  func.func @transform_9(%arg0: i32) -> (i32, i32) {
    %c0_i32 = arith.constant 0 : i32
    %c0_i32_0 = arith.constant 0 : i32
    %c0_i32_1 = arith.constant 0 : i32
    return %c0_i32, %c0_i32_0 : i32, i32
  }
  func.func @transform_10(%arg0: i32) -> (i32, i32) {
    %c0_i32 = arith.constant 0 : i32
    %c0_i32_0 = arith.constant 0 : i32
    %c0_i32_1 = arith.constant 0 : i32
    return %c0_i32, %c0_i32_0 : i32, i32
  }
  func.func @transform_11(%arg0: i32) -> (i32, i32) {
    %c0_i32 = arith.constant 0 : i32
    %c0_i32_0 = arith.constant 0 : i32
    %c0_i32_1 = arith.constant 0 : i32
    return %c0_i32, %c0_i32_0 : i32, i32
  }
  func.func @transform_12(%arg0: i32) -> (i32, i32) {
    %c0_i32 = arith.constant 0 : i32
    %c0_i32_0 = arith.constant 0 : i32
    %c0_i32_1 = arith.constant 0 : i32
    return %c0_i32, %c0_i32_0 : i32, i32
  }
  func.func @transform_13(%arg0: i32) -> (i32, i32) {
    %c0_i32 = arith.constant 0 : i32
    %c0_i32_0 = arith.constant 0 : i32
    %c0_i32_1 = arith.constant 0 : i32
    return %c0_i32, %c0_i32_0 : i32, i32
  }
  func.func @transform_14(%arg0: i32) -> (i32, i32) {
    %c0_i32 = arith.constant 0 : i32
    %c0_i32_0 = arith.constant 0 : i32
    %c0_i32_1 = arith.constant 0 : i32
    return %c0_i32, %c0_i32_0 : i32, i32
  }
  func.func @transform_15(%arg0: i32) -> (i32, i32) {
    %c0_i32 = arith.constant 0 : i32
    %c0_i32_0 = arith.constant 0 : i32
    %c0_i32_1 = arith.constant 0 : i32
    return %c0_i32, %c0_i32_0 : i32, i32
  }
  func.func @transform_16(%arg0: i32) -> (i32, i32) {
    %c0_i32 = arith.constant 0 : i32
    %c0_i32_0 = arith.constant 0 : i32
    %c0_i32_1 = arith.constant 0 : i32
    return %c0_i32, %c0_i32_0 : i32, i32
  }
  func.func @transform_17(%arg0: i32) -> (i32, i32) {
    %c0_i32 = arith.constant 0 : i32
    %c0_i32_0 = arith.constant 0 : i32
    %c0_i32_1 = arith.constant 0 : i32
    return %c0_i32, %c0_i32_0 : i32, i32
  }
  func.func @transform_18(%arg0: i32) -> (i32, i32) {
    %c0_i32 = arith.constant 0 : i32
    %c0_i32_0 = arith.constant 0 : i32
    %c0_i32_1 = arith.constant 0 : i32
    return %c0_i32, %c0_i32_0 : i32, i32
  }
  func.func @transform_19(%arg0: i32) -> (i32, i32) {
    %c0_i32 = arith.constant 0 : i32
    %c0_i32_0 = arith.constant 0 : i32
    return %arg0, %c0_i32 : i32, i32
  }
  func.func @transform_20(%arg0: i32) -> (i32, i32) {
    %c0_i32 = arith.constant 0 : i32
    %c0_i32_0 = arith.constant 0 : i32
    return %arg0, %c0_i32 : i32, i32
  }
  func.func @transform_21(%arg0: i32) -> (i32, i32) {
    %c0_i32 = arith.constant 0 : i32
    %c0_i32_0 = arith.constant 0 : i32
    return %arg0, %c0_i32 : i32, i32
  }
  func.func @transform_22(%arg0: i32) -> (i32, i32, i32) {
    %c0_i32 = arith.constant 0 : i32
    %c0_i32_0 = arith.constant 0 : i32
    %c0_i32_1 = arith.constant 0 : i32
    return %arg0, %c0_i32, %c0_i32_0 : i32, i32, i32
  }
}

</mosaic_0001>

<bundles_post_ra>
// kernel: tpu_custom_call.1
= control target key start
LH: loop header
LB: loop body
LE: loop exit
PB: predicated region body
PF: predicated region fallthrough
CT: control target
= control target key end

     0   :  { %s6505_s0 = inlined_call_operand.hbm [shape: f32[256,128], index: 0, kind: input, shape index: {}]   ;;  %s6506_s1 = inlined_call_operand.hbm [shape: f32[256,128], index: 1, kind: input, shape index: {}]   ;;  %s6507_s2 = inlined_call_operand.hbm [shape: f32[128,128], index: 2, kind: input, shape index: {}]   ;;  %s6508_s3 = inlined_call_operand.vmem [shape: f32[1,128], index: 3, kind: input, shape index: {}]   ;;  %s6509_s4 = inlined_call_operand.hbm [shape: f32[128,128], index: 4, kind: input, shape index: {}]   ;;  %s6510_s5 = inlined_call_operand.vmem [shape: f32[1,128], index: 5, kind: input, shape index: {}]   ;;  %s6511_s6 = inlined_call_operand.hbm [shape: f32[128,128], index: 6, kind: input, shape index: {}]   ;;  %s6512_s7 = inlined_call_operand.hbm [shape: f32[128,128], index: 7, kind: input, shape index: {}]   ;;  %s6513_s8 = inlined_call_operand.vmem [shape: f32[1,128], index: 8, kind: input, shape index: {}]   ;;  %s6514_s9 = inlined_call_operand.hbm [shape: f32[128,128], index: 9, kind: input, shape index: {}]   ;;  %s6515_s10 = inlined_call_operand.vmem [shape: f32[1,128], index: 10, kind: input, shape index: {}]   ;;  %s6516_s11 = inlined_call_operand.hbm [shape: f32[128,128], index: 11, kind: input, shape index: {}]   ;;  %s6517_s12 = inlined_call_operand.vmem [shape: f32[1,128], index: 12, kind: input, shape index: {}]   ;;  %s6518_s13 = inlined_call_operand.hbm [shape: f32[128,128], index: 13, kind: input, shape index: {}]   ;;  %s6519_s14 = inlined_call_operand.vmem [shape: f32[1,128], index: 14, kind: input, shape index: {}]   ;;  %s6520_s15 = inlined_call_operand.hbm [shape: f32[128,128], index: 15, kind: input, shape index: {}]   ;;  %s6521_s16 = inlined_call_operand.vmem [shape: f32[1,128], index: 16, kind: input, shape index: {}]   ;;  %s6522_s17 = inlined_call_operand.hbm [shape: f32[128,128], index: 17, kind: input, shape index: {}]   ;;  %s6523_s18 = inlined_call_operand.vmem [shape: f32[1,128], index: 18, kind: input, shape index: {}]   ;;  %s6524_s19 = inlined_call_operand.hbm [shape: f32[256,128], index: 19, kind: output, shape index: {0}]   ;;  %s6525_s20 = inlined_call_operand.hbm [shape: f32[256,128], index: 20, kind: output, shape index: {1}]   ;;  %s6526_s21 = inlined_call_operand.hbm [shape: f32[256,128], index: 21, kind: output, shape index: {2}]   ;;  %s6527_s22 = inlined_call_operand.hbm [shape: f32[2,8,128], index: 22, kind: output, shape index: {3}]  }
   0x1   :  { %6556 = sst [smem:[#allocation36_spill]] %s6505_s0 }
   0x2   :  { %6557 = sst [smem:[#allocation37_spill]] %s6506_s1 }
   0x3   :  { %6558 = sst [smem:[#allocation38_spill]] %s6507_s2 }
   0x4   :  { %6559 = sst [smem:[#allocation39_spill]] %s6508_s3 }
   0x5   :  { %6560 = sst [smem:[#allocation40_spill]] %s6509_s4 }
   0x6   :  { %6561 = sst [smem:[#allocation41_spill]] %s6510_s5 }
   0x7   :  { %6562 = sst [smem:[#allocation42_spill]] %s6511_s6 }
   0x8   :  { %6563 = sst [smem:[#allocation43_spill]] %s6512_s7 }
   0x9   :  { %6564 = sst [smem:[#allocation44_spill]] %s6514_s9 }
   0xa   :  { %6565 = sst [smem:[#allocation45_spill]] %s6515_s10 }
   0xb   :  { %6566 = sst [smem:[#allocation46_spill]] %s6516_s11 }
   0xc   :  { %6567 = sst [smem:[#allocation47_spill]] %s6517_s12 }
   0xd   :  { %6568 = sst [smem:[#allocation48_spill]] %s6518_s13 }
   0xe   :  { %6569 = sst [smem:[#allocation49_spill]] %s6519_s14 }
   0xf   :  { %6570 = sst [smem:[#allocation50_spill]] %s6520_s15 }
  0x10   :  { %6571 = sst [smem:[#allocation51_spill]] %s6521_s16 }
  0x11   :  { %6572 = sst [smem:[#allocation52_spill]] %s6522_s17 }
  0x12   :  { %6573 = sst [smem:[#allocation53_spill]] %s6523_s18 }
  0x13   :  { %6574 = sst [smem:[#allocation54_spill]] %s6524_s19 }
  0x14   :  { %6575 = sst [smem:[#allocation55_spill]] %s6525_s20 }
  0x15   :  { %6576 = sst [smem:[#allocation56_spill]] %s6526_s21 }
  0x16   :  { %6577 = sst [smem:[#allocation57_spill]] %s6527_s22 }
  0x17   :  { %28 = vsyncpa [#allocation3], 0 }
  0x18   :  { %30 = vsyncpa [#allocation3 + $0x1], 0 }
  0x19   :  { %31 = vsyncpa [#allocation6], 0 }
  0x1a   :  { %33 = vsyncpa [#allocation6 + $0x1], 0 }
  0x1b   :  { %34 = vsyncpa [#allocation9], 0 }
  0x1c   :  { %35 = vsyncpa [#allocation12], 0 }
  0x1d   :  { %36 = vsyncpa [#allocation15], 0 }
  0x1e   :  { %37 = vsyncpa [#allocation18], 0 }
  0x1f   :  { %38 = vsyncpa [#allocation4], 0 }
  0x20   :  { %40 = vsyncpa [#allocation4 + $0x1], 0 }
  0x21   :  { %41 = vsyncpa [#allocation22], 0 }
  0x22   :  { %43 = vsyncpa [#allocation22 + $0x1], 0 }
  0x23   :  { %44 = vsyncpa [#allocation25], 0 }
  0x24   :  { %46 = vsyncpa [#allocation25 + $0x1], 0  ;;  %s5309_s3 = smov 0   ;;  %s5311_s28 = smov 0  }
  0x25   :  { %s5313_s29 = smov 0   ;;  %s5315_s30 = smov 0  }
  0x26 LB: > { %s5174_s4 = smov [#allocation7]   ;;  %s5330_s23 = sadd.s32 4294967295, %s5172_s30   ;;  %s5172_s30 = sphi %s5315_s30, %s6634_s30   ;;  %s5168_s29 = sphi %s5313_s29, %s6633_s29   ;;  %s5164_s28 = sphi %s5311_s28, %s6632_s28   ;;  %s5160_s3 = sphi %s5309_s3, %s6631_s3  }
  0x27   : > { %s582_s0 = sshll.u32 %s5174_s4, 4  ;;  %p3245_p0 = scmp.ge.s32.totalorder %s5172_s30, 1  ;;  %s5335_s0 = int_to_ptr.vmem [resolvable:$true] %s582_s0 }
  0x28   : > { %p6538_p1 = scmp.eq.s32.totalorder %s5330_s23, 0  ;;  %p570_p2 = scmp.lt.s32.totalorder %s5172_s30, 3 }
  0x29   : > { %s5175_s5 = smov [#allocation8]   ;;  %s5176_s25 = smov [#allocation11]  }
  0x2a   : > { %p5337_p3 = pnand %p3245_p0, %p570_p2  ;;  %s598_s24 = sshll.u32 %s5175_s5, 4  ;;  %s5350_s24 = int_to_ptr.vmem [resolvable:$true] %s598_s24 }
  0x2b   : > { %s627_s26 = sshll.u32 %s5176_s25, 4  ;;  %s6580_s4 = sld [smem:[#allocation38_spill]]  ;;  %s5352_s26 = int_to_ptr.vmem [resolvable:$true] %s627_s26 }
  0x2c   : > { %s6578_s1 = scalar_select %p5337_p3, 1, 0 }
  0x2d   : > { %p4485_p5 = pneg %p5337_p3 }
  0x2f   : > { %p5346_p6 = pnand %p4485_p5, %p6538_p1 }
  0x31   : > { %s4678_s22 = scalar_lea.hbm %s6580_s4, 2048  ;;  %p5362_p8 = pneg %p5346_p6 }
  0x32   : > { %p4679_p7 = scmp.ne.s32.totalorder %s6580_s4, %s4678_s22  ;;  %p4685_p11 = scmp.lt.u32.totalorder %s4678_s22, %s6580_s4 }
  0x34   : > { %p4681_p9 = pnand %p5362_p8, %p4679_p7 }
  0x36   : > { %p4682_p10 = pneg %p4681_p9 }
  0x38   : > { %p4687_p12 = pnand %p4685_p11, %p4682_p10 }
  0x3a   : > { %4690 = shalt.err (!%p4687_p12)
}
  0x3b   : > { %s4691_s19 = scalar_lea.vmem %s5335_s0, 2048  ;;  %p4699_p5 = scmp.lt.s32.totalorder %s5335_s0, %s5335_s0 }
  0x3c   : > { %p4692_p13 = scmp.ne.s32.totalorder %s5335_s0, %s4691_s19  ;;  %p4700_p4 = scmp.lt.s32.totalorder %s4691_s19, %s4691_s19 }
  0x3e   : > { %p4694_p0 = pnand %p4692_p13, %p5362_p8  ;;  %p4701_p7 = por %p4700_p4, %p4699_p5 }
  0x40   : > { %p4695_p2 = pneg %p4694_p0 }
  0x42   : > { %p4702_p9 = pnand %p4701_p7, %p4695_p2 }
  0x44   : > { %4705 = shalt.err (!%p4702_p9)
}
  0x45   : > { %s6541_s21 = smov 128   ;;  %s6543_s20 = smov 8  }
  0x46   : > { %4488 = dma.hbm_to_vmem [thread:$0]  (!%p5346_p6), %s6580_s4, 2048, %s5335_s0, [#allocation6], %s6541_s21, %s6541_s21, %s6543_s20  }
  0x47   : > { %s6582_s18 = sld [smem:[#allocation40_spill]] }
  0x4d   : > { %s4706_s19 = scalar_lea.hbm %s6582_s18, 2048 }
  0x4e   : > { %p4707_p4 = scmp.ne.s32.totalorder %s6582_s18, %s4706_s19  ;;  %p4713_p12 = scmp.lt.u32.totalorder %s4706_s19, %s6582_s18 }
  0x50   : > { %p4709_p10 = pnand %p4707_p4, %p5362_p8 }
  0x52   : > { %p4710_p11 = pneg %p4709_p10 }
  0x54   : > { %p4715_p13 = pnand %p4713_p12, %p4710_p11 }
  0x56   : > { %4718 = shalt.err (!%p4715_p13)
}
  0x57   : > { %s4719_s0 = scalar_lea.vmem %s5350_s24, 2048  ;;  %p4727_p7 = scmp.lt.s32.totalorder %s5350_s24, %s5350_s24 }
  0x58   : > { %p4720_p0 = scmp.ne.s32.totalorder %s5350_s24, %s4719_s0  ;;  %p4728_p9 = scmp.lt.s32.totalorder %s4719_s0, %s4719_s0 }
  0x5a   : > { %p4722_p2 = pnand %p4720_p0, %p5362_p8  ;;  %p4729_p4 = por %p4728_p9, %p4727_p7 }
  0x5c   : > { %p4723_p5 = pneg %p4722_p2 }
  0x5e   : > { %p4730_p10 = pnand %p4729_p4, %p4723_p5 }
  0x60   : > { %4733 = shalt.err (!%p4730_p10)
}
  0x61   : > { %4491 = dma.hbm_to_vmem [thread:$0]  (!%p5346_p6), %s6582_s18, 2048, %s5350_s24, [#allocation9], %s6541_s21, %s6541_s21, %s6543_s20  }
  0x62   : > { %s6583_s7 = sld [smem:[#allocation43_spill]] }
  0x68   : > { %s4734_s22 = scalar_lea.hbm %s6583_s7, 2048 }
  0x69   : > { %p4735_p11 = scmp.ne.s32.totalorder %s6583_s7, %s4734_s22  ;;  %p4741_p0 = scmp.lt.u32.totalorder %s4734_s22, %s6583_s7 }
  0x6b   : > { %p4737_p12 = pnand %p4735_p11, %p5362_p8 }
  0x6d   : > { %p4738_p13 = pneg %p4737_p12 }
  0x6f   : > { %p4743_p2 = pnand %p4741_p0, %p4738_p13 }
  0x71   : > { %4746 = shalt.err (!%p4743_p2)
}
  0x72   : > { %s4747_s24 = scalar_lea.vmem %s5352_s26, 2048  ;;  %p4755_p4 = scmp.lt.s32.totalorder %s5352_s26, %s5352_s26 }
  0x73   : > { %p4748_p5 = scmp.ne.s32.totalorder %s5352_s26, %s4747_s24  ;;  %p4756_p10 = scmp.lt.s32.totalorder %s4747_s24, %s4747_s24 }
  0x75   : > { %p4750_p7 = pnand %p4748_p5, %p5362_p8  ;;  %p4757_p11 = por %p4756_p10, %p4755_p4 }
  0x77   : > { %p4751_p9 = pneg %p4750_p7 }
  0x79   : > { %p4758_p12 = pnand %p4757_p11, %p4751_p9 }
  0x7b   : > { %4761 = shalt.err (!%p4758_p12)
}
  0x7c   : > { %4497 = dma.hbm_to_vmem [thread:$0]  (!%p5346_p6), %s6583_s7, 2048, %s5352_s26, [#allocation12], %s6541_s21, %s6541_s21, %s6543_s20  }
  0x7d   : > { %s5179_s12 = smov [#allocation14]   ;;  %s5180_s16 = smov [#allocation17]  }
  0x7e   : > { %s659_s14 = sshll.u32 %s5179_s12, 4  ;;  %s691_s22 = sshll.u32 %s5180_s16, 4  ;;  %s660_s14 = int_to_ptr.vmem [resolvable:$true] %s659_s14  ;;  %s692_s22 = int_to_ptr.vmem [resolvable:$true] %s691_s22 }
  0x7f   : > { %s6584_s11 = sld [smem:[#allocation46_spill]] }
  0x85   : > { %s4762_s25 = scalar_lea.hbm %s6584_s11, 2048 }
  0x86   : > { %p4763_p13 = scmp.ne.s32.totalorder %s6584_s11, %s4762_s25  ;;  %p4769_p5 = scmp.lt.u32.totalorder %s4762_s25, %s6584_s11 }
  0x88   : > { %p4765_p0 = pnand %p4763_p13, %p5362_p8 }
  0x8a   : > { %p4766_p2 = pneg %p4765_p0 }
  0x8c   : > { %p4771_p7 = pnand %p4769_p5, %p4766_p2 }
  0x8e   : > { %4774 = shalt.err (!%p4771_p7)
}
  0x8f   : > { %s4775_s26 = scalar_lea.vmem %s660_s14, 2048  ;;  %p4783_p11 = scmp.lt.s32.totalorder %s660_s14, %s660_s14 }
  0x90   : > { %p4776_p9 = scmp.ne.s32.totalorder %s660_s14, %s4775_s26  ;;  %p4784_p12 = scmp.lt.s32.totalorder %s4775_s26, %s4775_s26 }
  0x92   : > { %p4778_p4 = pnand %p4776_p9, %p5362_p8  ;;  %p4785_p1 = por %p4784_p12, %p4783_p11 }
  0x94   : > { %p4779_p10 = pneg %p4778_p4 }
  0x96   : > { %p4786_p3 = pnand %p4785_p1, %p4779_p10 }
  0x98   : > { %4789 = shalt.err (!%p4786_p3)
}
  0x99   : > { %4503 = dma.hbm_to_vmem [thread:$0]  (!%p5346_p6), %s6584_s11, 2048, %s660_s14, [#allocation15], %s6541_s21, %s6541_s21, %s6543_s20  }
  0x9a   : > { %s6585_s15 = sld [smem:[#allocation50_spill]] }
  0xa0   : > { %s4790_s2 = scalar_lea.hbm %s6585_s15, 2048 }
  0xa1   : > { %p4791_p1 = scmp.ne.s32.totalorder %s6585_s15, %s4790_s2  ;;  %p4797_p0 = scmp.lt.u32.totalorder %s4790_s2, %s6585_s15 }
  0xa3   : > { %p4793_p3 = pnand %p4791_p1, %p5362_p8 }
  0xa5   : > { %p4794_p13 = pneg %p4793_p3 }
  0xa7   : > { %p4799_p2 = pnand %p4797_p0, %p4794_p13 }
  0xa9   : > { %4802 = shalt.err (!%p4799_p2)
}
  0xaa   : > { %s4803_s0 = scalar_lea.vmem %s692_s22, 2048  ;;  %p4811_p4 = scmp.lt.s32.totalorder %s692_s22, %s692_s22 }
  0xab   : > { %p4804_p5 = scmp.ne.s32.totalorder %s692_s22, %s4803_s0  ;;  %p4812_p10 = scmp.lt.s32.totalorder %s4803_s0, %s4803_s0 }
  0xad   : > { %p4806_p7 = pnand %p4804_p5, %p5362_p8  ;;  %p4813_p11 = por %p4812_p10, %p4811_p4 }
  0xaf   : > { %p4807_p9 = pneg %p4806_p7 }
  0xb1   : > { %p4814_p12 = pnand %p4813_p11, %p4807_p9 }
  0xb3   : > { %4817 = shalt.err (!%p4814_p12)
}
  0xb4   : > { %4509 = dma.hbm_to_vmem [thread:$0]  (!%p5346_p6), %s6585_s15, 2048, %s692_s22, [#allocation18], %s6541_s21, %s6541_s21, %s6543_s20  }
  0xb5   : > { %s5181_s4 = smov [#allocation10]   ;;  %s5182_s12 = smov [#allocation13]  }
  0xb6   : > { %s614_s10 = sshll.u32 %s5181_s4, 4  ;;  %s643_s16 = sshll.u32 %s5182_s12, 4  ;;  %s615_s10 = int_to_ptr.vmem [resolvable:$true] %s614_s10  ;;  %s644_s16 = int_to_ptr.vmem [resolvable:$true] %s643_s16 }
  0xb7   : > { %s6586_s25 = sld [smem:[#allocation42_spill]] }
  0xbd   : > { %s4818_s19 = scalar_lea.hbm %s6586_s25, 2048 }
  0xbe   : > { %p4819_p1 = scmp.ne.s32.totalorder %s6586_s25, %s4818_s19  ;;  %p4825_p0 = scmp.lt.u32.totalorder %s4818_s19, %s6586_s25 }
  0xc0   : > { %p4821_p3 = pnand %p4819_p1, %p5362_p8 }
  0xc2   : > { %p4822_p13 = pneg %p4821_p3 }
  0xc4   : > { %p4827_p2 = pnand %p4825_p0, %p4822_p13 }
  0xc6   : > { %4830 = shalt.err (!%p4827_p2)
}
  0xc7   : > { %s4831_s22 = scalar_lea.vmem %s615_s10, 2048  ;;  %p4839_p4 = scmp.lt.s32.totalorder %s615_s10, %s615_s10 }
  0xc8   : > { %p4832_p5 = scmp.ne.s32.totalorder %s615_s10, %s4831_s22  ;;  %p4840_p10 = scmp.lt.s32.totalorder %s4831_s22, %s4831_s22 }
  0xca   : > { %p4834_p7 = pnand %p4832_p5, %p5362_p8  ;;  %p4841_p11 = por %p4840_p10, %p4839_p4 }
  0xcc   : > { %p4835_p9 = pneg %p4834_p7 }
  0xce   : > { %p4842_p12 = pnand %p4841_p11, %p4835_p9 }
  0xd0   : > { %4845 = shalt.err (!%p4842_p12)
}
  0xd1   : > { %4494 = dma.hbm_to_vmem [thread:$0]  (!%p5346_p6), %s6586_s25, 2048, %s615_s10, [#allocation9], %s6541_s21, %s6541_s21, %s6543_s20  }
  0xd2   : > { %s6587_s9 = sld [smem:[#allocation44_spill]] }
  0xd8   : > { %s4846_s2 = scalar_lea.hbm %s6587_s9, 2048 }
  0xd9   : > { %p4847_p1 = scmp.ne.s32.totalorder %s6587_s9, %s4846_s2  ;;  %p4853_p0 = scmp.lt.u32.totalorder %s4846_s2, %s6587_s9 }
  0xdb   : > { %p4849_p3 = pnand %p4847_p1, %p5362_p8 }
  0xdd   : > { %p4850_p13 = pneg %p4849_p3 }
  0xdf   : > { %p4855_p2 = pnand %p4853_p0, %p4850_p13 }
  0xe1   : > { %4858 = shalt.err (!%p4855_p2)
}
  0xe2   : > { %s4859_s14 = scalar_lea.vmem %s644_s16, 2048  ;;  %p4867_p4 = scmp.lt.s32.totalorder %s644_s16, %s644_s16 }
  0xe3   : > { %p4860_p5 = scmp.ne.s32.totalorder %s644_s16, %s4859_s14  ;;  %p4868_p10 = scmp.lt.s32.totalorder %s4859_s14, %s4859_s14 }
  0xe5   : > { %p4862_p7 = pnand %p4860_p5, %p5362_p8  ;;  %p4869_p11 = por %p4868_p10, %p4867_p4 }
  0xe7   : > { %p4863_p9 = pneg %p4862_p7 }
  0xe9   : > { %p4870_p12 = pnand %p4869_p11, %p4863_p9 }
  0xeb   : > { %4873 = shalt.err (!%p4870_p12)
}
  0xec   : > { %4500 = dma.hbm_to_vmem [thread:$0]  (!%p5346_p6), %s6587_s9, 2048, %s644_s16, [#allocation12], %s6541_s21, %s6541_s21, %s6543_s20  }
  0xed   : > { %s5183_s7 = smov [#allocation16]   ;;  %s5184_s4 = smov [#allocation19]  }
  0xee   : > { %s675_s26 = sshll.u32 %s5183_s7, 4  ;;  %s707_s12 = sshll.u32 %s5184_s4, 4  ;;  %s676_s26 = int_to_ptr.vmem [resolvable:$true] %s675_s26  ;;  %s708_s12 = int_to_ptr.vmem [resolvable:$true] %s707_s12 }
  0xef   : > { %s6588_s13 = sld [smem:[#allocation48_spill]] }
  0xf5   : > { %s4874_s19 = scalar_lea.hbm %s6588_s13, 2048 }
  0xf6   : > { %p4875_p1 = scmp.ne.s32.totalorder %s6588_s13, %s4874_s19  ;;  %p4881_p0 = scmp.lt.u32.totalorder %s4874_s19, %s6588_s13 }
  0xf8   : > { %p4877_p3 = pnand %p4875_p1, %p5362_p8 }
  0xfa   : > { %p4878_p13 = pneg %p4877_p3 }
  0xfc   : > { %p4883_p2 = pnand %p4881_p0, %p4878_p13 }
  0xfe   : > { %4886 = shalt.err (!%p4883_p2)
}
  0xff   : > { %s4887_s16 = scalar_lea.vmem %s676_s26, 2048  ;;  %p4895_p4 = scmp.lt.s32.totalorder %s676_s26, %s676_s26 }
 0x100   : > { %p4888_p5 = scmp.ne.s32.totalorder %s676_s26, %s4887_s16  ;;  %p4896_p10 = scmp.lt.s32.totalorder %s4887_s16, %s4887_s16 }
 0x102   : > { %p4890_p7 = pnand %p4888_p5, %p5362_p8  ;;  %p4897_p11 = por %p4896_p10, %p4895_p4 }
 0x104   : > { %p4891_p9 = pneg %p4890_p7 }
 0x106   : > { %p4898_p12 = pnand %p4897_p11, %p4891_p9 }
 0x108   : > { %4901 = shalt.err (!%p4898_p12)
}
 0x109   : > { %4506 = dma.hbm_to_vmem [thread:$0]  (!%p5346_p6), %s6588_s13, 2048, %s676_s26, [#allocation15], %s6541_s21, %s6541_s21, %s6543_s20  }
 0x10a   : > { %s6589_s17 = sld [smem:[#allocation52_spill]] }
 0x110   : > { %s4902_s27 = scalar_lea.hbm %s6589_s17, 2048 }
 0x111   : > { %p4903_p1 = scmp.ne.s32.totalorder %s6589_s17, %s4902_s27  ;;  %p4909_p0 = scmp.lt.u32.totalorder %s4902_s27, %s6589_s17 }
 0x113   : > { %p4905_p3 = pnand %p4903_p1, %p5362_p8 }
 0x115   : > { %p4906_p13 = pneg %p4905_p3 }
 0x117   : > { %p4911_p2 = pnand %p4909_p0, %p4906_p13 }
 0x119   : > { %4914 = shalt.err (!%p4911_p2)
}
 0x11a   : > { %s4915_s10 = scalar_lea.vmem %s708_s12, 2048  ;;  %p4923_p4 = scmp.lt.s32.totalorder %s708_s12, %s708_s12 }
 0x11b   : > { %p4916_p5 = scmp.ne.s32.totalorder %s708_s12, %s4915_s10  ;;  %p4924_p10 = scmp.lt.s32.totalorder %s4915_s10, %s4915_s10 }
 0x11d   : > { %p4918_p7 = pnand %p4916_p5, %p5362_p8  ;;  %p4925_p11 = por %p4924_p10, %p4923_p4 }
 0x11f   : > { %p4919_p9 = pneg %p4918_p7 }
 0x121   : > { %p4926_p12 = pnand %p4925_p11, %p4919_p9 }
 0x123   : > { %4929 = shalt.err (!%p4926_p12)
}
 0x124   : > { %4512 = dma.hbm_to_vmem [thread:$0]  (!%p5346_p6), %s6589_s17, 2048, %s708_s12, [#allocation18], %s6541_s21, %s6541_s21, %s6543_s20  }
 0x125   : > { %s6540_s6 = sadd.s32 4294967294, %s5172_s30   ;;  %s5566_s5 = sadd.s32 1, %s5172_s30  }
 0x126   : > { %s59_s22 = sadd.s32 1, %s5168_s29  ;;  %s56_s7 = ssub.s32 %s5172_s30, %s5566_s5 }
 0x127   : > { %p66_p8 = scmp.ne.s32.totalorder %s5168_s29, %s5164_s28  ;;  %p57_p1 = scmp.eq.s32.totalorder %s56_s7, 0 }
 0x128   : > { %p67_p3 = scmp.eq.s32.totalorder %s5172_s30, 0  ;;  %p72_p13 = scmp.ne.s32.totalorder %s5164_s28, %s5160_s3 }
 0x129   : > { %p479_p0 = scmp.eq.s32.totalorder %s5330_s23, 1  ;;  %p6590_p5 = scmp.eq.s32.totalorder %s5330_s23, 0 }
 0x12a   : > { %s5578_s4 = scalar_select %p57_p1, %s5168_s29, %s59_s22  }
 0x12b   : > { %p68_p2 = por %p67_p3, %p66_p8  ;;  %p5582_p7 = por %p6590_p5, %p72_p13 }
 0x12c   : > { %p5586_p6 = por %p479_p0, %p66_p8  ;;  %p485_p9 = scmp.eq.s32.totalorder %s6540_s6, 1 }
 0x12d   : > { %p4542_p4 = scmp.lt.s32.totalorder %s5172_s30, 2  ;;  %s724_s27 = sand.u32 1, %s5168_s29  }
 0x12e   : > { %s6592_s12 = scalar_select %p5586_p6, 1, 0 }
 0x12f   : > { %p5594_p10 = por %p485_p9, %p72_p13  ;;  %s5598_s24 = sshll.u32 %s724_s27, 7 }
 0x130   : > { %s3316_s0 = sshll.u32 %s5172_s30, 11  ;;  %s6594_s26 = sld [smem:[#allocation36_spill]] }
 0x131   : > { %s6593_s19 = scalar_select %p5594_p10, 1, 0 }
 0x132   : > { %s728_s22 = scalar_lea.vmem [#allocation2], %s5598_s24  ;;  %p5607_p11 = pnand %p4542_p4, %p68_p2 }
 0x133   : > { %s735_s7 = sshll.u32 %s728_s22, 4  ;;  %s6596_s9 = sld [smem:[#allocation37_spill]]  ;;  %s5611_s7 = int_to_ptr.vmem [resolvable:$true] %s735_s7 }
 0x134   : > { %s5618_s10 = scalar_lea.sflag [#allocation3], %s724_s27  ;;  %p4932_p8 = pneg %p5607_p11 }
 0x136   : > { %s5604_s16 = scalar_lea.hbm %s6594_s26, %s3316_s0  ;;  %s4935_s15 = scalar_lea.hbm %s6594_s26, 4096 }
 0x137   : > { %s4930_s11 = scalar_lea.hbm %s5604_s16, 2048  ;;  %p4936_p13 = scmp.lt.u32.totalorder %s5604_s16, %s6594_s26 }
 0x138   : > { %p4931_p12 = scmp.ne.s32.totalorder %s5604_s16, %s4930_s11  ;;  %p4937_p0 = scmp.lt.u32.totalorder %s4935_s15, %s4930_s11 }
 0x139   : > { %s5616_s14 = scalar_lea.hbm %s6596_s9, %s3316_s0  ;;  %p4939_p5 = scmp.lt.u32.totalorder %s4930_s11, %s5604_s16 }
 0x13a   : > { %p4933_p1 = pnand %p4932_p8, %p4931_p12  ;;  %p4938_p2 = por %p4937_p0, %p4936_p13 }
 0x13c   : > { %p4934_p3 = pneg %p4933_p1  ;;  %p4940_p9 = por %p4939_p5, %p4938_p2 }
 0x13e   : > { %p4941_p4 = pnand %p4940_p9, %p4934_p3 }
 0x140   : > { %4944 = shalt.err (!%p4941_p4)
}
 0x141   : > { %s4945_s21 = scalar_lea.vmem %s5611_s7, 2048  ;;  %s5185_s13 = smov [#allocation2]  }
 0x142   : > { %p4946_p12 = scmp.ne.s32.totalorder %s5611_s7, %s4945_s21  ;;  %s4950_s20 = sshll.u32 %s5185_s13, 4  ;;  %s4951_s20 = int_to_ptr.vmem [resolvable:$false] %s4950_s20 }
 0x143   : > { %s4952_s17 = scalar_lea.vmem %s4951_s20, 4096  ;;  %p4953_p6 = scmp.lt.s32.totalorder %s5611_s7, %s4951_s20 }
 0x144   : > { %p4948_p1 = pnand %p4946_p12, %p4932_p8  ;;  %p4954_p13 = scmp.lt.s32.totalorder %s4952_s17, %s4945_s21 }
 0x146   : > { %p4949_p10 = pneg %p4948_p1  ;;  %p4955_p0 = por %p4954_p13, %p4953_p6 }
 0x148   : > { %p4956_p2 = pnand %p4955_p0, %p4949_p10 }
 0x14a   : > { %4959 = shalt.err (!%p4956_p2)
}
 0x14b   : > { %s6597_s11 = smov 8   ;;  %s6598_s15 = smov 128  }
 0x14c   : > { %4516 = dma.hbm_to_vmem [thread:$0]  (!%p5607_p11), %s5604_s16, 2048, %s5611_s7, %s5618_s10, %s6598_s15, %s6598_s15, %s6597_s11  }
 0x14d   : > { %s749_s18 = scalar_lea.vmem [#allocation5], %s5598_s24  ;;  %s745_s0 = sand.u32 1, %s5172_s30  }
 0x14e   : > { %s756_s27 = sshll.u32 %s749_s18, 4  ;;  %s5653_s22 = scalar_lea.sflag [#allocation6], %s745_s0  ;;  %s5651_s27 = int_to_ptr.vmem [resolvable:$true] %s756_s27 }
 0x14f   : > { %s4960_s21 = scalar_lea.hbm %s5616_s14, 2048  ;;  %s4965_s17 = scalar_lea.hbm %s6596_s9, 4096 }
 0x150   : > { %p4961_p6 = scmp.ne.s32.totalorder %s5616_s14, %s4960_s21  ;;  %p4966_p5 = scmp.lt.u32.totalorder %s5616_s14, %s6596_s9 }
 0x151   : > { %p4967_p9 = scmp.lt.u32.totalorder %s4965_s17, %s4960_s21  ;;  %p4969_p12 = scmp.lt.u32.totalorder %s4960_s21, %s5616_s14 }
 0x152   : > { %p4963_p10 = pnand %p4961_p6, %p4932_p8 }
 0x153   : > { %p4968_p4 = por %p4967_p9, %p4966_p5 }
 0x154   : > { %p4964_p3 = pneg %p4963_p10 }
 0x155   : > { %p4970_p1 = por %p4969_p12, %p4968_p4 }
 0x157   : > { %p4971_p13 = pnand %p4970_p1, %p4964_p3 }
 0x159   : > { %4974 = shalt.err (!%p4971_p13)
}
 0x15a   : > { %s4975_s24 = scalar_lea.vmem %s5651_s27, 2048  ;;  %s5186_s16 = smov [#allocation5]  }
 0x15b   : > { %p4976_p0 = scmp.ne.s32.totalorder %s5651_s27, %s4975_s24  ;;  %s4980_s7 = sshll.u32 %s5186_s16, 4  ;;  %s4981_s7 = int_to_ptr.vmem [resolvable:$false] %s4980_s7 }
 0x15c   : > { %s4982_s25 = scalar_lea.vmem %s4981_s7, 4096  ;;  %p4983_p10 = scmp.lt.s32.totalorder %s5651_s27, %s4981_s7 }
 0x15d   : > { %p4978_p2 = pnand %p4976_p0, %p4932_p8  ;;  %p4984_p5 = scmp.lt.s32.totalorder %s4982_s25, %s4975_s24 }
 0x15f   : > { %p4979_p6 = pneg %p4978_p2  ;;  %p4985_p9 = por %p4984_p5, %p4983_p10 }
 0x161   : > { %p4986_p4 = pnand %p4985_p9, %p4979_p6 }
 0x163   : > { %4989 = shalt.err (!%p4986_p4)
}
 0x164   : > { %4519 = dma.hbm_to_vmem [thread:$0]  (!%p5607_p11), %s5616_s14, 2048, %s5651_s27, %s5653_s22, %s6598_s15, %s6598_s15, %s6597_s11  }
 0x165   : > { %p6599_p8 = scmp.ne.s32.totalorder %s6578_s1, 0 }
 0x166   : > { %s5685_s26 = sand.u32 (!%p6599_p8), 1, %s5164_s28  }
 0x167   : > { %768 = sbr.rel (%p6599_p8) target bundleno = 2038 (0x7f6), region = 96  ;;  %s5688_s10 = sshll.u32 (!%p6599_p8), %s5685_s26, 7 }
 0x168   : > { %s771_s6 = scalar_lea.sflag (!%p6599_p8), [#allocation3], %s5685_s26  ;;  %s5692_s18 = scalar_lea.vmem (!%p6599_p8), [#allocation2], %s5688_s10 }
 0x16e   : > { %5119 = dma.done.wait (%p5582_p7), %s771_s6, 2048  }
 0x16f   : > { %5121 = vsyncadd (%p5582_p7), %s771_s6, 4294965248  ;;  %s779_s1 = sand.u32 1, %s5330_s23   ;;  %s5702_s11 = scalar_lea.vmem [#allocation5], %s5688_s10 }
 0x170   : > { %s780_s14 = scalar_lea.sflag [#allocation6], %s779_s1 }
 0x171   : > { %5123 = dma.done.wait (%p5582_p7), %s780_s14, 2048  }
 0x172   : > { %5125 = vsyncadd (%p5582_p7), %s780_s14, 4294965248  ;;  %p6600_p11 = scmp.eq.s32.totalorder %s5330_s23, 0 }
 0x174   : > { %5127 = dma.done.wait (%p6600_p11), [#allocation6], 2048   ;;  %p6601_p3 = pmov %p6600_p11 }
 0x176   : > { %5129 = vsyncadd (%p6601_p3), [#allocation6], 4294965248  ;;  %p6602_p12 = pmov %p6601_p3 }
 0x177   : > { %p6603_p1 = pmov %p6601_p3 }
 0x178   : > { %5131 = dma.done.wait (%p6602_p12), [#allocation9], 4096  }
 0x179   : > { %5133 = vsyncadd (%p6603_p1), [#allocation9], 4294963200  ;;  %p6604_p13 = pmov %p6603_p1 }
 0x17a   : > { %p6605_p0 = pmov %p6603_p1 }
 0x17b   : > { %5135 = dma.done.wait (%p6604_p13), [#allocation12], 4096  }
 0x17c   : > { %5137 = vsyncadd (%p6605_p0), [#allocation12], 4294963200  ;;  %p6606_p7 = pmov %p6605_p0 }
 0x17d   : > { %p6607_p2 = pmov %p6605_p0 }
 0x17e   : > { %5139 = dma.done.wait (%p6606_p7), [#allocation15], 4096  }
 0x17f   : > { %5141 = vsyncadd (%p6607_p2), [#allocation15], 4294963200  ;;  %p6608_p6 = pmov %p6605_p0 }
 0x180   : > { %p6609_p10 = pmov %p6605_p0 }
 0x181   : > { %5143 = dma.done.wait (%p6608_p6), [#allocation18], 4096  }
 0x182   : > { %5145 = vsyncadd (%p6609_p10), [#allocation18], 4294963200  ;;  %v921_v0 = vld [vmem:[#allocation7] sm:$0xff]  ;;  %v922_v1 = vld [vmem:[#allocation7 + $0x8] sm:$0xff]  ;;  %s6610_s27 = sld [smem:[#allocation39_spill]]  ;;  %s6611_s21 = sld [smem:[#allocation41_spill]] }
 0x183   : > { %v923_v2 = vld [vmem:[#allocation7 + $0x10] sm:$0xff]  ;;  %v4113_v3 = vpack.c.bf16 %v922_v1, %v921_v0  ;;  %v924_v4 = vld [vmem:[#allocation7 + $0x18] sm:$0xff]  ;;  %v925_v6 = vld [vmem:[#allocation7 + $0x20] sm:$0xff]  ;;  %s6612_s16 = sld [smem:[#allocation45_spill]]  ;;  %s5900_s7 = scalar_lea.vmem [#allocation20], %s5688_s10 }
 0x184   : > { %v4117_v5 = vpack.c.bf16 %v924_v4, %v923_v2  ;;  %v926_v7 = vld [vmem:[#allocation7 + $0x28] sm:$0xff]  ;;  %v905_v9 = vld [vmem:[%s5692_s18] sm:$0xff]  ;;  %v927_v10 = vld [vmem:[#allocation7 + $0x30] sm:$0xff]  ;;  %s6555_s14 = sshll.u32 %s5330_s23, 7  ;;  %s6619_s17 = sld [smem:[#allocation53_spill]] }
 0x185   : > { %4114 = vmatprep.subr.bf16.mxu0 %v4113_v3  ;;  %v4121_v8 = vpack.c.bf16 %v926_v7, %v925_v6  ;;  %v928_v11 = vld [vmem:[#allocation7 + $0x38] sm:$0xff]  ;;  %3641 = vmatprep.mubr.f32.mxu0 %v905_v9  ;;  %v929_v13 = vld [vmem:[#allocation7 + $0x40] sm:$0xff]  ;;  %v930_v14 = vld [vmem:[#allocation7 + $0x48] sm:$0xff]  ;;  %s6264_s24 = scalar_lea.vmem [#allocation21], %s5688_s10  ;;  %s6622_s6 = sld [smem:[#allocation55_spill]] }
 0x186   : > { %4116 = vmatpush3.bf16.msra.mxu0 %v4113_v3  ;;  %v4125_v12 = vpack.c.bf16 %v928_v11, %v927_v10  ;;  %v1105_v15 = vld [vmem:[#allocation8] sm:$0xff]  ;;  %v1106_v16 = vld [vmem:[#allocation8 + $0x8] sm:$0xff]  ;;  %v1107_v17 = vld [vmem:[#allocation8 + $0x10] sm:$0xff]  ;;  %v4129_v21 = vpack.c.bf16 %v930_v14, %v929_v13  ;;  %s2941_s2 = sshll.u32 %s6264_s24, 4  ;;  %s6623_s0 = sld [smem:[#allocation56_spill]]  ;;  %s6352_s2 = int_to_ptr.vmem [resolvable:$true] %s2941_s2 }
 0x187   : > { %4118 = vmatprep.subr.bf16.mxu0 %v4117_v5  ;;  %v1108_v18 = vld [vmem:[#allocation8 + $0x18] sm:$0xff]  ;;  %v4145_v19 = vpack.c.bf16 %v1106_v16, %v1105_v15  ;;  %v1109_v22 = vld [vmem:[#allocation8 + $0x20] sm:$0xff]  ;;  %v1110_v23 = vld [vmem:[#allocation8 + $0x28] sm:$0xff]  ;;  %s4990_s13 = scalar_lea.vmem %s6352_s2, 2048  ;;  %p6624_p9 = scmp.ne.s32.totalorder %s6592_s12, 0 }
 0x188   : > { %v4149_v20 = vpack.c.bf16 %v1108_v18, %v1107_v17  ;;  %v931_v24 = vld [vmem:[#allocation7 + $0x50] sm:$0xff]  ;;  %v932_v25 = vld [vmem:[#allocation7 + $0x58] sm:$0xff]  ;;  %v4153_v26 = vpack.c.bf16 %v1110_v23, %v1109_v22  ;;  %v933_v30 = vld [vmem:[#allocation7 + $0x60] sm:$0xff]  ;;  %p4991_p5 = scmp.ne.s32.totalorder %s6352_s2, %s4990_s13  ;;  %s5188_s20 = smov [#allocation21]  }
 0x189   : > { %4146 = vmatprep.subr.bf16.mxu1 %v4145_v19  ;;  %v4133_v27 = vpack.c.bf16 %v932_v25, %v931_v24  ;;  %v1111_v28 = vld [vmem:[#allocation8 + $0x30] sm:$0xff]  ;;  %v1112_v29 = vld [vmem:[#allocation8 + $0x38] sm:$0xff]  ;;  %v934_v31 = vld [vmem:[#allocation7 + $0x68] sm:$0xff] }
 0x18a   : > { %4120 = vmatpush3.bf16.msra.mxu0 %v4117_v5  ;;  %4148 = vmatpush3.bf16.msra.mxu1 %v4145_v19  ;;  %v4157_v32 = vpack.c.bf16 %v1112_v29, %v1111_v28  ;;  %v4137_v33 = vpack.c.bf16 %v934_v31, %v933_v30  ;;  %v1113_v34 = vld [vmem:[#allocation8 + $0x40] sm:$0xff]  ;;  %v1114_v35 = vld [vmem:[#allocation8 + $0x48] sm:$0xff]  ;;  %v935_v36 = vld [vmem:[#allocation7 + $0x70] sm:$0xff]  ;;  %p4992_p4 = pnand %p4991_p5, %p6624_p9 }
 0x18b   : > { %4122 = vmatprep.subr.bf16.mxu0 %v4121_v8  ;;  %4150 = vmatprep.subr.bf16.mxu1 %v4149_v20  ;;  %v936_v37 = vld [vmem:[#allocation7 + $0x78] sm:$0xff]  ;;  %v4161_v38 = vpack.c.bf16 %v1114_v35, %v1113_v34  ;;  %v1115_v40 = vld [vmem:[#allocation8 + $0x50] sm:$0xff]  ;;  %v1117_v43 = vld [vmem:[#allocation8 + $0x60] sm:$0xff] }
 0x18c   : > { %v4141_v39 = vpack.c.bf16 %v936_v37, %v935_v36  ;;  %v1116_v41 = vld [vmem:[#allocation8 + $0x58] sm:$0xff]  ;;  %v1118_v44 = vld [vmem:[#allocation8 + $0x68] sm:$0xff]  ;;  %v907_v47 = vld [vmem:[%s5692_s18 + $0x10] sm:$0xff]  ;;  %p4993_p8 = pneg %p4992_p4 }
 0x18d   : > { %v4165_v42 = vpack.c.bf16 %v1116_v41, %v1115_v40  ;;  %v906_v45 = vld [vmem:[%s5692_s18 + $0x8] sm:$0xff]  ;;  %v4169_v46 = vpack.c.bf16 %v1118_v44, %v1117_v43  ;;  %v908_v48 = vld [vmem:[%s5692_s18 + $0x18] sm:$0xff]  ;;  %v909_v49 = vld [vmem:[%s5692_s18 + $0x20] sm:$0xff] }
 0x18e   : > { %4124 = vmatpush3.bf16.msra.mxu0 %v4121_v8  ;;  %4152 = vmatpush3.bf16.msra.mxu1 %v4149_v20  ;;  %v910_v50 = vld [vmem:[%s5692_s18 + $0x28] sm:$0xff]  ;;  %v911_v51 = vld [vmem:[%s5692_s18 + $0x30] sm:$0xff]  ;;  %v912_v52 = vld [vmem:[%s5692_s18 + $0x38] sm:$0xff] }
 0x18f   : > { %4126 = vmatprep.subr.bf16.mxu0 %v4125_v12  ;;  %4154 = vmatprep.subr.bf16.mxu1 %v4153_v26  ;;  %v913_v53 = vld [vmem:[%s5692_s18 + $0x40] sm:$0xff]  ;;  %v914_v54 = vld [vmem:[%s5692_s18 + $0x48] sm:$0xff]  ;;  %v915_v55 = vld [vmem:[%s5692_s18 + $0x50] sm:$0xff] }
 0x190   : > { %v916_v56 = vld [vmem:[%s5692_s18 + $0x58] sm:$0xff]  ;;  %v917_v57 = vld [vmem:[%s5692_s18 + $0x60] sm:$0xff]  ;;  %v918_v58 = vld [vmem:[%s5692_s18 + $0x68] sm:$0xff] }
 0x191   : > { %v919_v59 = vld [vmem:[%s5692_s18 + $0x70] sm:$0xff]  ;;  %v920_v60 = vld [vmem:[%s5692_s18 + $0x78] sm:$0xff]  ;;  %v1321_v0 = vld [vmem:[#allocation11] sm:$0xff]  ;;  %s6613_s18 = sld [smem:[#allocation47_spill]] }
 0x192   : > { %4128 = vmatpush3.bf16.msra.mxu0 %v4125_v12  ;;  %4156 = vmatpush3.bf16.msra.mxu1 %v4153_v26  ;;  %v1119_v61 = vld [vmem:[#allocation8 + $0x70] sm:$0xff]  ;;  %v1120_v62 = vld [vmem:[#allocation8 + $0x78] sm:$0xff]  ;;  %v1322_v1 = vld [vmem:[#allocation11 + $0x8] sm:$0xff] }
 0x193   : > { %4130 = vmatprep.subr.bf16.mxu0 %v4129_v21  ;;  %4158 = vmatprep.subr.bf16.mxu1 %v4157_v32  ;;  %v4173_v63 = vpack.c.bf16 %v1120_v62, %v1119_v61  ;;  %v1323_v2 = vld [vmem:[#allocation11 + $0x10] sm:$0xff]  ;;  %v4177_v3 = vpack.c.bf16 %v1322_v1, %v1321_v0  ;;  %v1324_v4 = vld [vmem:[#allocation11 + $0x18] sm:$0xff]  ;;  %v1325_v6 = vld [vmem:[#allocation11 + $0x20] sm:$0xff] }
 0x194   : > { %v4181_v5 = vpack.c.bf16 %v1324_v4, %v1323_v2  ;;  %v1326_v7 = vld [vmem:[#allocation11 + $0x28] sm:$0xff]  ;;  %v1327_v9 = vld [vmem:[#allocation11 + $0x30] sm:$0xff]  ;;  %v1328_v10 = vld [vmem:[#allocation11 + $0x38] sm:$0xff] }
 0x195   : > { %v4185_v8 = vpack.c.bf16 %v1326_v7, %v1325_v6  ;;  %v4189_v11 = vpack.c.bf16 %v1328_v10, %v1327_v9  ;;  %v1329_v12 = vld [vmem:[#allocation11 + $0x40] sm:$0xff]  ;;  %v1330_v13 = vld [vmem:[#allocation11 + $0x48] sm:$0xff]  ;;  %v1331_v15 = vld [vmem:[#allocation11 + $0x50] sm:$0xff] }
 0x196   : > { %4132 = vmatpush3.bf16.msra.mxu0 %v4129_v21  ;;  %4160 = vmatpush3.bf16.msra.mxu1 %v4157_v32  ;;  %v4193_v14 = vpack.c.bf16 %v1330_v13, %v1329_v12  ;;  %v1332_v16 = vld [vmem:[#allocation11 + $0x58] sm:$0xff]  ;;  %v1333_v18 = vld [vmem:[#allocation11 + $0x60] sm:$0xff]  ;;  %v1334_v19 = vld [vmem:[#allocation11 + $0x68] sm:$0xff] }
 0x197   : > { %4134 = vmatprep.subr.bf16.mxu0 %v4133_v27  ;;  %4162 = vmatprep.subr.bf16.mxu1 %v4161_v38  ;;  %v4197_v17 = vpack.c.bf16 %v1332_v16, %v1331_v15  ;;  %v4201_v20 = vpack.c.bf16 %v1334_v19, %v1333_v18  ;;  %v3278_v21 = vld [vmem:[%s6610_s27] ss:$0 sm:$0xff]  ;;  %v1335_v6 = vld [vmem:[#allocation11 + $0x70] sm:$0xff]  ;;  %v1336_v7 = vld [vmem:[#allocation11 + $0x78] sm:$0xff]  ;;  %s6614_s27 = sld [smem:[#allocation49_spill]] }
 0x198   : > { %v1305_v9 = vld [vmem:[#allocation10] sm:$0xff]  ;;  %v1306_v10 = vld [vmem:[#allocation10 + $0x8] sm:$0xff]  ;;  %v1669_v16 = vld [vmem:[#allocation13 + $0x18] sm:$0xff] }
 0x199   : > { %v1666_v12 = vld [vmem:[#allocation13] sm:$0xff]  ;;  %v1667_v13 = vld [vmem:[#allocation13 + $0x8] sm:$0xff] }
 0x19a   : > { %4136 = vmatpush3.bf16.msra.mxu0 %v4133_v27  ;;  %4164 = vmatpush3.bf16.msra.mxu1 %v4161_v38  ;;  %v4241_v15 = vpack.c.bf16 %v1667_v13, %v1666_v12  ;;  %v1670_v18 = vld [vmem:[#allocation13 + $0x20] sm:$0xff]  ;;  %v1671_v19 = vld [vmem:[#allocation13 + $0x28] sm:$0xff] }
 0x19b   : > { %4138 = vmatprep.subr.bf16.mxu0 %v4137_v33  ;;  %4166 = vmatprep.subr.bf16.mxu1 %v4165_v42 }
 0x19e   : > { %4140 = vmatpush3.bf16.msra.mxu0 %v4137_v33  ;;  %4168 = vmatpush3.bf16.msra.mxu1 %v4165_v42 }
 0x19f   : > { %4142 = vmatprep.subr.bf16.mxu0 %v4141_v39  ;;  %4170 = vmatprep.subr.bf16.mxu1 %v4169_v46 }
 0x1a2   : > { %4144 = vmatpush3.bf16.msra.mxu0 %v4141_v39  ;;  %4172 = vmatpush3.bf16.msra.mxu1 %v4169_v46 }
 0x1a3   : > { %4174 = vmatprep.subr.bf16.mxu1 %v4173_v63  ;;  %4178 = vmatprep.subr.bf16.mxu0 %v4177_v3 }
 0x1a5   : > { %3642 = vmatmul.mubr.f32.vlgmr.msra.gmra.mrb[0].mxu0 %v906_v45 }
 0x1a6   : > { %3644 = vmatprep.mubr.f32.mxu0 %v907_v47  ;;  %4176 = vmatpush3.bf16.msra.mxu1 %v4173_v63 }
 0x1a7   : > { %4180 = vmatpush3.bf16.msra.mxu0 %v4177_v3  ;;  %4242 = vmatprep.subr.bf16.mxu1 %v4241_v15 }
 0x1a8   : > { %4182 = vmatprep.subr.bf16.mxu0 %v4181_v5 }
 0x1a9   : > { %3645 = vmatmul.mubr.f32.gmra.mrb[2].mxu0 %v908_v48 }
 0x1aa   : > { %3647 = vmatprep.mubr.f32.mxu0 %v909_v49 }
 0x1ab   : > { %4184 = vmatpush3.bf16.msra.mxu0 %v4181_v5 }
 0x1ac   : > { %4186 = vmatprep.subr.bf16.mxu0 %v4185_v8 }
 0x1ad   : > { %3648 = vmatmul.mubr.f32.gmra.mrb[4].mxu0 %v910_v50 }
 0x1ae   : > { %3650 = vmatprep.mubr.f32.mxu0 %v911_v51 }
 0x1af   : > { %4188 = vmatpush3.bf16.msra.mxu0 %v4185_v8  ;;  %v4205_v8 = vpack.c.bf16 %v1336_v7, %v1335_v6 }
 0x1b0   : > { %4190 = vmatprep.subr.bf16.mxu0 %v4189_v11 }
 0x1b1   : > { %3651 = vmatmul.mubr.f32.gmra.mrb[6].mxu0 %v912_v52 }
 0x1b2   : > { %3653 = vmatprep.mubr.f32.mxu0 %v913_v53 }
 0x1b3   : > { %4192 = vmatpush3.bf16.msra.mxu0 %v4189_v11  ;;  %v4209_v11 = vpack.c.bf16 %v1306_v10, %v1305_v9  ;;  %v1315_v10 = vld [vmem:[#allocation10 + $0x50] sm:$0xff] }
 0x1b4   : > { %4194 = vmatprep.subr.bf16.mxu0 %v4193_v14 }
 0x1b5   : > { %3654 = vmatmul.mubr.f32.gmra.mrb[8].mxu0 %v914_v54 }
 0x1b6   : > { %3656 = vmatprep.mubr.f32.mxu0 %v915_v55 }
 0x1b7   : > { %4196 = vmatpush3.bf16.msra.mxu0 %v4193_v14  ;;  %v1668_v14 = vld [vmem:[#allocation13 + $0x10] sm:$0xff] }
 0x1b8   : > { %4198 = vmatprep.subr.bf16.mxu0 %v4197_v17 }
 0x1b9   : > { %3657 = vmatmul.mubr.f32.gmra.mrb[10].mxu0 %v916_v56 }
 0x1ba   : > { %3659 = vmatprep.mubr.f32.mxu0 %v917_v57 }
 0x1bb   : > { %4200 = vmatpush3.bf16.msra.mxu0 %v4197_v17  ;;  %v4245_v17 = vpack.c.bf16 %v1669_v16, %v1668_v14 }
 0x1bc   : > { %4202 = vmatprep.subr.bf16.mxu0 %v4201_v20 }
 0x1bd   : > { %3660 = vmatmul.mubr.f32.gmra.mrb[12].mxu0 %v918_v58 }
 0x1be   : > { %3662 = vmatprep.mubr.f32.mxu0 %v919_v59 }
 0x1bf   : > { %4204 = vmatpush3.bf16.msra.mxu0 %v4201_v20  ;;  %v4249_v20 = vpack.c.bf16 %v1671_v19, %v1670_v18  ;;  %v1317_v19 = vld [vmem:[#allocation10 + $0x60] sm:$0xff] }
 0x1c0   : > { %4206 = vmatprep.subr.bf16.mxu0 %v4205_v8 }
 0x1c1   : > { %3663 = vmatmul.mubr.f32.gmra.mrb[14].mxu0 %v920_v60 }
 0x1c3   : > { %4208 = vmatpush3.bf16.msra.mxu0 %v4205_v8 }
 0x1c4   : > { %4210 = vmatprep.subr.bf16.mxu0 %v4209_v11 }
 0x278   : > { %v3643_v22 = vpop.f32.mrb[0].mxu0 }
 0x279   : > { %v1016_v23 = vadd.f32 %v3643_v22, %v3278_v21  ;;  %v1010_v24 = vpop.f32.mrb[1].mxu0  ;;  %v1673_v22 = vld [vmem:[#allocation13 + $0x38] sm:$0xff] }
 0x27a   : > { %v1011_v25 = vadd.f32 %v3278_v21, %v1010_v24  ;;  %v1674_v24 = vld [vmem:[#allocation13 + $0x40] sm:$0xff] }
 0x27b   : > { %v1090_v28 = vmax.f32 %v1016_v23, 0.0 }
 0x27c   : > { %v3646_v26 = vpop.f32.mrb[2].mxu0  ;;  %v1089_v27 = vmax.f32 %v1011_v25, 0.0  ;;  %v1675_v25 = vld [vmem:[#allocation13 + $0x48] sm:$0xff] }
 0x27d   : > { %v1026_v29 = vadd.f32 %v3646_v26, %v3278_v21  ;;  %v1020_v30 = vpop.f32.mrb[3].mxu0  ;;  %v4257_v26 = vpack.c.bf16 %v1675_v25, %v1674_v24 }
 0x27e   : > { %v1021_v31 = vadd.f32 %v3278_v21, %v1020_v30  ;;  %3697 = vmatprep.mubr.f32.mxu1 %v1089_v27  ;;  %v1676_v27 = vld [vmem:[#allocation13 + $0x50] sm:$0xff]  ;;  %v1678_v30 = vld [vmem:[#allocation13 + $0x60] sm:$0xff] }
 0x27f   : > { %3698 = vmatmul.mubr.f32.vlgmr.msra.gmra.mrb[0].mxu1 %v1090_v28  ;;  %v1092_v34 = vmax.f32 %v1026_v29, 0.0  ;;  %v1677_v28 = vld [vmem:[#allocation13 + $0x58] sm:$0xff] }
 0x280   : > { %v1091_v32 = vmax.f32 %v1021_v31, 0.0  ;;  %v3649_v33 = vpop.f32.mrb[4].mxu0  ;;  %4244 = vmatpush3.bf16.msra.mxu1 %v4241_v15  ;;  %v4261_v29 = vpack.c.bf16 %v1677_v28, %v1676_v27  ;;  %v1679_v31 = vld [vmem:[#allocation13 + $0x68] sm:$0xff]  ;;  %v1319_v28 = vld [vmem:[#allocation10 + $0x70] sm:$0xff] }
 0x281   : > { %v1036_v35 = vadd.f32 %v3649_v33, %v3278_v21  ;;  %v1030_v36 = vpop.f32.mrb[5].mxu0  ;;  %4246 = vmatprep.subr.bf16.mxu1 %v4245_v17  ;;  %v5750_v33 = vld [vmem:[%s6611_s21] ss:$0 sm:$0xff]  ;;  %s6615_s21 = sld [smem:[#allocation51_spill]] }
 0x282   : > { %v1031_v37 = vadd.f32 %v3278_v21, %v1030_v36  ;;  %3700 = vmatprep.mubr.f32.mxu1 %v1091_v32  ;;  %v4265_v32 = vpack.c.bf16 %v1679_v31, %v1678_v30 }
 0x283   : > { %3701 = vmatmul.mubr.f32.gmra.mrb[2].mxu1 %v1092_v34  ;;  %v1094_v40 = vmax.f32 %v1036_v35, 0.0 }
 0x284   : > { %v1093_v38 = vmax.f32 %v1031_v37, 0.0  ;;  %v3652_v39 = vpop.f32.mrb[6].mxu0  ;;  %4248 = vmatpush3.bf16.msra.mxu1 %v4245_v17 }
 0x285   : > { %v1046_v41 = vadd.f32 %v3652_v39, %v3278_v21  ;;  %v1040_v42 = vpop.f32.mrb[7].mxu0  ;;  %4250 = vmatprep.subr.bf16.mxu1 %v4249_v20  ;;  %v1308_v39 = vld [vmem:[#allocation10 + $0x18] sm:$0xff] }
 0x286   : > { %v1041_v43 = vadd.f32 %v3278_v21, %v1040_v42  ;;  %3703 = vmatprep.mubr.f32.mxu1 %v1093_v38  ;;  %v1307_v38 = vld [vmem:[#allocation10 + $0x10] sm:$0xff] }
 0x287   : > { %3704 = vmatmul.mubr.f32.gmra.mrb[4].mxu1 %v1094_v40  ;;  %v1096_v46 = vmax.f32 %v1046_v41, 0.0 }
 0x288   : > { %v1095_v44 = vmax.f32 %v1041_v43, 0.0  ;;  %v3655_v45 = vpop.f32.mrb[8].mxu0  ;;  %4252 = vmatpush3.bf16.msra.mxu1 %v4249_v20  ;;  %v1318_v20 = vld [vmem:[#allocation10 + $0x68] sm:$0xff] }
 0x289   : > { %v1056_v47 = vadd.f32 %v3655_v45, %v3278_v21  ;;  %v1050_v48 = vpop.f32.mrb[9].mxu0  ;;  %v4213_v45 = vpack.c.bf16 %v1308_v39, %v1307_v38 }
 0x28a   : > { %v1051_v49 = vadd.f32 %v3278_v21, %v1050_v48  ;;  %3706 = vmatprep.mubr.f32.mxu1 %v1095_v44  ;;  %v1310_v48 = vld [vmem:[#allocation10 + $0x28] sm:$0xff] }
 0x28b   : > { %3707 = vmatmul.mubr.f32.gmra.mrb[6].mxu1 %v1096_v46  ;;  %v1098_v52 = vmax.f32 %v1056_v47, 0.0  ;;  %v1309_v47 = vld [vmem:[#allocation10 + $0x20] sm:$0xff] }
 0x28c   : > { %v1097_v50 = vmax.f32 %v1051_v49, 0.0  ;;  %v3658_v51 = vpop.f32.mrb[10].mxu0 }
 0x28d   : > { %v1066_v53 = vadd.f32 %v3658_v51, %v3278_v21  ;;  %v1060_v54 = vpop.f32.mrb[11].mxu0 }
 0x28e   : > { %v1061_v55 = vadd.f32 %v3278_v21, %v1060_v54  ;;  %3709 = vmatprep.mubr.f32.mxu1 %v1097_v50  ;;  %v4217_v54 = vpack.c.bf16 %v1310_v48, %v1309_v47  ;;  %v1291_v47 = vld [vmem:[%s5702_s11 + $0x10] sm:$0xff]  ;;  %v1292_v48 = vld [vmem:[%s5702_s11 + $0x18] sm:$0xff] }
 0x28f   : > { %3710 = vmatmul.mubr.f32.gmra.mrb[8].mxu1 %v1098_v52  ;;  %v1100_v58 = vmax.f32 %v1066_v53, 0.0 }
 0x290   : > { %v1099_v56 = vmax.f32 %v1061_v55, 0.0  ;;  %v3661_v57 = vpop.f32.mrb[12].mxu0 }
 0x291   : > { %v1076_v59 = vadd.f32 %v3661_v57, %v3278_v21  ;;  %v1070_v60 = vpop.f32.mrb[13].mxu0  ;;  %v1312_v57 = vld [vmem:[#allocation10 + $0x38] sm:$0xff] }
 0x292   : > { %v1071_v61 = vadd.f32 %v3278_v21, %v1070_v60  ;;  %3712 = vmatprep.mubr.f32.mxu1 %v1099_v56  ;;  %v1311_v56 = vld [vmem:[#allocation10 + $0x30] sm:$0xff] }
 0x293   : > { %3713 = vmatmul.mubr.f32.gmra.mrb[10].mxu1 %v1100_v58  ;;  %v1102_v0 = vmax.f32 %v1076_v59, 0.0 }
 0x294   : > { %v1101_v62 = vmax.f32 %v1071_v61, 0.0  ;;  %v3664_v63 = vpop.f32.mrb[14].mxu0 }
 0x295   : > { %v1086_v1 = vadd.f32 %v3664_v63, %v3278_v21  ;;  %v1080_v2 = vpop.f32.mrb[15].mxu0  ;;  %v4221_v63 = vpack.c.bf16 %v1312_v57, %v1311_v56  ;;  %v1296_v56 = vld [vmem:[%s5702_s11 + $0x38] sm:$0xff]  ;;  %v1297_v57 = vld [vmem:[%s5702_s11 + $0x40] sm:$0xff] }
 0x296   : > { %v1081_v3 = vadd.f32 %v3278_v21, %v1080_v2  ;;  %3715 = vmatprep.mubr.f32.mxu1 %v1101_v62  ;;  %v1672_v21 = vld [vmem:[#allocation13 + $0x30] sm:$0xff]  ;;  %v1314_v2 = vld [vmem:[#allocation10 + $0x48] sm:$0xff] }
 0x297   : > { %3716 = vmatmul.mubr.f32.gmra.mrb[12].mxu1 %v1102_v0  ;;  %v1104_v5 = vmax.f32 %v1086_v1, 0.0  ;;  %v4253_v23 = vpack.c.bf16 %v1673_v22, %v1672_v21  ;;  %v1313_v1 = vld [vmem:[#allocation10 + $0x40] sm:$0xff] }
 0x298   : > { %v1103_v4 = vmax.f32 %v1081_v3, 0.0  ;;  %v4225_v8 = vpack.c.bf16 %v1314_v2, %v1313_v1  ;;  %v1301_v1 = vld [vmem:[%s5702_s11 + $0x60] sm:$0xff]  ;;  %v1302_v2 = vld [vmem:[%s5702_s11 + $0x68] sm:$0xff] }
 0x299   : > { %4254 = vmatprep.subr.bf16.mxu1 %v4253_v23 }
 0x29a   : > { %3718 = vmatprep.mubr.f32.mxu1 %v1103_v4  ;;  %4256 = vmatpush3.bf16.msra.mxu1 %v4253_v23 }
 0x29b   : > { %3719 = vmatmul.mubr.f32.gmra.mrb[14].mxu1 %v1104_v5  ;;  %4258 = vmatprep.subr.bf16.mxu1 %v4257_v26 }
 0x29e   : > { %4260 = vmatpush3.bf16.msra.mxu1 %v4257_v26  ;;  %v4233_v26 = vpack.c.bf16 %v1318_v20, %v1317_v19  ;;  %v5870_v19 = vld [vmem:[%s6513_s8] ss:$0 sm:$0xff] }
 0x29f   : > { %4262 = vmatprep.subr.bf16.mxu1 %v4261_v29 }
 0x2a2   : > { %4264 = vmatpush3.bf16.msra.mxu1 %v4261_v29  ;;  %v1320_v29 = vld [vmem:[#allocation10 + $0x78] sm:$0xff] }
 0x2a3   : > { %4266 = vmatprep.subr.bf16.mxu1 %v4265_v32  ;;  %v4237_v38 = vpack.c.bf16 %v1320_v29, %v1319_v28  ;;  %v1852_v28 = vld [vmem:[#allocation14 + $0x10] sm:$0xff]  ;;  %v1853_v29 = vld [vmem:[#allocation14 + $0x18] sm:$0xff] }
 0x2a6   : > { %4268 = vmatpush3.bf16.msra.mxu1 %v4265_v32 }
 0x352   : > { %v3699_v34 = vpop.f32.mrb[0].mxu1 }
 0x353   : > { %v5753_v35 = vadd.f32 %v3699_v34, %v5750_v33  ;;  %v1194_v36 = vpop.f32.mrb[1].mxu1 }
 0x354   : > { %v5756_v37 = vadd.f32 %v5750_v33, %v1194_v36 }
 0x355   : > { %v1274_v42 = vmax.f32 %v5753_v35, 0.0 }
 0x356   : > { %v1273_v40 = vmax.f32 %v5756_v37, 0.0  ;;  %v3702_v41 = vpop.f32.mrb[2].mxu1 }
 0x357   : > { %v5761_v43 = vadd.f32 %v3702_v41, %v5750_v33  ;;  %v1204_v44 = vpop.f32.mrb[3].mxu1 }
 0x358   : > { %v5764_v46 = vadd.f32 %v5750_v33, %v1204_v44  ;;  %3753 = vmatprep.mubr.f32.mxu0 %v1273_v40 }
 0x359   : > { %3754 = vmatmul.mubr.f32.vlgmr.msra.gmra.mrb[16].mxu0 %v1274_v42  ;;  %v1276_v51 = vmax.f32 %v5761_v43, 0.0 }
 0x35a   : > { %v1275_v49 = vmax.f32 %v5764_v46, 0.0  ;;  %4212 = vmatpush3.bf16.msra.mxu0 %v4209_v11  ;;  %v3705_v50 = vpop.f32.mrb[4].mxu1  ;;  %v1316_v11 = vld [vmem:[#allocation10 + $0x58] sm:$0xff] }
 0x35b   : > { %v5773_v52 = vadd.f32 %v3705_v50, %v5750_v33  ;;  %v1214_v53 = vpop.f32.mrb[5].mxu1  ;;  %4214 = vmatprep.subr.bf16.mxu0 %v4213_v45  ;;  %v4229_v17 = vpack.c.bf16 %v1316_v11, %v1315_v10  ;;  %v1293_v50 = vld [vmem:[%s5702_s11 + $0x20] sm:$0xff]  ;;  %v1681_v10 = vld [vmem:[#allocation13 + $0x78] sm:$0xff] }
 0x35c   : > { %v5776_v55 = vadd.f32 %v5750_v33, %v1214_v53  ;;  %3756 = vmatprep.mubr.f32.mxu0 %v1275_v49  ;;  %v1294_v53 = vld [vmem:[%s5702_s11 + $0x28] sm:$0xff] }
 0x35d   : > { %3757 = vmatmul.mubr.f32.gmra.mrb[18].mxu0 %v1276_v51  ;;  %v1278_v60 = vmax.f32 %v5773_v52, 0.0 }
 0x35e   : > { %v1277_v58 = vmax.f32 %v5776_v55, 0.0  ;;  %4216 = vmatpush3.bf16.msra.mxu0 %v4213_v45  ;;  %v3708_v59 = vpop.f32.mrb[6].mxu1  ;;  %v1289_v45 = vld [vmem:[%s5702_s11] sm:$0xff] }
 0x35f   : > { %v5785_v61 = vadd.f32 %v3708_v59, %v5750_v33  ;;  %v1224_v62 = vpop.f32.mrb[7].mxu1  ;;  %4218 = vmatprep.subr.bf16.mxu0 %v4217_v54  ;;  %v1298_v59 = vld [vmem:[%s5702_s11 + $0x48] sm:$0xff] }
 0x360   : > { %v5788_v0 = vadd.f32 %v5750_v33, %v1224_v62  ;;  %3759 = vmatprep.mubr.f32.mxu0 %v1277_v58  ;;  %v1299_v62 = vld [vmem:[%s5702_s11 + $0x50] sm:$0xff] }
 0x361   : > { %3760 = vmatmul.mubr.f32.gmra.mrb[20].mxu0 %v1278_v60  ;;  %v1280_v5 = vmax.f32 %v5785_v61, 0.0 }
 0x362   : > { %v1279_v3 = vmax.f32 %v5788_v0, 0.0  ;;  %4220 = vmatpush3.bf16.msra.mxu0 %v4217_v54  ;;  %v3711_v4 = vpop.f32.mrb[8].mxu1  ;;  %v1295_v54 = vld [vmem:[%s5702_s11 + $0x30] sm:$0xff] }
 0x363   : > { %v5797_v6 = vadd.f32 %v3711_v4, %v5750_v33  ;;  %v1234_v7 = vpop.f32.mrb[9].mxu1  ;;  %4222 = vmatprep.subr.bf16.mxu0 %v4221_v63  ;;  %v1303_v4 = vld [vmem:[%s5702_s11 + $0x70] sm:$0xff] }
 0x364   : > { %v5800_v9 = vadd.f32 %v5750_v33, %v1234_v7  ;;  %3762 = vmatprep.mubr.f32.mxu0 %v1279_v3  ;;  %v1304_v7 = vld [vmem:[%s5702_s11 + $0x78] sm:$0xff] }
 0x365   : > { %3763 = vmatmul.mubr.f32.gmra.mrb[22].mxu0 %v1280_v5  ;;  %v1282_v14 = vmax.f32 %v5797_v6, 0.0 }
 0x366   : > { %v1281_v12 = vmax.f32 %v5800_v9, 0.0  ;;  %4224 = vmatpush3.bf16.msra.mxu0 %v4221_v63  ;;  %v3714_v13 = vpop.f32.mrb[10].mxu1  ;;  %v1300_v63 = vld [vmem:[%s5702_s11 + $0x58] sm:$0xff] }
 0x367   : > { %v5809_v15 = vadd.f32 %v3714_v13, %v5750_v33  ;;  %v1244_v16 = vpop.f32.mrb[11].mxu1  ;;  %4226 = vmatprep.subr.bf16.mxu0 %v4225_v8  ;;  %v1850_v13 = vld [vmem:[#allocation14] sm:$0xff] }
 0x368   : > { %v5812_v18 = vadd.f32 %v5750_v33, %v1244_v16  ;;  %3765 = vmatprep.mubr.f32.mxu0 %v1281_v12  ;;  %v1851_v16 = vld [vmem:[#allocation14 + $0x8] sm:$0xff] }
 0x369   : > { %3766 = vmatmul.mubr.f32.gmra.mrb[24].mxu0 %v1282_v14  ;;  %v1284_v23 = vmax.f32 %v5809_v15, 0.0 }
 0x36a   : > { %v1283_v21 = vmax.f32 %v5812_v18, 0.0  ;;  %4228 = vmatpush3.bf16.msra.mxu0 %v4225_v8  ;;  %v3717_v22 = vpop.f32.mrb[12].mxu1  ;;  %v1680_v8 = vld [vmem:[#allocation13 + $0x70] sm:$0xff] }
 0x36b   : > { %v5821_v24 = vadd.f32 %v3717_v22, %v5750_v33  ;;  %v1254_v25 = vpop.f32.mrb[13].mxu1  ;;  %4230 = vmatprep.subr.bf16.mxu0 %v4229_v17  ;;  %v4269_v11 = vpack.c.bf16 %v1681_v10, %v1680_v8 }
 0x36c   : > { %v5824_v27 = vadd.f32 %v5750_v33, %v1254_v25  ;;  %3768 = vmatprep.mubr.f32.mxu0 %v1283_v21 }
 0x36d   : > { %3769 = vmatmul.mubr.f32.gmra.mrb[26].mxu0 %v1284_v23  ;;  %v6552_v32 = vmax.f32 %v5821_v24, 0.0  ;;  %4270 = vmatprep.subr.bf16.mxu1 %v4269_v11 }
 0x36e   : > { %v6551_v30 = vmax.f32 %v5824_v27, 0.0  ;;  %4232 = vmatpush3.bf16.msra.mxu0 %v4229_v17  ;;  %v3720_v31 = vpop.f32.mrb[14].mxu1  ;;  %4272 = vmatpush3.bf16.msra.mxu1 %v4269_v11  ;;  %v4273_v17 = vpack.c.bf16 %v1851_v16, %v1850_v13 }
 0x36f   : > { %v5833_v34 = vadd.f32 %v3720_v31, %v5750_v33  ;;  %v1264_v36 = vpop.f32.mrb[15].mxu1  ;;  %4234 = vmatprep.subr.bf16.mxu0 %v4233_v26 }
 0x370   : > { %v5836_v39 = vadd.f32 %v5750_v33, %v1264_v36  ;;  %3771 = vmatprep.mubr.f32.mxu0 %v6551_v30  ;;  %v5850_v33 = vld [vmem:[%s5702_s11 + $0x8] sm:$0xff]  ;;  %4274 = vmatprep.subr.bf16.mxu1 %v4273_v17 }
 0x371   : > { %3772 = vmatmul.mubr.f32.gmra.mrb[28].mxu0 %v6552_v32  ;;  %v6550_v44 = vmax.f32 %v5833_v34, 0.0  ;;  %v4664_v32 = vld [vmem:[%s5702_s11 + $0x18] sm:$0xff] }
 0x372   : > { %v6549_v41 = vmax.f32 %v5836_v39, 0.0  ;;  %4236 = vmatpush3.bf16.msra.mxu0 %v4233_v26 }
 0x373   : > { %4238 = vmatprep.subr.bf16.mxu0 %v4237_v38 }
 0x374   : > { %3774 = vmatprep.mubr.f32.mxu0 %v6549_v41  ;;  %v2374_v41 = vld [vmem:[#allocation19 + $0x20] sm:$0xff] }
 0x375   : > { %3775 = vmatmul.mubr.f32.gmra.mrb[30].mxu0 %v6550_v44  ;;  %v2375_v44 = vld [vmem:[#allocation19 + $0x28] sm:$0xff] }
 0x376   : > { %4240 = vmatpush3.bf16.msra.mxu0 %v4237_v38  ;;  %3809 = vmatprep.mubr.f32.mxu0 %v1289_v45 }
 0x379   : > { %3810 = vmatmul.mubr.f32.vlgmr.msra.gmra.mrb[16].mxu0 %v5850_v33 }
 0x37a   : > { %3812 = vmatprep.mubr.f32.mxu0 %v1291_v47 }
 0x37d   : > { %3813 = vmatmul.mubr.f32.gmra.mrb[18].mxu0 %v1292_v48  ;;  %v4277_v48 = vpack.c.bf16 %v1853_v29, %v1852_v28 }
 0x37e   : > { %3815 = vmatprep.mubr.f32.mxu0 %v1293_v50 }
 0x381   : > { %3816 = vmatmul.mubr.f32.gmra.mrb[20].mxu0 %v1294_v53  ;;  %v1854_v53 = vld [vmem:[#allocation14 + $0x20] sm:$0xff] }
 0x382   : > { %3818 = vmatprep.mubr.f32.mxu0 %v1295_v54  ;;  %v1855_v54 = vld [vmem:[#allocation14 + $0x28] sm:$0xff] }
 0x385   : > { %3819 = vmatmul.mubr.f32.gmra.mrb[22].mxu0 %v1296_v56 }
 0x386   : > { %3821 = vmatprep.mubr.f32.mxu0 %v1297_v57 }
 0x389   : > { %3822 = vmatmul.mubr.f32.gmra.mrb[24].mxu0 %v1298_v59 }
 0x38a   : > { %3824 = vmatprep.mubr.f32.mxu0 %v1299_v62 }
 0x38d   : > { %3825 = vmatmul.mubr.f32.gmra.mrb[26].mxu0 %v1300_v63 }
 0x38e   : > { %3827 = vmatprep.mubr.f32.mxu0 %v1301_v1  ;;  %v4281_v1 = vpack.c.bf16 %v1855_v54, %v1854_v53 }
 0x391   : > { %3828 = vmatmul.mubr.f32.gmra.mrb[28].mxu0 %v1302_v2 }
 0x392   : > { %3830 = vmatprep.mubr.f32.mxu0 %v1303_v4  ;;  %v1856_v4 = vld [vmem:[#allocation14 + $0x30] sm:$0xff] }
 0x395   : > { %3831 = vmatmul.mubr.f32.gmra.mrb[30].mxu0 %v1304_v7  ;;  %v1857_v7 = vld [vmem:[#allocation14 + $0x38] sm:$0xff] }
 0x44c   : > { %v3811_v20 = vpop.f32.mrb[16].mxu0 }
 0x44d   : > { %v1635_v22 = vadd.f32 %v3811_v20, %v5870_v19  ;;  %v1548_v25 = vpop.f32.mrb[17].mxu0 }
 0x44e   : > { %v1634_v26 = vadd.f32 %v5870_v19, %v1548_v25  ;;  %v1859_v25 = vld [vmem:[#allocation14 + $0x48] sm:$0xff] }
 0x44f   : > { %v1651_v38 = vmax.f32 %v1635_v22, 0.0  ;;  %v1858_v22 = vld [vmem:[#allocation14 + $0x40] sm:$0xff] }
 0x450   : > { %v1650_v31 = vmax.f32 %v1634_v26, 0.0  ;;  %v3814_v36 = vpop.f32.mrb[18].mxu0 }
 0x451   : > { %v1637_v45 = vadd.f32 %v3814_v36, %v5870_v19  ;;  %v1558_v47 = vpop.f32.mrb[19].mxu0 }
 0x452   : > { %v1636_v50 = vadd.f32 %v5870_v19, %v1558_v47  ;;  %3865 = vmatprep.mubr.f32.mxu1 %v1650_v31  ;;  %v1860_v47 = vld [vmem:[#allocation14 + $0x50] sm:$0xff] }
 0x453   : > { %3866 = vmatmul.mubr.f32.vlgmr.msra.gmra.mrb[16].mxu1 %v1651_v38  ;;  %v1653_v59 = vmax.f32 %v1637_v45, 0.0  ;;  %v4289_v38 = vpack.c.bf16 %v1859_v25, %v1858_v22 }
 0x454   : > { %v1652_v56 = vmax.f32 %v1636_v50, 0.0  ;;  %v3817_v57 = vpop.f32.mrb[20].mxu0  ;;  %4276 = vmatpush3.bf16.msra.mxu1 %v4273_v17  ;;  %v4285_v17 = vpack.c.bf16 %v1857_v7, %v1856_v4 }
 0x455   : > { %v1639_v62 = vadd.f32 %v3817_v57, %v5870_v19  ;;  %v1568_v63 = vpop.f32.mrb[21].mxu0  ;;  %4278 = vmatprep.subr.bf16.mxu1 %v4277_v48 }
 0x456   : > { %v1638_v2 = vadd.f32 %v5870_v19, %v1568_v63  ;;  %3868 = vmatprep.mubr.f32.mxu1 %v1652_v56  ;;  %v1862_v63 = vld [vmem:[#allocation14 + $0x60] sm:$0xff] }
 0x457   : > { %3869 = vmatmul.mubr.f32.gmra.mrb[18].mxu1 %v1653_v59  ;;  %v1655_v11 = vmax.f32 %v1639_v62, 0.0 }
 0x458   : > { %v1654_v8 = vmax.f32 %v1638_v2, 0.0  ;;  %v3820_v10 = vpop.f32.mrb[22].mxu0  ;;  %4280 = vmatpush3.bf16.msra.mxu1 %v4277_v48  ;;  %v1861_v48 = vld [vmem:[#allocation14 + $0x58] sm:$0xff] }
 0x459   : > { %v1641_v13 = vadd.f32 %v3820_v10, %v5870_v19  ;;  %v1578_v16 = vpop.f32.mrb[23].mxu0  ;;  %4282 = vmatprep.subr.bf16.mxu1 %v4281_v1  ;;  %v4293_v59 = vpack.c.bf16 %v1861_v48, %v1860_v47  ;;  %v2035_v47 = vld [vmem:[#allocation16 + $0x8] sm:$0xff]  ;;  %v2202_v48 = vld [vmem:[#allocation17] sm:$0xff] }
 0x45a   : > { %v1640_v20 = vadd.f32 %v5870_v19, %v1578_v16  ;;  %3871 = vmatprep.mubr.f32.mxu1 %v1654_v8 }
 0x45b   : > { %3872 = vmatmul.mubr.f32.gmra.mrb[20].mxu1 %v1655_v11  ;;  %v1657_v29 = vmax.f32 %v1641_v13, 0.0 }
 0x45c   : > { %v1656_v26 = vmax.f32 %v1640_v20, 0.0  ;;  %v3823_v28 = vpop.f32.mrb[24].mxu0  ;;  %4284 = vmatpush3.bf16.msra.mxu1 %v4281_v1  ;;  %v1863_v1 = vld [vmem:[#allocation14 + $0x68] sm:$0xff] }
 0x45d   : > { %v1643_v31 = vadd.f32 %v3823_v28, %v5870_v19  ;;  %v1588_v36 = vpop.f32.mrb[25].mxu0  ;;  %4286 = vmatprep.subr.bf16.mxu1 %v4285_v17  ;;  %v4297_v11 = vpack.c.bf16 %v1863_v1, %v1862_v63  ;;  %v2040_v1 = vld [vmem:[#allocation16 + $0x30] sm:$0xff] }
 0x45e   : > { %v1642_v45 = vadd.f32 %v5870_v19, %v1588_v36  ;;  %3874 = vmatprep.mubr.f32.mxu1 %v1656_v26  ;;  %v1865_v36 = vld [vmem:[#allocation14 + $0x78] sm:$0xff] }
 0x45f   : > { %3875 = vmatmul.mubr.f32.gmra.mrb[22].mxu1 %v1657_v29  ;;  %v1659_v54 = vmax.f32 %v1643_v31, 0.0  ;;  %v1864_v31 = vld [vmem:[#allocation14 + $0x70] sm:$0xff] }
 0x460   : > { %v1658_v50 = vmax.f32 %v1642_v45, 0.0  ;;  %v3826_v53 = vpop.f32.mrb[26].mxu0  ;;  %4288 = vmatpush3.bf16.msra.mxu1 %v4285_v17  ;;  %v2034_v45 = vld [vmem:[#allocation16] sm:$0xff] }
 0x461   : > { %v1645_v56 = vadd.f32 %v3826_v53, %v5870_v19  ;;  %v1598_v57 = vpop.f32.mrb[27].mxu0  ;;  %4290 = vmatprep.subr.bf16.mxu1 %v4289_v38  ;;  %v2203_v53 = vld [vmem:[#allocation17 + $0x8] sm:$0xff] }
 0x462   : > { %v1644_v62 = vadd.f32 %v5870_v19, %v1598_v57  ;;  %3877 = vmatprep.mubr.f32.mxu1 %v1658_v50  ;;  %v4305_v50 = vpack.c.bf16 %v2035_v47, %v2034_v45 }
 0x463   : > { %3878 = vmatmul.mubr.f32.gmra.mrb[24].mxu1 %v1659_v54  ;;  %v1661_v7 = vmax.f32 %v1645_v56, 0.0  ;;  %v2036_v54 = vld [vmem:[#allocation16 + $0x10] sm:$0xff]  ;;  %v2037_v56 = vld [vmem:[#allocation16 + $0x18] sm:$0xff] }
 0x464   : > { %v1660_v2 = vmax.f32 %v1644_v62, 0.0  ;;  %v3829_v4 = vpop.f32.mrb[28].mxu0  ;;  %4292 = vmatpush3.bf16.msra.mxu1 %v4289_v38  ;;  %v4301_v38 = vpack.c.bf16 %v1865_v36, %v1864_v31  ;;  %v4309_v57 = vpack.c.bf16 %v2037_v56, %v2036_v54  ;;  %4306 = vmatprep.subr.bf16.mxu0 %v4305_v50  ;;  %v2039_v62 = vld [vmem:[#allocation16 + $0x28] sm:$0xff] }
 0x465   : > { %v1647_v8 = vadd.f32 %v3829_v4, %v5870_v19  ;;  %v1608_v10 = vpop.f32.mrb[29].mxu0  ;;  %4294 = vmatprep.subr.bf16.mxu1 %v4293_v59  ;;  %4308 = vmatpush3.bf16.msra.mxu0 %v4305_v50  ;;  %v2207_v50 = vld [vmem:[#allocation17 + $0x28] sm:$0xff] }
 0x466   : > { %v1646_v13 = vadd.f32 %v5870_v19, %v1608_v10  ;;  %3880 = vmatprep.mubr.f32.mxu1 %v1660_v2  ;;  %4310 = vmatprep.subr.bf16.mxu0 %v4309_v57  ;;  %v2041_v2 = vld [vmem:[#allocation16 + $0x38] sm:$0xff] }
 0x467   : > { %3881 = vmatmul.mubr.f32.gmra.mrb[26].mxu1 %v1661_v7  ;;  %v1663_v20 = vmax.f32 %v1647_v8, 0.0  ;;  %v4317_v4 = vpack.c.bf16 %v2041_v2, %v2040_v1  ;;  %v2042_v7 = vld [vmem:[#allocation16 + $0x40] sm:$0xff]  ;;  %v2043_v8 = vld [vmem:[#allocation16 + $0x48] sm:$0xff] }
 0x468   : > { %v1662_v16 = vmax.f32 %v1646_v13, 0.0  ;;  %v3832_v17 = vpop.f32.mrb[30].mxu0  ;;  %4296 = vmatpush3.bf16.msra.mxu1 %v4293_v59  ;;  %v2038_v59 = vld [vmem:[#allocation16 + $0x20] sm:$0xff]  ;;  %v4321_v10 = vpack.c.bf16 %v2043_v8, %v2042_v7  ;;  %v2045_v13 = vld [vmem:[#allocation16 + $0x58] sm:$0xff] }
 0x469   : > { %v1649_v22 = vadd.f32 %v3832_v17, %v5870_v19  ;;  %v1618_v25 = vpop.f32.mrb[31].mxu0  ;;  %4298 = vmatprep.subr.bf16.mxu1 %v4297_v11  ;;  %v4313_v63 = vpack.c.bf16 %v2039_v62, %v2038_v59  ;;  %4312 = vmatpush3.bf16.msra.mxu0 %v4309_v57  ;;  %v2046_v17 = vld [vmem:[#allocation16 + $0x60] sm:$0xff]  ;;  %v2208_v62 = vld [vmem:[#allocation17 + $0x30] sm:$0xff] }
 0x46a   : > { %v1648_v26 = vadd.f32 %v5870_v19, %v1618_v25  ;;  %3883 = vmatprep.mubr.f32.mxu1 %v1662_v16  ;;  %v4337_v19 = vpack.c.bf16 %v2203_v53, %v2202_v48  ;;  %v5891_v25 = vld [vmem:[%s6612_s16] ss:$0 sm:$0xff] }
 0x46b   : > { %3884 = vmatmul.mubr.f32.gmra.mrb[28].mxu1 %v1663_v20  ;;  %v1665_v29 = vmax.f32 %v1649_v22, 0.0  ;;  %4314 = vmatprep.subr.bf16.mxu0 %v4313_v63  ;;  %v2047_v20 = vld [vmem:[#allocation16 + $0x68] sm:$0xff]  ;;  %v2206_v48 = vld [vmem:[#allocation17 + $0x20] sm:$0xff] }
 0x46c   : > { %v1664_v28 = vmax.f32 %v1648_v26, 0.0  ;;  %4300 = vmatpush3.bf16.msra.mxu1 %v4297_v11  ;;  %v2044_v11 = vld [vmem:[#allocation16 + $0x50] sm:$0xff]  ;;  %v4329_v22 = vpack.c.bf16 %v2047_v20, %v2046_v17  ;;  %v4345_v57 = vpack.c.bf16 %v2207_v50, %v2206_v48  ;;  %v2210_v8 = vld [vmem:[#allocation17 + $0x40] sm:$0xff]  ;;  %v2215_v50 = vld [vmem:[#allocation17 + $0x68] sm:$0xff] }
 0x46d   : > { %4302 = vmatprep.subr.bf16.mxu1 %v4301_v38  ;;  %4316 = vmatpush3.bf16.msra.mxu0 %v4313_v63  ;;  %v4325_v16 = vpack.c.bf16 %v2045_v13, %v2044_v11  ;;  %v2209_v63 = vld [vmem:[#allocation17 + $0x38] sm:$0xff]  ;;  %v2214_v48 = vld [vmem:[#allocation17 + $0x60] sm:$0xff] }
 0x46e   : > { %3886 = vmatprep.mubr.f32.mxu1 %v1664_v28  ;;  %4318 = vmatprep.subr.bf16.mxu0 %v4317_v4  ;;  %v2204_v28 = vld [vmem:[#allocation17 + $0x10] sm:$0xff] }
 0x46f   : > { %3887 = vmatmul.mubr.f32.gmra.mrb[30].mxu1 %v1665_v29  ;;  %v2205_v29 = vld [vmem:[#allocation17 + $0x18] sm:$0xff] }
 0x470   : > { %4304 = vmatpush3.bf16.msra.mxu1 %v4301_v38  ;;  %v4341_v45 = vpack.c.bf16 %v2205_v29, %v2204_v28 }
 0x471   : > { %4338 = vmatprep.subr.bf16.mxu1 %v4337_v19  ;;  %4320 = vmatpush3.bf16.msra.mxu0 %v4317_v4  ;;  %v4349_v4 = vpack.c.bf16 %v2209_v63, %v2208_v62  ;;  %v4361_v62 = vpack.c.bf16 %v2215_v50, %v2214_v48  ;;  %v2371_v48 = vld [vmem:[#allocation19 + $0x8] sm:$0xff] }
 0x472   : > { %4322 = vmatprep.subr.bf16.mxu0 %v4321_v10 }
 0x475   : > { %4324 = vmatpush3.bf16.msra.mxu0 %v4321_v10  ;;  %v2211_v10 = vld [vmem:[#allocation17 + $0x48] sm:$0xff] }
 0x476   : > { %4326 = vmatprep.subr.bf16.mxu0 %v4325_v16  ;;  %v4353_v17 = vpack.c.bf16 %v2211_v10, %v2210_v8 }
 0x479   : > { %4328 = vmatpush3.bf16.msra.mxu0 %v4325_v16 }
 0x47a   : > { %4330 = vmatprep.subr.bf16.mxu0 %v4329_v22 }
 0x47d   : > { %4332 = vmatpush3.bf16.msra.mxu0 %v4329_v22  ;;  %v2212_v22 = vld [vmem:[#allocation17 + $0x50] sm:$0xff] }
 0x526   : > { %v3867_v26 = vpop.f32.mrb[16].mxu1 }
 0x527   : > { %v5894_v31 = vadd.f32 %v3867_v26, %v5891_v25  ;;  %v1755_v36 = vpop.f32.mrb[17].mxu1  ;;  %v2213_v26 = vld [vmem:[#allocation17 + $0x58] sm:$0xff] }
 0x528   : > { %v5897_v38 = vadd.f32 %v5891_v25, %v1755_v36 }
 0x529   : > { %1835 = vst [vmem:[%s5900_s7 + $0x8] sm:$0xff] %v5894_v31 }
 0x52a   : > { %1834 = vst [vmem:[%s5900_s7] sm:$0xff] %v5897_v38  ;;  %v3870_v47 = vpop.f32.mrb[18].mxu1  ;;  %3921 = vmatprep.mubr.f32.mxu1 %v5897_v38 }
 0x52b   : > { %v5908_v53 = vadd.f32 %v3870_v47, %v5891_v25  ;;  %v1765_v54 = vpop.f32.mrb[19].mxu1  ;;  %3922 = vmatmul.mubr.f32.vlgmr.msra.gmra.mrb[32].mxu1 %v5894_v31 }
 0x52c   : > { %v5912_v56 = vadd.f32 %v5891_v25, %v1765_v54  ;;  %4340 = vmatpush3.bf16.msra.mxu1 %v4337_v19 }
 0x52d   : > { %1837 = vst [vmem:[%s5900_s7 + $0x18] sm:$0xff] %v5908_v53  ;;  %4342 = vmatprep.subr.bf16.mxu1 %v4341_v45 }
 0x52e   : > { %1836 = vst [vmem:[%s5900_s7 + $0x10] sm:$0xff] %v5912_v56  ;;  %v3873_v59 = vpop.f32.mrb[20].mxu1  ;;  %3924 = vmatprep.mubr.f32.mxu1 %v5912_v56 }
 0x52f   : > { %v5920_v1 = vadd.f32 %v3873_v59, %v5891_v25  ;;  %v1775_v2 = vpop.f32.mrb[21].mxu1  ;;  %3925 = vmatmul.mubr.f32.gmra.mrb[34].mxu1 %v5908_v53 }
 0x530   : > { %v5924_v19 = vadd.f32 %v5891_v25, %v1775_v2  ;;  %4344 = vmatpush3.bf16.msra.mxu1 %v4341_v45  ;;  %v4357_v45 = vpack.c.bf16 %v2213_v26, %v2212_v22  ;;  %v2049_v22 = vld [vmem:[#allocation16 + $0x78] sm:$0xff] }
 0x531   : > { %1839 = vst [vmem:[%s5900_s7 + $0x28] sm:$0xff] %v5920_v1  ;;  %4346 = vmatprep.subr.bf16.mxu1 %v4345_v57 }
 0x532   : > { %1838 = vst [vmem:[%s5900_s7 + $0x20] sm:$0xff] %v5924_v19  ;;  %v3876_v7 = vpop.f32.mrb[22].mxu1  ;;  %3927 = vmatprep.mubr.f32.mxu1 %v5924_v19 }
 0x533   : > { %v5932_v11 = vadd.f32 %v3876_v7, %v5891_v25  ;;  %v1785_v13 = vpop.f32.mrb[23].mxu1  ;;  %3928 = vmatmul.mubr.f32.gmra.mrb[36].mxu1 %v5920_v1 }
 0x534   : > { %v5936_v16 = vadd.f32 %v5891_v25, %v1785_v13  ;;  %4348 = vmatpush3.bf16.msra.mxu1 %v4345_v57 }
 0x535   : > { %1841 = vst [vmem:[%s5900_s7 + $0x38] sm:$0xff] %v5932_v11  ;;  %4350 = vmatprep.subr.bf16.mxu1 %v4349_v4 }
 0x536   : > { %1840 = vst [vmem:[%s5900_s7 + $0x30] sm:$0xff] %v5936_v16  ;;  %v3879_v20 = vpop.f32.mrb[24].mxu1  ;;  %3930 = vmatprep.mubr.f32.mxu1 %v5936_v16 }
 0x537   : > { %v5944_v28 = vadd.f32 %v3879_v20, %v5891_v25  ;;  %v1795_v29 = vpop.f32.mrb[25].mxu1  ;;  %3931 = vmatmul.mubr.f32.gmra.mrb[38].mxu1 %v5932_v11  ;;  %v2048_v20 = vld [vmem:[#allocation16 + $0x70] sm:$0xff] }
 0x538   : > { %v5948_v36 = vadd.f32 %v5891_v25, %v1795_v29  ;;  %4352 = vmatpush3.bf16.msra.mxu1 %v4349_v4  ;;  %v4333_v26 = vpack.c.bf16 %v2049_v22, %v2048_v20  ;;  %v2216_v29 = vld [vmem:[#allocation17 + $0x70] sm:$0xff]  ;;  %v2373_v20 = vld [vmem:[#allocation19 + $0x18] sm:$0xff] }
 0x539   : > { %1843 = vst [vmem:[%s5900_s7 + $0x48] sm:$0xff] %v5944_v28  ;;  %4354 = vmatprep.subr.bf16.mxu1 %v4353_v17 }
 0x53a   : > { %1842 = vst [vmem:[%s5900_s7 + $0x40] sm:$0xff] %v5948_v36  ;;  %v3882_v47 = vpop.f32.mrb[26].mxu1  ;;  %3933 = vmatprep.mubr.f32.mxu1 %v5948_v36  ;;  %4334 = vmatprep.subr.bf16.mxu0 %v4333_v26 }
 0x53b   : > { %v5956_v54 = vadd.f32 %v3882_v47, %v5891_v25  ;;  %v1805_v57 = vpop.f32.mrb[27].mxu1  ;;  %3934 = vmatmul.mubr.f32.gmra.mrb[40].mxu1 %v5944_v28  ;;  %4336 = vmatpush3.bf16.msra.mxu0 %v4333_v26 }
 0x53c   : > { %v5960_v59 = vadd.f32 %v5891_v25, %v1805_v57  ;;  %4356 = vmatpush3.bf16.msra.mxu1 %v4353_v17  ;;  %v5995_v57 = vld [vmem:[%s6613_s18] ss:$0 sm:$0xff] }
 0x53d   : > { %1845 = vst [vmem:[%s5900_s7 + $0x58] sm:$0xff] %v5956_v54  ;;  %4358 = vmatprep.subr.bf16.mxu1 %v4357_v45 }
 0x53e   : > { %1844 = vst [vmem:[%s5900_s7 + $0x50] sm:$0xff] %v5960_v59  ;;  %v3885_v63 = vpop.f32.mrb[28].mxu1  ;;  %3936 = vmatprep.mubr.f32.mxu1 %v5960_v59 }
 0x53f   : > { %v5968_v2 = vadd.f32 %v3885_v63, %v5891_v25  ;;  %v1815_v4 = vpop.f32.mrb[29].mxu1  ;;  %3937 = vmatmul.mubr.f32.gmra.mrb[42].mxu1 %v5956_v54 }
 0x540   : > { %v5972_v7 = vadd.f32 %v5891_v25, %v1815_v4  ;;  %4360 = vmatpush3.bf16.msra.mxu1 %v4357_v45  ;;  %v2217_v45 = vld [vmem:[#allocation17 + $0x78] sm:$0xff] }
 0x541   : > { %1847 = vst [vmem:[%s5900_s7 + $0x68] sm:$0xff] %v5968_v2  ;;  %4362 = vmatprep.subr.bf16.mxu1 %v4361_v62  ;;  %v4365_v47 = vpack.c.bf16 %v2217_v45, %v2216_v29 }
 0x542   : > { %1846 = vst [vmem:[%s5900_s7 + $0x60] sm:$0xff] %v5972_v7  ;;  %v3888_v8 = vpop.f32.mrb[30].mxu1  ;;  %3939 = vmatprep.mubr.f32.mxu1 %v5972_v7 }
 0x543   : > { %v5980_v10 = vadd.f32 %v3888_v8, %v5891_v25  ;;  %v1825_v13 = vpop.f32.mrb[31].mxu1  ;;  %3940 = vmatmul.mubr.f32.gmra.mrb[44].mxu1 %v5968_v2 }
 0x544   : > { %v5984_v17 = vadd.f32 %v5891_v25, %v1825_v13  ;;  %4364 = vmatpush3.bf16.msra.mxu1 %v4361_v62  ;;  %v2370_v25 = vld [vmem:[#allocation19] sm:$0xff]  ;;  %v2372_v13 = vld [vmem:[#allocation19 + $0x10] sm:$0xff] }
 0x545   : > { %1849 = vst [vmem:[%s5900_s7 + $0x78] sm:$0xff] %v5980_v10  ;;  %4366 = vmatprep.subr.bf16.mxu1 %v4365_v47  ;;  %v4369_v50 = vpack.c.bf16 %v2371_v48, %v2370_v25  ;;  %v4373_v25 = vpack.c.bf16 %v2373_v20, %v2372_v13  ;;  %v2376_v20 = vld [vmem:[#allocation19 + $0x30] sm:$0xff] }
 0x546   : > { %1848 = vst [vmem:[%s5900_s7 + $0x70] sm:$0xff] %v5984_v17  ;;  %3942 = vmatprep.mubr.f32.mxu1 %v5984_v17 }
 0x547   : > { %3943 = vmatmul.mubr.f32.gmra.mrb[46].mxu1 %v5980_v10  ;;  %4370 = vmatprep.subr.bf16.mxu0 %v4369_v50 }
 0x548   : > { %4368 = vmatpush3.bf16.msra.mxu1 %v4365_v47 }
 0x549   : > { %4401 = vmatprep.subr.bf16.mxu1 %v4369_v50 }
 0x5fe   : > { %v3923_v62 = vpop.f32.mrb[32].mxu1 }
 0x5ff   : > { %v1945_v63 = vadd.f32 %v3923_v62, %v5995_v57  ;;  %v1939_v4 = vpop.f32.mrb[33].mxu1 }
 0x600   : > { %v1940_v8 = vadd.f32 %v5995_v57, %v1939_v4 }
 0x601   : > { %v2019_v29 = vmax.f32 %v1945_v63, 0.0 }
 0x602   : > { %v2018_v22 = vmax.f32 %v1940_v8, 0.0  ;;  %v3926_v26 = vpop.f32.mrb[34].mxu1 }
 0x603   : > { %v1955_v45 = vadd.f32 %v3926_v26, %v5995_v57  ;;  %v1949_v47 = vpop.f32.mrb[35].mxu1  ;;  %v4377_v26 = vpack.c.bf16 %v2375_v44, %v2374_v41  ;;  %v2378_v44 = vld [vmem:[#allocation19 + $0x40] sm:$0xff] }
 0x604   : > { %v1950_v48 = vadd.f32 %v5995_v57, %v1949_v47  ;;  %3977 = vmatprep.mubr.f32.mxu0 %v2018_v22  ;;  %4033 = vmatprep.mubr.f32.mxu1 %v2018_v22  ;;  %v2377_v22 = vld [vmem:[#allocation19 + $0x38] sm:$0xff] }
 0x605   : > { %3978 = vmatmul.mubr.f32.vlgmr.msra.gmra.mrb[32].mxu0 %v2019_v29  ;;  %4034 = vmatmul.mubr.f32.vlgmr.msra.gmra.mrb[48].mxu1 %v2019_v29  ;;  %v2021_v4 = vmax.f32 %v1955_v45, 0.0 }
 0x606   : > { %v2020_v62 = vmax.f32 %v1950_v48, 0.0  ;;  %v3929_v30 = vpop.f32.mrb[36].mxu1  ;;  %4372 = vmatpush3.bf16.msra.mxu0 %v4369_v50  ;;  %4409 = vmatpush3.bf16.msra.mxu1 %v4369_v50  ;;  %v4381_v48 = vpack.c.bf16 %v2377_v22, %v2376_v20  ;;  %v2380_v22 = vld [vmem:[#allocation19 + $0x50] sm:$0xff] }
 0x607   : > { %v1965_v8 = vadd.f32 %v3929_v30, %v5995_v57  ;;  %v1959_v63 = vpop.f32.mrb[37].mxu1  ;;  %4374 = vmatprep.subr.bf16.mxu0 %v4373_v25  ;;  %4402 = vmatprep.subr.bf16.mxu1 %v4373_v25 }
 0x608   : > { %v1960_v13 = vadd.f32 %v5995_v57, %v1959_v63  ;;  %3980 = vmatprep.mubr.f32.mxu0 %v2020_v62  ;;  %4036 = vmatprep.mubr.f32.mxu1 %v2020_v62  ;;  %v2379_v62 = vld [vmem:[#allocation19 + $0x48] sm:$0xff] }
 0x609   : > { %3981 = vmatmul.mubr.f32.gmra.mrb[34].mxu0 %v2021_v4  ;;  %4037 = vmatmul.mubr.f32.gmra.mrb[50].mxu1 %v2021_v4  ;;  %v2023_v50 = vmax.f32 %v1965_v8, 0.0 }
 0x60a   : > { %v2022_v29 = vmax.f32 %v1960_v13, 0.0  ;;  %v3932_v47 = vpop.f32.mrb[38].mxu1  ;;  %4376 = vmatpush3.bf16.msra.mxu0 %v4373_v25  ;;  %4410 = vmatpush3.bf16.msra.mxu1 %v4373_v25 }
 0x60b   : > { %v1975_v45 = vadd.f32 %v3932_v47, %v5995_v57  ;;  %v1969_v30 = vpop.f32.mrb[39].mxu1  ;;  %4378 = vmatprep.subr.bf16.mxu0 %v4377_v26  ;;  %4403 = vmatprep.subr.bf16.mxu1 %v4377_v26  ;;  %v4385_v47 = vpack.c.bf16 %v2379_v62, %v2378_v44  ;;  %v2382_v62 = vld [vmem:[#allocation19 + $0x60] sm:$0xff] }
 0x60c   : > { %v1970_v41 = vadd.f32 %v5995_v57, %v1969_v30  ;;  %3983 = vmatprep.mubr.f32.mxu0 %v2022_v29  ;;  %4039 = vmatprep.mubr.f32.mxu1 %v2022_v29  ;;  %v2381_v29 = vld [vmem:[#allocation19 + $0x58] sm:$0xff] }
 0x60d   : > { %3984 = vmatmul.mubr.f32.gmra.mrb[36].mxu0 %v2023_v50  ;;  %4040 = vmatmul.mubr.f32.gmra.mrb[52].mxu1 %v2023_v50  ;;  %v2025_v25 = vmax.f32 %v1975_v45, 0.0 }
 0x60e   : > { %v2024_v4 = vmax.f32 %v1970_v41, 0.0  ;;  %v3935_v63 = vpop.f32.mrb[40].mxu1  ;;  %4380 = vmatpush3.bf16.msra.mxu0 %v4377_v26  ;;  %4411 = vmatpush3.bf16.msra.mxu1 %v4377_v26 }
 0x60f   : > { %v1985_v8 = vadd.f32 %v3935_v63, %v5995_v57  ;;  %v1979_v13 = vpop.f32.mrb[41].mxu1  ;;  %4382 = vmatprep.subr.bf16.mxu0 %v4381_v48  ;;  %4404 = vmatprep.subr.bf16.mxu1 %v4381_v48  ;;  %v4389_v63 = vpack.c.bf16 %v2381_v29, %v2380_v22  ;;  %v2384_v29 = vld [vmem:[#allocation19 + $0x70] sm:$0xff] }
 0x610   : > { %v1980_v20 = vadd.f32 %v5995_v57, %v1979_v13  ;;  %3986 = vmatprep.mubr.f32.mxu0 %v2024_v4  ;;  %4042 = vmatprep.mubr.f32.mxu1 %v2024_v4  ;;  %v2383_v4 = vld [vmem:[#allocation19 + $0x68] sm:$0xff] }
 0x611   : > { %3987 = vmatmul.mubr.f32.gmra.mrb[38].mxu0 %v2025_v25  ;;  %4043 = vmatmul.mubr.f32.gmra.mrb[54].mxu1 %v2025_v25  ;;  %v2027_v26 = vmax.f32 %v1985_v8, 0.0 }
 0x612   : > { %v2026_v50 = vmax.f32 %v1980_v20, 0.0  ;;  %v3938_v30 = vpop.f32.mrb[42].mxu1  ;;  %4384 = vmatpush3.bf16.msra.mxu0 %v4381_v48  ;;  %4412 = vmatpush3.bf16.msra.mxu1 %v4381_v48 }
 0x613   : > { %v1995_v45 = vadd.f32 %v3938_v30, %v5995_v57  ;;  %v1989_v41 = vpop.f32.mrb[43].mxu1  ;;  %4386 = vmatprep.subr.bf16.mxu0 %v4385_v47  ;;  %4405 = vmatprep.subr.bf16.mxu1 %v4385_v47  ;;  %v4393_v30 = vpack.c.bf16 %v2383_v4, %v2382_v62 }
 0x614   : > { %v1990_v44 = vadd.f32 %v5995_v57, %v1989_v41  ;;  %3989 = vmatprep.mubr.f32.mxu0 %v2026_v50  ;;  %4045 = vmatprep.mubr.f32.mxu1 %v2026_v50  ;;  %v2385_v50 = vld [vmem:[#allocation19 + $0x78] sm:$0xff] }
 0x615   : > { %3990 = vmatmul.mubr.f32.gmra.mrb[40].mxu0 %v2027_v26  ;;  %4046 = vmatmul.mubr.f32.gmra.mrb[56].mxu1 %v2027_v26  ;;  %v2029_v48 = vmax.f32 %v1995_v45, 0.0 }
 0x616   : > { %v2028_v25 = vmax.f32 %v1990_v44, 0.0  ;;  %v3941_v13 = vpop.f32.mrb[44].mxu1  ;;  %4388 = vmatpush3.bf16.msra.mxu0 %v4385_v47  ;;  %4413 = vmatpush3.bf16.msra.mxu1 %v4385_v47 }
 0x617   : > { %v2005_v8 = vadd.f32 %v3941_v13, %v5995_v57  ;;  %v1999_v20 = vpop.f32.mrb[45].mxu1  ;;  %4390 = vmatprep.subr.bf16.mxu0 %v4389_v63  ;;  %4406 = vmatprep.subr.bf16.mxu1 %v4389_v63  ;;  %v4397_v13 = vpack.c.bf16 %v2385_v50, %v2384_v29 }
 0x618   : > { %v2000_v22 = vadd.f32 %v5995_v57, %v1999_v20  ;;  %3992 = vmatprep.mubr.f32.mxu0 %v2028_v25  ;;  %4048 = vmatprep.mubr.f32.mxu1 %v2028_v25 }
 0x619   : > { %3993 = vmatmul.mubr.f32.gmra.mrb[42].mxu0 %v2029_v48  ;;  %4049 = vmatmul.mubr.f32.gmra.mrb[58].mxu1 %v2029_v48  ;;  %v2031_v47 = vmax.f32 %v2005_v8, 0.0 }
 0x61a   : > { %v2030_v26 = vmax.f32 %v2000_v22, 0.0  ;;  %v3944_v41 = vpop.f32.mrb[46].mxu1  ;;  %4392 = vmatpush3.bf16.msra.mxu0 %v4389_v63  ;;  %4414 = vmatpush3.bf16.msra.mxu1 %v4389_v63 }
 0x61b   : > { %v2015_v45 = vadd.f32 %v3944_v41, %v5995_v57  ;;  %v2009_v44 = vpop.f32.mrb[47].mxu1  ;;  %4394 = vmatprep.subr.bf16.mxu0 %v4393_v30  ;;  %4407 = vmatprep.subr.bf16.mxu1 %v4393_v30 }
 0x61c   : > { %v2010_v62 = vadd.f32 %v5995_v57, %v2009_v44  ;;  %3995 = vmatprep.mubr.f32.mxu0 %v2030_v26  ;;  %4051 = vmatprep.mubr.f32.mxu1 %v2030_v26 }
 0x61d   : > { %3996 = vmatmul.mubr.f32.gmra.mrb[44].mxu0 %v2031_v47  ;;  %4052 = vmatmul.mubr.f32.gmra.mrb[60].mxu1 %v2031_v47  ;;  %v2033_v25 = vmax.f32 %v2015_v45, 0.0 }
 0x61e   : > { %v2032_v4 = vmax.f32 %v2010_v62, 0.0  ;;  %4396 = vmatpush3.bf16.msra.mxu0 %v4393_v30  ;;  %4415 = vmatpush3.bf16.msra.mxu1 %v4393_v30  ;;  %v6553_v62 = vmov 0.0  }
 0x61f   : > { %4398 = vmatprep.subr.bf16.mxu0 %v4397_v13  ;;  %4408 = vmatprep.subr.bf16.mxu1 %v4397_v13 }
 0x620   : > { %3998 = vmatprep.mubr.f32.mxu0 %v2032_v4  ;;  %4054 = vmatprep.mubr.f32.mxu1 %v2032_v4 }
 0x621   : > { %3999 = vmatmul.mubr.f32.gmra.mrb[46].mxu0 %v2033_v25  ;;  %4055 = vmatmul.mubr.f32.gmra.mrb[62].mxu1 %v2033_v25 }
 0x622   : > { %4400 = vmatpush3.bf16.msra.mxu0 %v4397_v13  ;;  %4416 = vmatpush3.bf16.msra.mxu1 %v4397_v13  ;;  %v6067_v13 = vld [vmem:[%s6614_s27] ss:$0 sm:$0xff] }
 0x623   : > { %4089 = vmatprep.mubr.f32.mxu0 %v5897_v38  ;;  %4101 = vmatprep.mubr.f32.mxu1 %v5948_v36 }
 0x625   : > { %4090 = vmatmul.mubr.f32.vlgmr.msra.gmra.mrb[48].mxu0 %v5894_v31  ;;  %4102 = vmatmul.mubr.f32.vlgmr.msra.gmra.mrb[64].mxu1 %v5944_v28  ;;  %v2667_v31 = vlaneseq }
 0x626   : > { %4092 = vmatprep.mubr.f32.mxu0 %v5912_v56  ;;  %4104 = vmatprep.mubr.f32.mxu1 %v5960_v59  ;;  %v6035_v56 = vstv %s6555_s14 }
 0x627   : > { %v6029_v38 = vshrl.u32 %v2667_v31, 7 }
 0x629   : > { %4093 = vmatmul.mubr.f32.gmra.mrb[50].mxu0 %v5908_v53  ;;  %4105 = vmatmul.mubr.f32.gmra.mrb[66].mxu1 %v5956_v54  ;;  %v2669_v53 = vadd.s32 8, %v6029_v38  ;;  %v2672_v28 = vadd.s32 32, %v6029_v38  ;;  %v2674_v54 = vadd.s32 48, %v6029_v38  ;;  %v2685_v59 = vadd.s32 %v6035_v56, %v6029_v38 }
 0x62a   : > { %4095 = vmatprep.mubr.f32.mxu0 %v5924_v19  ;;  %4107 = vmatprep.mubr.f32.mxu1 %v5972_v7  ;;  %v2670_v19 = vadd.s32 16, %v6029_v38  ;;  %v2677_v7 = vadd.s32 72, %v6029_v38  ;;  %v2679_v63 = vadd.s32 88, %v6029_v38  ;;  %v2678_v48 = vadd.s32 80, %v6029_v38 }
 0x62b   : > { %v2686_v36 = vadd.s32 %v6035_v56, %v2669_v53  ;;  %v2689_v8 = vadd.s32 %v6035_v56, %v2672_v28  ;;  %v2681_v30 = vadd.s32 104, %v6029_v38  ;;  %v2680_v22 = vadd.s32 96, %v6029_v38  ;;  %v6076_v53 = vld [vmem:[%s6615_s21] ss:$0 sm:$0xff]  ;;  %s6362_s21 = scalar_lea.sflag [#allocation22], %s779_s1 }
 0x62c   : > { %v2691_v29 = vadd.s32 %v6035_v56, %v2674_v54  ;;  %vm2701_vm1 = vcmp.lt.s32.totalorder %v2685_v59, 200  ;;  %v2694_v50 = vadd.s32 %v6035_v56, %v2677_v7  ;;  %v2696_v41 = vadd.s32 %v6035_v56, %v2679_v63 }
 0x62d   : > { %4096 = vmatmul.mubr.f32.gmra.mrb[52].mxu0 %v5920_v1  ;;  %4108 = vmatmul.mubr.f32.gmra.mrb[68].mxu1 %v5968_v2  ;;  %v2671_v1 = vadd.s32 24, %v6029_v38  ;;  %vm2702_vm0 = vcmp.lt.s32.totalorder %v2686_v36, 200  ;;  %v2695_v47 = vadd.s32 %v6035_v56, %v2678_v48  ;;  %vm2705_vm5 = vcmp.lt.s32.totalorder %v2689_v8, 200 }
 0x62e   : > { %4098 = vmatprep.mubr.f32.mxu0 %v5936_v16  ;;  %4110 = vmatprep.mubr.f32.mxu1 %v5984_v17  ;;  %v2673_v16 = vadd.s32 40, %v6029_v38  ;;  %v2687_v17 = vadd.s32 %v6035_v56, %v2670_v19  ;;  %v2698_v45 = vadd.s32 %v6035_v56, %v2681_v30  ;;  %v2697_v44 = vadd.s32 %v6035_v56, %v2680_v22 }
 0x62f   : > { %v2688_v2 = vadd.s32 %v6035_v56, %v2671_v1  ;;  %v3288_v4 = vsel %vm2702_vm0, 1.0, %v6553_v62  ;;  %v3287_v25 = vsel %vm2701_vm1, 1.0, %v6553_v62  ;;  %vm2707_vm7 = vcmp.lt.s32.totalorder %v2691_v29, 200 }
 0x630   : > { %v2690_v57 = vadd.s32 %v6035_v56, %v2673_v16  ;;  %vm2703_vm3 = vcmp.lt.s32.totalorder %v2687_v17, 200  ;;  %vm2710_vm8 = vcmp.lt.s32.totalorder %v2694_v50, 200  ;;  %v6085_v16 = vsel %vm2705_vm5, 1.0, %v6553_v62 }
 0x631   : > { %4099 = vmatmul.mubr.f32.gmra.mrb[54].mxu0 %v5932_v11  ;;  %4111 = vmatmul.mubr.f32.gmra.mrb[70].mxu1 %v5980_v10  ;;  %v2675_v11 = vadd.s32 56, %v6029_v38  ;;  %v2676_v10 = vadd.s32 64, %v6029_v38  ;;  %vm2704_vm2 = vcmp.lt.s32.totalorder %v2688_v2, 200  ;;  %v6079_v1 = vsel %vm2703_vm3, 1.0, %v6553_v62 }
 0x632   : > { %vm2706_vm4 = vcmp.lt.s32.totalorder %v2690_v57, 200  ;;  %v3290_v31 = vsel %vm2704_vm2, 1.0, %v6553_v62  ;;  %vm2712_vm10 = vcmp.lt.s32.totalorder %v2696_v41, 200  ;;  %vm2711_vm11 = vcmp.lt.s32.totalorder %v2695_v47, 200 }
 0x633   : > { %v2692_v20 = vadd.s32 %v6035_v56, %v2675_v11  ;;  %v2693_v26 = vadd.s32 %v6035_v56, %v2676_v10  ;;  %v6082_v19 = vsel %vm2706_vm4, 1.0, %v6553_v62  ;;  %v6091_v54 = vsel %vm2707_vm7, 1.0, %v6553_v62 }
 0x634   : > { %vm2714_vm12 = vcmp.lt.s32.totalorder %v2698_v45, 200  ;;  %vm2713_vm13 = vcmp.lt.s32.totalorder %v2697_v44, 200  ;;  %v2683_v59 = vadd.s32 120, %v6029_v38  ;;  %v6098_v57 = vsel %vm2710_vm8, 1.0, %v6553_v62  ;;  %v4663_v45 = vld [vmem:[%s5702_s11] sm:$0xff] }
 0x635   : > { %vm2708_vm6 = vcmp.lt.s32.totalorder %v2692_v20, 200  ;;  %vm2709_vm9 = vcmp.lt.s32.totalorder %v2693_v26, 200  ;;  %v6108_v20 = vsel %vm2712_vm10, 1.0, %v6553_v62  ;;  %v6112_v30 = vsel %vm2711_vm11, 1.0, %v6553_v62 }
 0x636   : > { %v6088_v28 = vsel %vm2708_vm6, 1.0, %v6553_v62  ;;  %v6102_v63 = vsel %vm2709_vm9, 1.0, %v6553_v62  ;;  %v6118_v50 = vsel %vm2714_vm12, 1.0, %v6553_v62  ;;  %v6121_v26 = vsel %vm2713_vm13, 1.0, %v6553_v62 }
 0x6d8   : > { %v3979_v11 = vpop.f32.mrb[32].mxu0  ;;  %v4035_v36 = vpop.f32.mrb[48].mxu1 }
 0x6d9   : > { %v2129_v2 = vadd.f32 %v3979_v11, %v6067_v13  ;;  %v2297_v7 = vadd.f32 %v4035_v36, %v6076_v53  ;;  %v2123_v10 = vpop.f32.mrb[33].mxu0  ;;  %v2291_v17 = vpop.f32.mrb[49].mxu1  ;;  %v2682_v36 = vadd.s32 112, %v6029_v38 }
 0x6da   : > { %v2124_v48 = vadd.f32 %v6067_v13, %v2123_v10  ;;  %v2292_v8 = vadd.f32 %v6076_v53, %v2291_v17 }
 0x6db   : > { %v2750_v22 = vsub.f32 %v2129_v2, %v5850_v33  ;;  %v2782_v29 = vsub.f32 %v2297_v7, %v1274_v42  ;;  %v6128_v33 = vadd.s32 %v6035_v56, %v2683_v59 }
 0x6dc   : > { %v2749_v44 = vsub.f32 %v2124_v48, %v4663_v45  ;;  %v2781_v41 = vsub.f32 %v2292_v8, %v1273_v40  ;;  %v3982_v11 = vpop.f32.mrb[34].mxu0  ;;  %v4038_v47 = vpop.f32.mrb[50].mxu1 }
 0x6dd   : > { %v2766_v35 = vmul.f32 %v3288_v4, %v2750_v22  ;;  %v2798_v42 = vmul.f32 %v3288_v4, %v2782_v29  ;;  %v2139_v2 = vadd.f32 %v3982_v11, %v6067_v13  ;;  %v2307_v7 = vadd.f32 %v4038_v47, %v6076_v53  ;;  %v2133_v10 = vpop.f32.mrb[35].mxu0  ;;  %v2301_v17 = vpop.f32.mrb[51].mxu1  ;;  %v4665_v11 = vld [vmem:[%s5702_s11 + $0x10] sm:$0xff] }
 0x6de   : > { %v2765_v48 = vmul.f32 %v3287_v25, %v2749_v44  ;;  %v2797_v37 = vmul.f32 %v3287_v25, %v2781_v41  ;;  %v2134_v40 = vadd.f32 %v6067_v13, %v2133_v10  ;;  %v2302_v8 = vadd.f32 %v6076_v53, %v2301_v17 }
 0x6df   : > { %v2814_v45 = vmul.f32 %v2766_v35, %v2766_v35  ;;  %v2854_v38 = vmul.f32 %v2798_v42, %v2798_v42  ;;  %v2752_v59 = vsub.f32 %v2139_v2, %v4664_v32  ;;  %v2784_v4 = vsub.f32 %v2307_v7, %v1276_v51 }
 0x6e0   : > { %v2813_v22 = vmul.f32 %v2765_v48, %v2765_v48  ;;  %v2853_v29 = vmul.f32 %v2797_v37, %v2797_v37  ;;  %v2751_v47 = vsub.f32 %v2134_v40, %v4665_v11  ;;  %v2783_v44 = vsub.f32 %v2302_v8, %v1275_v49  ;;  %v3985_v25 = vpop.f32.mrb[36].mxu0  ;;  %v4041_v41 = vpop.f32.mrb[52].mxu1  ;;  %v4666_v37 = vld [vmem:[%s5702_s11 + $0x28] sm:$0xff] }
 0x6e1   : > { %v2768_v10 = vmul.f32 %v3290_v31, %v2752_v59  ;;  %v2800_v62 = vmul.f32 %v3290_v31, %v2784_v4  ;;  %v2149_v35 = vadd.f32 %v3985_v25, %v6067_v13  ;;  %v2317_v42 = vadd.f32 %v4041_v41, %v6076_v53  ;;  %v2143_v32 = vpop.f32.mrb[37].mxu0  ;;  %v2311_v2 = vpop.f32.mrb[53].mxu1 }
 0x6e2   : > { %v2829_v43 = vadd.f32 %v2814_v45, %v2813_v22  ;;  %v2869_v51 = vadd.f32 %v2854_v38, %v2853_v29  ;;  %v2767_v7 = vmul.f32 %v6079_v1, %v2751_v47  ;;  %v2799_v17 = vmul.f32 %v6079_v1, %v2783_v44  ;;  %v4667_v47 = vld [vmem:[%s5702_s11 + $0x20] sm:$0xff] }
 0x6e3   : > { %v2816_v48 = vmul.f32 %v2768_v10, %v2768_v10  ;;  %v2754_v46 = vsub.f32 %v2149_v35, %v4666_v37  ;;  %v2786_v49 = vsub.f32 %v2317_v42, %v1278_v60  ;;  %v6148_v31 = vadd.s32 %v6035_v56, %v2682_v36  ;;  %v4668_v35 = vld [vmem:[%s5702_s11 + $0x38] sm:$0xff] }
 0x6e4   : > { %v2815_v40 = vmul.f32 %v2767_v7, %v2767_v7  ;;  %v2855_v8 = vmul.f32 %v2799_v17, %v2799_v17  ;;  %v2144_v59 = vadd.f32 %v6067_v13, %v2143_v32  ;;  %v2312_v45 = vadd.f32 %v6076_v53, %v2311_v2  ;;  %v3988_v38 = vpop.f32.mrb[38].mxu0  ;;  %v4044_v4 = vpop.f32.mrb[54].mxu1 }
 0x6e5   : > { %v2856_v1 = vmul.f32 %v2800_v62, %v2800_v62  ;;  %v2770_v22 = vmul.f32 %v6082_v19, %v2754_v46  ;;  %v2159_v29 = vadd.f32 %v3988_v38, %v6067_v13  ;;  %v2327_v52 = vadd.f32 %v4044_v4, %v6076_v53  ;;  %v2153_v60 = vpop.f32.mrb[39].mxu0  ;;  %v2321_v11 = vpop.f32.mrb[55].mxu1 }
 0x6e6   : > { %v2830_v56 = vadd.f32 %v2829_v43, %v2815_v40  ;;  %v2870_v36 = vadd.f32 %v2869_v51, %v2855_v8  ;;  %v2753_v44 = vsub.f32 %v2144_v59, %v4667_v47  ;;  %v2785_v25 = vsub.f32 %v2312_v45, %v1277_v58  ;;  %v4669_v59 = vld [vmem:[%s5702_s11 + $0x30] sm:$0xff] }
 0x6e7   : > { %v2818_v41 = vmul.f32 %v2770_v22, %v2770_v22  ;;  %v2802_v10 = vmul.f32 %v6082_v19, %v2786_v49  ;;  %v2756_v62 = vsub.f32 %v2159_v29, %v4668_v35  ;;  %v2788_v42 = vsub.f32 %v2327_v52, %v1280_v5 }
 0x6e8   : > { %v2769_v32 = vmul.f32 %v6085_v16, %v2753_v44  ;;  %v2831_v2 = vadd.f32 %v2830_v56, %v2816_v48  ;;  %v2801_v7 = vmul.f32 %v6085_v16, %v2785_v25  ;;  %v2871_v43 = vadd.f32 %v2870_v36, %v2856_v1  ;;  %v3991_v51 = vpop.f32.mrb[40].mxu0  ;;  %v4047_v17 = vpop.f32.mrb[56].mxu1  ;;  %v4670_v1 = vld [vmem:[%s5702_s11 + $0x48] sm:$0xff] }
 0x6e9   : > { %v2772_v55 = vmul.f32 %v6088_v28, %v2756_v62  ;;  %v2804_v58 = vmul.f32 %v6088_v28, %v2788_v42  ;;  %v2154_v19 = vadd.f32 %v6067_v13, %v2153_v60  ;;  %v2322_v37 = vadd.f32 %v6076_v53, %v2321_v11  ;;  %v2163_v61 = vpop.f32.mrb[41].mxu0  ;;  %v2331_v5 = vpop.f32.mrb[57].mxu1 }
 0x6ea   : > { %v2817_v46 = vmul.f32 %v2769_v32, %v2769_v32  ;;  %v2857_v49 = vmul.f32 %v2801_v7, %v2801_v7  ;;  %v2169_v48 = vadd.f32 %v3991_v51, %v6067_v13  ;;  %v2337_v16 = vadd.f32 %v4047_v17, %v6076_v53 }
 0x6eb   : > { %v2858_v40 = vmul.f32 %v2802_v10, %v2802_v10  ;;  %v2820_v8 = vmul.f32 %v2772_v55, %v2772_v55  ;;  %v2755_v45 = vsub.f32 %v2154_v19, %v4669_v59  ;;  %v2787_v28 = vsub.f32 %v2322_v37, %v1279_v3  ;;  %v4672_v37 = vld [vmem:[%s5702_s11 + $0x58] sm:$0xff] }
 0x6ec   : > { %vm2716_vm14 = vcmp.lt.s32.totalorder %v6128_v33, 200  ;;  %v2832_v38 = vadd.f32 %v2831_v2, %v2817_v46  ;;  %v2872_v4 = vadd.f32 %v2871_v43, %v2857_v49  ;;  %v2758_v22 = vsub.f32 %v2169_v48, %v4670_v1  ;;  %v3994_v52 = vpop.f32.mrb[42].mxu0  ;;  %v4050_v60 = vpop.f32.mrb[58].mxu1 }
 0x6ed   : > { %v2790_v29 = vsub.f32 %v2337_v16, %v1282_v14  ;;  %v2771_v11 = vmul.f32 %v6091_v54, %v2755_v45  ;;  %v2803_v56 = vmul.f32 %v6091_v54, %v2787_v28  ;;  %v2164_v36 = vadd.f32 %v6067_v13, %v2163_v61  ;;  %v2173_v3 = vpop.f32.mrb[43].mxu0  ;;  %v2341_v47 = vpop.f32.mrb[59].mxu1  ;;  %v4671_v14 = vld [vmem:[%s5702_s11 + $0x40] sm:$0xff]  ;;  %v4673_v28 = vld [vmem:[%s5702_s11 + $0x50] sm:$0xff] }
 0x6ee   : > { %v2332_v0 = vadd.f32 %v6076_v53, %v2331_v5  ;;  %v2860_v44 = vmul.f32 %v2804_v58, %v2804_v58  ;;  %v2833_v25 = vadd.f32 %v2832_v38, %v2818_v41  ;;  %v2873_v10 = vadd.f32 %v2872_v4, %v2858_v40 }
 0x6ef   : > { %v2774_v35 = vmul.f32 %v6098_v57, %v2758_v22  ;;  %v2819_v6 = vmul.f32 %v2771_v11, %v2771_v11  ;;  %v2859_v62 = vmul.f32 %v2803_v56, %v2803_v56  ;;  %v2757_v42 = vsub.f32 %v2164_v36, %v4671_v14 }
 0x6f0   : > { %v2789_v32 = vsub.f32 %v2332_v0, %v1281_v12  ;;  %v2806_v2 = vmul.f32 %v6098_v57, %v2790_v29  ;;  %v2179_v7 = vadd.f32 %v3994_v52, %v6067_v13  ;;  %v2347_v43 = vadd.f32 %v4050_v60, %v6076_v53  ;;  %v3997_v51 = vpop.f32.mrb[44].mxu0  ;;  %v4053_v41 = vpop.f32.mrb[60].mxu1 }
 0x6f1   : > { %v2822_v54 = vmul.f32 %v2774_v35, %v2774_v35  ;;  %vm2715_vm15 = vcmp.lt.s32.totalorder %v6148_v31, 200  ;;  %v2834_v17 = vadd.f32 %v2833_v25, %v2819_v6  ;;  %v2874_v55 = vadd.f32 %v2873_v10, %v2859_v62  ;;  %v2183_v9 = vpop.f32.mrb[45].mxu0  ;;  %v2351_v12 = vpop.f32.mrb[61].mxu1 }
 0x6f2   : > { %v2773_v58 = vmul.f32 %v6102_v63, %v2757_v42  ;;  %v2805_v19 = vmul.f32 %v6102_v63, %v2789_v32  ;;  %v2760_v61 = vsub.f32 %v2179_v7, %v4672_v37  ;;  %v2792_v57 = vsub.f32 %v2347_v43, %v1284_v23  ;;  %v4675_v43 = vld [vmem:[%s5702_s11 + $0x60] sm:$0xff] }
 0x6f3   : > { %v2174_v5 = vadd.f32 %v6067_v13, %v2173_v3  ;;  %v2342_v46 = vadd.f32 %v6076_v53, %v2341_v47  ;;  %v2835_v48 = vadd.f32 %v2834_v17, %v2820_v8  ;;  %v2875_v40 = vadd.f32 %v2874_v55, %v2860_v44  ;;  %v4674_v3 = vld [vmem:[%s5702_s11 + $0x68] sm:$0xff]  ;;  %v6228_v55 = vld [vmem:[%s6619_s17] ss:$0 sm:$0xff]  ;;  %s4994_s17 = sshll.u32 %s5188_s20, 4  ;;  %s4995_s17 = int_to_ptr.vmem [resolvable:$false] %s4994_s17 }
 0x6f4   : > { %v2821_v49 = vmul.f32 %v2773_v58, %v2773_v58  ;;  %v2861_v16 = vmul.f32 %v2805_v19, %v2805_v19  ;;  %v2862_v59 = vmul.f32 %v2806_v2, %v2806_v2  ;;  %v2808_v45 = vmul.f32 %v6108_v20, %v2792_v57  ;;  %v4000_v4 = vpop.f32.mrb[46].mxu0  ;;  %v4056_v15 = vpop.f32.mrb[62].mxu1  ;;  %v6245_v57 = vld [vmem:[%s5702_s11 + $0x78] sm:$0xff]  ;;  %p4997_p11 = scmp.lt.s32.totalorder %s6352_s2, %s4995_s17 }
 0x6f5   : > { %v2759_v63 = vsub.f32 %v2174_v5, %v4673_v28  ;;  %v2791_v38 = vsub.f32 %v2342_v46, %v1283_v21  ;;  %v2189_v22 = vadd.f32 %v3997_v51, %v6067_v13  ;;  %v2357_v29 = vadd.f32 %v4053_v41, %v6076_v53  ;;  %v2193_v8 = vpop.f32.mrb[47].mxu0  ;;  %v2361_v52 = vpop.f32.mrb[63].mxu1 }
 0x6f6   : > { %v2836_v23 = vadd.f32 %v2835_v48, %v2821_v49  ;;  %v2876_v1 = vadd.f32 %v2875_v40, %v2861_v16  ;;  %v2776_v60 = vmul.f32 %v6108_v20, %v2760_v61  ;;  %v6616_v36 = vmov 0.0  }
 0x6f7   : > { %v2775_v11 = vmul.f32 %v6112_v30, %v2759_v63  ;;  %v2807_v56 = vmul.f32 %v6112_v30, %v2791_v38  ;;  %v6208_v18 = vsel %vm2716_vm14, 1.0, %v6616_v36  ;;  %v2762_v47 = vsub.f32 %v2189_v22, %v4674_v3 }
 0x6f8   : > { %v2837_v21 = vadd.f32 %v2836_v23, %v2822_v54  ;;  %v2877_v0 = vadd.f32 %v2876_v1, %v2862_v59  ;;  %v6617_v44 = vmax.f32 %v5821_v24, 0.0  ;;  %v2184_v20 = vadd.f32 %v6067_v13, %v2183_v9  ;;  %v4091_v30 = vpop.f32.mrb[48].mxu0  ;;  %v4103_v62 = vpop.f32.mrb[64].mxu1 }
 0x6f9   : > { %v2823_v10 = vmul.f32 %v2775_v11, %v2775_v11  ;;  %v2863_v35 = vmul.f32 %v2807_v56, %v2807_v56  ;;  %v2352_v6 = vadd.f32 %v6076_v53, %v2351_v12  ;;  %v2864_v14 = vmul.f32 %v2808_v45, %v2808_v45  ;;  %v2459_v24 = vpop.f32.mrb[49].mxu0  ;;  %v2499_v54 = vpop.f32.mrb[65].mxu1 }
 0x6fa   : > { %v2794_v25 = vsub.f32 %v2357_v29, %v6617_v44  ;;  %v2778_v33 = vmul.f32 %v6118_v50, %v2762_v47  ;;  %v6217_v42 = vadd.f32 %v4000_v4, %v6067_v13  ;;  %v2367_v32 = vadd.f32 %v4056_v15, %v6076_v53 }
 0x6fb   : > { %v6220_v2 = vadd.f32 %v2837_v21, %v2823_v10  ;;  %v2878_v7 = vadd.f32 %v2877_v0, %v2863_v35  ;;  %v2761_v51 = vsub.f32 %v2184_v20, %v4675_v43  ;;  %v6618_v41 = vmax.f32 %v5824_v27, 0.0 }
 0x6fc   : > { %v6230_v58 = vmul.f32 %v2776_v60, %v2776_v60  ;;  %v6232_v19 = vmul.f32 %v2778_v33, %v2778_v33  ;;  %v6235_v9 = vmul.f32 %v6118_v50, %v2794_v25  ;;  %v6240_v12 = vsel %vm2715_vm15, 1.0, %v6616_v36  ;;  %v4094_v46 = vpop.f32.mrb[50].mxu0  ;;  %v4106_v49 = vpop.f32.mrb[66].mxu1 }
 0x6fd   : > { %v2793_v17 = vsub.f32 %v2352_v6, %v6618_v41  ;;  %v2777_v27 = vmul.f32 %v6121_v26, %v2761_v51  ;;  %v2879_v61 = vadd.f32 %v2878_v7, %v2864_v14  ;;  %v2764_v5 = vsub.f32 %v6217_v42, %v6245_v57  ;;  %v2469_v40 = vpop.f32.mrb[51].mxu0 }
 0x6fe   : > { %v6250_v50 = vadd.f32 %v6067_v13, %v2193_v8  ;;  %v2465_v31 = vadd.f32 %v4091_v30, %v6228_v55  ;;  %v2505_v48 = vadd.f32 %v4103_v62, %v6228_v55  ;;  %v2460_v16 = vadd.f32 %v6228_v55, %v2459_v24 }
 0x6ff   : > { %v2809_v37 = vmul.f32 %v6121_v26, %v2793_v17  ;;  %v2509_v26 = vpop.f32.mrb[67].mxu1  ;;  %v6620_v45 = vmax.f32 %v5833_v34, 0.0  ;;  %v2362_v63 = vadd.f32 %v6076_v53, %v2361_v52  ;;  %v2500_v38 = vadd.f32 %v6228_v55, %v2499_v54  ;;  %v4677_v52 = vld [vmem:[%s5702_s11 + $0x70] sm:$0xff]  ;;  %s6324_s11 = scalar_lea.vmem [#allocation23], %s5688_s10  ;;  %s6343_s10 = sshll.u32 %s5330_s23, 11 }
 0x700   : > { %v6261_v13 = vmul.f32 %v2777_v27, %v2777_v27  ;;  %2539 = vst [vmem:[%s6264_s24 + $0x8] sm:$0xff] %v2465_v31  ;;  %v2555_v4 = vsub.f32 0.0, %v2465_v31  ;;  %2547 = vst [vmem:[%s6264_s24 + $0x48] sm:$0xff] %v2505_v48  ;;  %v2563_v15 = vsub.f32 0.0, %v2505_v48  ;;  %v2554_v34 = vsub.f32 0.0, %v2460_v16  ;;  %v4097_v29 = vpop.f32.mrb[52].mxu0  ;;  %s6349_s18 = scalar_lea.hbm %s6622_s6, %s6343_s10  ;;  %s6358_s22 = scalar_lea.hbm %s6623_s0, %s6343_s10 }
 0x701   : > { %v2865_v59 = vmul.f32 %v2809_v37, %v2809_v37  ;;  %v6257_v28 = vsub.f32 %v2367_v32, %v6620_v45  ;;  %2538 = vst [vmem:[%s6264_s24] sm:$0xff] %v2460_v16  ;;  %2546 = vst [vmem:[%s6264_s24 + $0x40] sm:$0xff] %v2500_v38  ;;  %v2562_v23 = vsub.f32 0.0, %v2500_v38  ;;  %v2475_v1 = vadd.f32 %v4094_v46, %v6228_v55  ;;  %v4109_v8 = vpop.f32.mrb[68].mxu1  ;;  %v2479_v44 = vpop.f32.mrb[53].mxu0 }
 0x702   : > { %v2515_v22 = vadd.f32 %v4106_v49, %v6228_v55  ;;  %v2763_v60 = vsub.f32 %v6250_v50, %v4677_v52  ;;  %v2572_v11 = vmul.f32 1.442695, %v2555_v4  ;;  %v2588_v56 = vmul.f32 1.442695, %v2563_v15  ;;  %v2519_v25 = vpop.f32.mrb[69].mxu1 }
 0x703   : > { %v6269_v53 = vadd.f32 %v2879_v61, %v2865_v59  ;;  %v2570_v36 = vmul.f32 1.442695, %v2554_v34  ;;  %v2586_v21 = vmul.f32 1.442695, %v2562_v23  ;;  %2541 = vst [vmem:[%s6264_s24 + $0x18] sm:$0xff] %v2475_v1  ;;  %v2557_v0 = vsub.f32 0.0, %v2475_v1 }
 0x704   : > { %2549 = vst [vmem:[%s6264_s24 + $0x58] sm:$0xff] %v2515_v22  ;;  %v2565_v3 = vsub.f32 0.0, %v2515_v22  ;;  %v2470_v47 = vadd.f32 %v6228_v55, %v2469_v40  ;;  %v6621_v10 = vmax.f32 %v5836_v39, 0.0  ;;  %4599 = vpow2.f32 %v2572_v11  ;;  %v4100_v33 = vpop.f32.mrb[54].mxu0  ;;  %v4112_v54 = vpop.f32.mrb[70].mxu1 }
 0x705   : > { %v2510_v20 = vadd.f32 %v6228_v55, %v2509_v26  ;;  %v2485_v6 = vadd.f32 %v4097_v29, %v6228_v55  ;;  %4601 = vpow2.f32 %v2588_v56  ;;  %v2576_v30 = vmul.f32 1.442695, %v2557_v0  ;;  %v2489_v7 = vpop.f32.mrb[55].mxu0  ;;  %v2529_v17 = vpop.f32.mrb[71].mxu1 }
 0x706   : > { %v2795_v35 = vsub.f32 %v2362_v63, %v6621_v10  ;;  %v2592_v62 = vmul.f32 1.442695, %v2565_v3  ;;  %2540 = vst [vmem:[%s6264_s24 + $0x10] sm:$0xff] %v2470_v47  ;;  %v2556_v14 = vsub.f32 0.0, %v2470_v47  ;;  %4603 = vpow2.f32 %v2570_v36 }
 0x707   : > { %2548 = vst [vmem:[%s6264_s24 + $0x50] sm:$0xff] %v2510_v20  ;;  %v2564_v32 = vsub.f32 0.0, %v2510_v20  ;;  %2543 = vst [vmem:[%s6264_s24 + $0x28] sm:$0xff] %v2485_v6  ;;  %v2559_v24 = vsub.f32 0.0, %v2485_v6  ;;  %v2525_v39 = vadd.f32 %v4109_v8, %v6228_v55  ;;  %4605 = vpow2.f32 %v2586_v21 }
 0x708   : > { %v2574_v43 = vmul.f32 1.442695, %v2556_v14  ;;  %v2480_v51 = vadd.f32 %v6228_v55, %v2479_v44  ;;  %v2520_v41 = vadd.f32 %v6228_v55, %v2519_v25  ;;  %4607 = vpow2.f32 %v2576_v30 }
 0x709   : > { %v2590_v27 = vmul.f32 1.442695, %v2564_v32  ;;  %v2580_v37 = vmul.f32 1.442695, %v2559_v24  ;;  %2551 = vst [vmem:[%s6264_s24 + $0x68] sm:$0xff] %v2525_v39  ;;  %v2567_v61 = vsub.f32 0.0, %v2525_v39  ;;  %4609 = vpow2.f32 %v2592_v62 }
 0x70a   : > { %2542 = vst [vmem:[%s6264_s24 + $0x20] sm:$0xff] %v2480_v51  ;;  %v2558_v46 = vsub.f32 0.0, %v2480_v51  ;;  %2550 = vst [vmem:[%s6264_s24 + $0x60] sm:$0xff] %v2520_v41  ;;  %v2566_v49 = vsub.f32 0.0, %v2520_v41  ;;  %v2779_v50 = vmul.f32 %v6240_v12, %v2763_v60  ;;  %v2811_v31 = vmul.f32 %v6240_v12, %v2795_v35 }
 0x70b   : > { %4611 = vpow2.f32 %v2574_v43  ;;  %v2596_v48 = vmul.f32 1.442695, %v2567_v61  ;;  %v2839_v16 = vadd.f32 %v6220_v2, %v6230_v58  ;;  %v2780_v59 = vmul.f32 %v6208_v18, %v2764_v5 }
 0x70c   : > { %4613 = vpow2.f32 %v2590_v27  ;;  %v2578_v40 = vmul.f32 1.442695, %v2558_v46  ;;  %v2594_v26 = vmul.f32 1.442695, %v2566_v49  ;;  %v2827_v45 = vmul.f32 %v2779_v50, %v2779_v50 }
 0x70d   : > { %4615 = vpow2.f32 %v2580_v37  ;;  %v2840_v12 = vadd.f32 %v2839_v16, %v6261_v13  ;;  %v2495_v63 = vadd.f32 %v4100_v33, %v6228_v55  ;;  %v2535_v2 = vadd.f32 %v4112_v54, %v6228_v55 }
 0x70e   : > { %4617 = vpow2.f32 %v2596_v48  ;;  %v6304_v58 = vadd.f32 %v6228_v55, %v2489_v7  ;;  %v6307_v38 = vadd.f32 %v6228_v55, %v2529_v17  ;;  %v4600_v42 = vpop.eup %4599  ;;  %v2866_v15 = vmul.f32 %v6235_v9, %v6235_v9 }
 0x70f   : > { %4619 = vpow2.f32 %v2578_v40  ;;  %v2841_v57 = vadd.f32 %v2840_v12, %v6232_v19  ;;  %2545 = vst [vmem:[%s6264_s24 + $0x38] sm:$0xff] %v2495_v63  ;;  %v4602_v5 = vpop.eup %4601  ;;  %v2603_v4 = vadd.f32 1.0, %v4600_v42  ;;  %2553 = vst [vmem:[%s6264_s24 + $0x78] sm:$0xff] %v2535_v2  ;;  %v2828_v55 = vmul.f32 %v2780_v59, %v2780_v59 }
 0x710   : > { %4621 = vpow2.f32 %v2594_v26  ;;  %2544 = vst [vmem:[%s6264_s24 + $0x30] sm:$0xff] %v6304_v58  ;;  %2552 = vst [vmem:[%s6264_s24 + $0x70] sm:$0xff] %v6307_v38  ;;  %v4604_v13 = vpop.eup %4603  ;;  %v2611_v34 = vadd.f32 1.0, %v4602_v5  ;;  %v2867_v22 = vmul.f32 %v2811_v31, %v2811_v31  ;;  %v2812_v29 = vmul.f32 %v6208_v18, %v6257_v28  ;;  %s4996_s24 = scalar_lea.vmem %s4995_s17, 4096 }
 0x711   : > { %v2842_v23 = vadd.f32 %v2841_v57, %v2827_v45  ;;  %v4606_v1 = vpop.eup %4605  ;;  %4623 = vrcp.f32 %v2603_v4  ;;  %v2602_v19 = vadd.f32 1.0, %v4604_v13  ;;  %v2881_v36 = vadd.f32 %v6269_v53, %v2866_v15  ;;  %p4998_p3 = scmp.lt.s32.totalorder %s4996_s24, %s4990_s13 }
 0x712   : > { %v4608_v8 = vpop.eup %4607  ;;  %4625 = vrcp.f32 %v2611_v34  ;;  %v2610_v52 = vadd.f32 1.0, %v4606_v1  ;;  %v2561_v0 = vsub.f32 0.0, %v2495_v63  ;;  %v2868_v44 = vmul.f32 %v2812_v29, %v2812_v29 }
 0x713   : > { %v2843_v60 = vadd.f32 %v2842_v23, %v2828_v55  ;;  %v4610_v11 = vpop.eup %4609  ;;  %4627 = vrcp.f32 %v2602_v19  ;;  %v2605_v56 = vadd.f32 1.0, %v4608_v8  ;;  %v2882_v25 = vadd.f32 %v2881_v36, %v2867_v22  ;;  %p4999_p12 = por %p4998_p3, %p4997_p11 }
 0x714   : > { %4629 = vrcp.f32 %v2610_v52  ;;  %v2613_v21 = vadd.f32 1.0, %v4610_v11  ;;  %v2569_v10 = vsub.f32 0.0, %v2535_v2  ;;  %v2560_v6 = vsub.f32 0.0, %v6304_v58 }
 0x715   : > { %v4612_v9 = vpop.eup %4611  ;;  %2844 = vadd.xlane.f32.xlu0 %v2843_v60  ;;  %4631 = vrcp.f32 %v2605_v56  ;;  %v2883_v53 = vadd.f32 %v2882_v25, %v2868_v44  ;;  %v2568_v14 = vsub.f32 0.0, %v6307_v38  ;;  %v2584_v24 = vmul.f32 1.442695, %v2561_v0  ;;  %p5000_p1 = pnand %p4999_p12, %p4993_p8 }
 0x716   : > { %v4614_v3 = vpop.eup %4613  ;;  %v2604_v47 = vadd.f32 1.0, %v4612_v9  ;;  %4633 = vrcp.f32 %v2613_v21  ;;  %v2600_v54 = vmul.f32 1.442695, %v2569_v10  ;;  %v2582_v43 = vmul.f32 1.442695, %v2560_v6 }
 0x717   : > { %v4616_v18 = vpop.eup %4615  ;;  %v2612_v28 = vadd.f32 1.0, %v4614_v3  ;;  %v2598_v41 = vmul.f32 1.442695, %v2568_v14 }
 0x718   : > { %v4618_v35 = vpop.eup %4617  ;;  %4635 = vrcp.f32 %v2604_v47  ;;  %v2607_v20 = vadd.f32 1.0, %v4616_v18 }
 0x719   : > { %v4620_v30 = vpop.eup %4619  ;;  %4637 = vrcp.f32 %v2612_v28  ;;  %v2615_v62 = vadd.f32 1.0, %v4618_v35  ;;  %2884 = vadd.xlane.f32.xlu0 %v2883_v53 }
 0x71a   : > { %v4622_v33 = vpop.eup %4621  ;;  %4639 = vrcp.f32 %v2607_v20  ;;  %v2606_v32 = vadd.f32 1.0, %v4620_v30 }
 0x71b   : > { %4641 = vrcp.f32 %v2615_v62  ;;  %v2614_v39 = vadd.f32 1.0, %v4622_v33  ;;  %v4624_v7 = vpop.eup %4623 }
 0x71c   : > { %4643 = vrcp.f32 %v2606_v32  ;;  %v4626_v51 = vpop.eup %4625  ;;  %2651 = vst [vmem:[%s6324_s11 + $0x8] sm:$0xff] %v4624_v7 }
 0x71d   : > { %4645 = vrcp.f32 %v2614_v39  ;;  %v4628_v17 = vpop.eup %4627  ;;  %2659 = vst [vmem:[%s6324_s11 + $0x48] sm:$0xff] %v4626_v51 }
 0x71e   : > { %4647 = vpow2.f32 %v2584_v24  ;;  %v4630_v27 = vpop.eup %4629  ;;  %2650 = vst [vmem:[%s6324_s11] sm:$0xff] %v4628_v17 }
 0x71f   : > { %4649 = vpow2.f32 %v2600_v54  ;;  %v4632_v37 = vpop.eup %4631  ;;  %2658 = vst [vmem:[%s6324_s11 + $0x40] sm:$0xff] %v4630_v27 }
 0x720   : > { %4651 = vpow2.f32 %v2582_v43  ;;  %v4634_v61 = vpop.eup %4633  ;;  %2653 = vst [vmem:[%s6324_s11 + $0x18] sm:$0xff] %v4632_v37 }
 0x721   : > { %4653 = vpow2.f32 %v2598_v41  ;;  %2661 = vst [vmem:[%s6324_s11 + $0x58] sm:$0xff] %v4634_v61 }
 0x722   : > { %v4636_v46 = vpop.eup %4635 }
 0x723   : > { %v4638_v49 = vpop.eup %4637  ;;  %2652 = vst [vmem:[%s6324_s11 + $0x10] sm:$0xff] %v4636_v46 }
 0x724   : > { %v4640_v50 = vpop.eup %4639  ;;  %2660 = vst [vmem:[%s6324_s11 + $0x50] sm:$0xff] %v4638_v49 }
 0x725   : > { %v4642_v31 = vpop.eup %4641  ;;  %2655 = vst [vmem:[%s6324_s11 + $0x28] sm:$0xff] %v4640_v50 }
 0x726   : > { %v4644_v48 = vpop.eup %4643  ;;  %2663 = vst [vmem:[%s6324_s11 + $0x68] sm:$0xff] %v4642_v31 }
 0x727   : > { %v4646_v16 = vpop.eup %4645  ;;  %2654 = vst [vmem:[%s6324_s11 + $0x20] sm:$0xff] %v4644_v48 }
 0x728   : > { %v4648_v40 = vpop.eup %4647  ;;  %2662 = vst [vmem:[%s6324_s11 + $0x60] sm:$0xff] %v4646_v16 }
 0x729   : > { %v4650_v26 = vpop.eup %4649  ;;  %v2609_v59 = vadd.f32 1.0, %v4648_v40 }
 0x72a   : > { %v4652_v45 = vpop.eup %4651  ;;  %v2617_v12 = vadd.f32 1.0, %v4650_v26 }
 0x72b   : > { %v4654_v63 = vpop.eup %4653  ;;  %4655 = vrcp.f32 %v2609_v59  ;;  %v2608_v2 = vadd.f32 1.0, %v4652_v45 }
 0x72c   : > { %4657 = vrcp.f32 %v2617_v12  ;;  %v2616_v58 = vadd.f32 1.0, %v4654_v63 }
 0x72d   : > { %4659 = vrcp.f32 %v2608_v2 }
 0x72e   : > { %4661 = vrcp.f32 %v2616_v58 }
 0x735   : > { %v4656_v38 = vpop.eup %4655 }
 0x736   : > { %v4658_v42 = vpop.eup %4657  ;;  %2657 = vst [vmem:[%s6324_s11 + $0x38] sm:$0xff] %v4656_v38 }
 0x737   : > { %v4660_v57 = vpop.eup %4659  ;;  %2665 = vst [vmem:[%s6324_s11 + $0x78] sm:$0xff] %v4658_v42 }
 0x738   : > { %v4662_v5 = vpop.eup %4661  ;;  %2656 = vst [vmem:[%s6324_s11 + $0x30] sm:$0xff] %v4660_v57 }
 0x739   : > { %2664 = vst [vmem:[%s6324_s11 + $0x70] sm:$0xff] %v4662_v5 }
 0x73a   : > { %5003 = shalt.err (!%p5000_p1)
}
 0x73b   : > { %s5004_s1 = scalar_lea.hbm %s6349_s18, 2048  ;;  %s5008_s15 = scalar_lea.hbm %s6622_s6, 4096 }
 0x73c   : > { %p5005_p13 = scmp.ne.s32.totalorder %s6349_s18, %s5004_s1  ;;  %p5009_p2 = scmp.lt.u32.totalorder %s6349_s18, %s6622_s6 }
 0x73d   : > { %p5010_p6 = scmp.lt.u32.totalorder %s5008_s15, %s5004_s1  ;;  %p5012_p5 = scmp.lt.u32.totalorder %s5004_s1, %s6349_s18 }
 0x73e   : > { %p5006_p0 = pnand %p5005_p13, %p6624_p9 }
 0x73f   : > { %p5011_p10 = por %p5010_p6, %p5009_p2 }
 0x740   : > { %p5007_p7 = pneg %p5006_p0 }
 0x741   : > { %p5013_p4 = por %p5012_p5, %p5011_p10 }
 0x743   : > { %p5014_p8 = pnand %p5013_p4, %p5007_p7 }
 0x745   : > { %5017 = shalt.err (!%p5014_p8)
}
 0x746   : > { %s5189_s13 = smov 128   ;;  %s5190_s17 = smov 8  }
 0x747   : > { %4478 = dma.vmem_to_hbm [thread:$0]  (%p6624_p9), %s6352_s2, 2048, %s6349_s18, %s6362_s21, %s5189_s13, %s5189_s13, %s5190_s17  }
 0x748   : > { %s6625_s16 = sld [smem:[#allocation54_spill]]  ;;  %s2925_s15 = sshll.u32 %s5900_s7, 4  ;;  %s6397_s15 = int_to_ptr.vmem [resolvable:$true] %s2925_s15 }
 0x749   : > { %s2957_s27 = sshll.u32 %s6324_s11, 4  ;;  %s2897_s20 = scalar_lea.sflag [#allocation4], %s5685_s26  ;;  %s6399_s27 = int_to_ptr.vmem [resolvable:$true] %s2957_s27 }
 0x74a   : > { %s5018_s14 = scalar_lea.vmem %s6397_s15, 2048  ;;  %s5191_s18 = smov [#allocation20]  }
 0x74b   : > { %p5019_p11 = scmp.ne.s32.totalorder %s6397_s15, %s5018_s14  ;;  %s5022_s2 = sshll.u32 %s5191_s18, 4  ;;  %s5023_s2 = int_to_ptr.vmem [resolvable:$false] %s5022_s2 }
 0x74c   : > { %p5025_p1 = scmp.lt.s32.totalorder %s6397_s15, %s5023_s2 }
 0x74d   : > { %p5020_p3 = pnand %p5019_p11, %p6624_p9 }
 0x74e   : > { %s6393_s25 = scalar_lea.hbm %s6625_s16, %s6343_s10  ;;  %s5024_s10 = scalar_lea.vmem %s5023_s2, 4096 }
 0x74f   : > { %p5021_p12 = pneg %p5020_p3  ;;  %p5026_p13 = scmp.lt.s32.totalorder %s5024_s10, %s5018_s14 }
 0x751   : > { %p5027_p0 = por %p5026_p13, %p5025_p1 }
 0x753   : > { %p5028_p7 = pnand %p5027_p0, %p5021_p12 }
 0x755   : > { %5031 = shalt.err (!%p5028_p7)
}
 0x756   : > { %s5032_s7 = scalar_lea.hbm %s6393_s25, 2048  ;;  %s5036_s1 = scalar_lea.hbm %s6625_s16, 4096 }
 0x757   : > { %p5033_p2 = scmp.ne.s32.totalorder %s6393_s25, %s5032_s7  ;;  %p5037_p5 = scmp.lt.u32.totalorder %s6393_s25, %s6625_s16 }
 0x758   : > { %p5038_p4 = scmp.lt.u32.totalorder %s5036_s1, %s5032_s7  ;;  %p5040_p11 = scmp.lt.u32.totalorder %s5032_s7, %s6393_s25 }
 0x759   : > { %p5034_p6 = pnand %p5033_p2, %p6624_p9 }
 0x75a   : > { %p5039_p8 = por %p5038_p4, %p5037_p5 }
 0x75b   : > { %p5035_p10 = pneg %p5034_p6 }
 0x75c   : > { %p5041_p3 = por %p5040_p11, %p5039_p8 }
 0x75e   : > { %p5042_p12 = pnand %p5041_p3, %p5035_p10 }
 0x760   : > { %5045 = shalt.err (!%p5042_p12)
}
 0x761   : > { %4477 = dma.vmem_to_hbm [thread:$0]  (%p6624_p9), %s6397_s15, 2048, %s6393_s25, %s2897_s20, %s5189_s13, %s5189_s13, %s5190_s17  }
 0x762   : > { %s5046_s14 = scalar_lea.vmem %s6399_s27, 2048  ;;  %s5192_s10 = smov [#allocation23]  }
 0x763   : > { %p5047_p1 = scmp.ne.s32.totalorder %s6399_s27, %s5046_s14  ;;  %s5050_s7 = sshll.u32 %s5192_s10, 4  ;;  %s5051_s7 = int_to_ptr.vmem [resolvable:$false] %s5050_s7 }
 0x764   : > { %s5052_s11 = scalar_lea.vmem %s5051_s7, 4096  ;;  %p5053_p7 = scmp.lt.s32.totalorder %s6399_s27, %s5051_s7 }
 0x765   : > { %p5048_p13 = pnand %p5047_p1, %p6624_p9  ;;  %p5054_p2 = scmp.lt.s32.totalorder %s5052_s11, %s5046_s14 }
 0x767   : > { %p5049_p0 = pneg %p5048_p13  ;;  %p5055_p6 = por %p5054_p2, %p5053_p7 }
 0x769   : > { %p5056_p10 = pnand %p5055_p6, %p5049_p0 }
 0x76b   : > { %5059 = shalt.err (!%p5056_p10)
}
 0x76c   : > { %s5060_s25 = scalar_lea.hbm %s6358_s22, 2048  ;;  %s5064_s24 = scalar_lea.hbm %s6623_s0, 4096 }
 0x76d   : > { %p5061_p5 = scmp.ne.s32.totalorder %s6358_s22, %s5060_s25  ;;  %p5065_p11 = scmp.lt.u32.totalorder %s6358_s22, %s6623_s0 }
 0x76e   : > { %p5066_p3 = scmp.lt.u32.totalorder %s5064_s24, %s5060_s25  ;;  %p5068_p1 = scmp.lt.u32.totalorder %s5060_s25, %s6358_s22 }
 0x76f   : > { %p5062_p4 = pnand %p5061_p5, %p6624_p9 }
 0x770   : > { %p5067_p12 = por %p5066_p3, %p5065_p11 }
 0x771   : > { %p5063_p8 = pneg %p5062_p4 }
 0x772   : > { %p5069_p13 = por %p5068_p1, %p5067_p12 }
 0x774   : > { %p5070_p0 = pnand %p5069_p13, %p5063_p8 }
 0x776   : > { %5073 = shalt.err (!%p5070_p0)
}
 0x777   : > { %4479 = dma.vmem_to_hbm [thread:$0]  (%p6624_p9), %s6399_s27, 2048, %s6358_s22, %s6362_s21, %s5189_s13, %s5189_s13, %s5190_s17  }
 0x778   : > { %s3277_s22 = sshll.u32 %s5685_s26, 3  ;;  %s6626_s14 = sshll.u32 %s5330_s23, 7 }
 0x779   : > { %s899_s13 = scalar_lea.vmem [#allocation24], %s3277_s22  ;;  %s6627_s11 = sld [smem:[#allocation57_spill]] }
 0x77a   : > { %s2973_s17 = sshll.u32 %s899_s13, 4  ;;  %s2912_s15 = scalar_lea.sflag [#allocation25], %s5685_s26  ;;  %s6461_s17 = int_to_ptr.vmem [resolvable:$true] %s2973_s17 }
 0x77b   : > { %s5074_s20 = scalar_lea.vmem %s6461_s17, 128  ;;  %s5193_s24 = smov [#allocation24]  }
 0x77c   : > { %p5075_p7 = scmp.ne.s32.totalorder %s6461_s17, %s5074_s20  ;;  %s5078_s23 = sshll.u32 %s5193_s24, 4  ;;  %s5079_s23 = int_to_ptr.vmem [resolvable:$false] %s5078_s23 }
 0x77d   : > { %s5080_s1 = scalar_lea.vmem %s5079_s23, 256  ;;  %p5081_p10 = scmp.lt.s32.totalorder %s6461_s17, %s5079_s23 }
 0x77e   : > { %p5076_p2 = pnand %p5075_p7, %p6624_p9  ;;  %p5082_p5 = scmp.lt.s32.totalorder %s5080_s1, %s5074_s20 }
 0x77f   : > { %s6459_s25 = scalar_lea.hbm %s6627_s11, %s6626_s14 }
 0x780   : > { %p5077_p6 = pneg %p5076_p2  ;;  %p5083_p4 = por %p5082_p5, %p5081_p10 }
 0x782   : > { %p5084_p8 = pnand %p5083_p4, %p5077_p6 }
 0x7a2   : > { %v2845_v4 = vpop.xlane.xlu0 %2844 }
 0x7a3   : > { %v2846_v13 = vrot.slane %v2845_v4, 4 }
 0x7a5   : > { %v2847_v15 = vadd.f32 %v2846_v13, %v2845_v4 }
 0x7a6   : > { %v2885_v55 = vpop.xlane.xlu0 %2884 }
 0x7a7   : > { %v2848_v34 = vrot.slane %v2847_v15, 2  ;;  %v2886_v23 = vrot.slane %v2885_v55, 4 }
 0x7a9   : > { %v2849_v1 = vadd.f32 %v2848_v34, %v2847_v15  ;;  %v2887_v22 = vadd.f32 %v2886_v23, %v2885_v55 }
 0x7ab   : > { %v2850_v19 = vrot.slane %v2849_v1, 1  ;;  %v2888_v29 = vrot.slane %v2887_v22, 2 }
 0x7ad   : > { %v2851_v8 = vadd.f32 %v2850_v19, %v2849_v1  ;;  %v2889_v52 = vadd.f32 %v2888_v29, %v2887_v22 }
 0x7af   : > { %4433 = vpush %v2851_v8  ;;  %v2890_v60 = vrot.slane %v2889_v52, 1 }
 0x7b1   : > { %v2891_v11 = vadd.f32 %v2890_v60, %v2889_v52 }
 0x7b3   : > { %4435 = vpush %v2891_v11 }
 0x7e0   : > { %s4434_s21 = spop %4433 }
 0x7e4   : > { %s4436_s27 = spop %4435 }
 0x7e5   : > { %s2893_s2 = sadd.f32 %s4436_s27, %s4434_s21 }
 0x7e7   : > { %v2894_v56 = vstv %s2893_s2 }
 0x7e8   : > { %2895 = vst [vmem:[%s899_s13] sm:$0xff] %v2894_v56 }
 0x7e9   : > { %5087 = shalt.err (!%p5084_p8)
}
 0x7ea   : > { %s5088_s26 = scalar_lea.hbm %s6459_s25, 128  ;;  %s5092_s21 = scalar_lea.hbm %s6627_s11, 256 }
 0x7eb   : > { %p5089_p11 = scmp.ne.s32.totalorder %s6459_s25, %s5088_s26  ;;  %p5093_p1 = scmp.lt.u32.totalorder %s6459_s25, %s6627_s11 }
 0x7ec   : > { %p5094_p13 = scmp.lt.u32.totalorder %s5092_s21, %s5088_s26  ;;  %p5096_p7 = scmp.lt.u32.totalorder %s5088_s26, %s6459_s25 }
 0x7ed   : > { %p5090_p3 = pnand %p5089_p11, %p6624_p9 }
 0x7ee   : > { %p5095_p0 = por %p5094_p13, %p5093_p1 }
 0x7ef   : > { %p5091_p12 = pneg %p5090_p3 }
 0x7f0   : > { %p5097_p2 = por %p5096_p7, %p5095_p0 }
 0x7f2   : > { %p5098_p6 = pnand %p5097_p2, %p5091_p12 }
 0x7f4   : > { %5101 = shalt.err (!%p5098_p6)
}
 0x7f5   : > { %4480 = dma.vmem_to_hbm [thread:$0]  (%p6624_p9), %s6461_s17, 128, %s6459_s25, %s2912_s15  }
 0x7f6 PF: > { %s2985_s2 = sand.u32 1, %s5160_s3   ;;  %p6628_p10 = scmp.ne.s32.totalorder %s6593_s19, 0 }
 0x7f7   : > { %p6629_p5 = scmp.ge.s32.totalorder %s5172_s30, 2  ;;  %s2986_s14 = scalar_lea.sflag [#allocation4], %s2985_s2 }
 0x7f9   : > { %p4521_p4 = pnand %p6629_p5, %p6628_p10 }
 0x7fb   : > { %5147 = dma.done.wait (!%p4521_p4), %s2986_s14, 2048  }
 0x7fc   : > { %5149 = vsyncadd (!%p4521_p4), %s2986_s14, 4294965248  ;;  %s6630_s10 = sadd.s32 4294967294, %s5172_s30  }
 0x7fd   : > { %s2994_s7 = sand.u32 1, %s6630_s10  }
 0x7fe   : > { %s2995_s20 = scalar_lea.sflag [#allocation22], %s2994_s7 }
 0x7ff   : > { %5151 = dma.done.wait (!%p4521_p4), %s2995_s20, 4096  }
 0x800   : > { %5153 = vsyncadd (!%p4521_p4), %s2995_s20, 4294963200  ;;  %s3013_s12 = scalar_lea.sflag [#allocation25], %s2985_s2 }
 0x801   : > { %5155 = dma.done.wait (!%p4521_p4), %s3013_s12, 128  }
 0x802   : > { %5157 = vsyncadd (!%p4521_p4), %s3013_s12, 4294967168  ;;  %p49_p9 = scmp.ge.s32.totalorder %s5566_s5, 4   ;;  %s6631_s3 = smov %s5164_s28 }
 0x803   : > { %s6632_s28 = smov %s5168_s29  ;;  %s6633_s29 = smov %s5578_s4 }
 0x804   : > { %s6634_s30 = smov %s5566_s5  ;;  %51 = sbr.rel (!%p49_p9) target bundleno = 38 (0x26), region = 239 }
 0x80b   :  { %3018 = vsyncpa [#allocation3], 1 }
 0x80c   :  { %3020 = vsyncpa [#allocation3 + $0x1], 1 }
 0x80d   :  { %3021 = vsyncpa [#allocation6], 1 }
 0x80e   :  { %3023 = vsyncpa [#allocation6 + $0x1], 1 }
 0x80f   :  { %3024 = vsyncpa [#allocation9], 1 }
 0x810   :  { %3025 = vsyncpa [#allocation12], 1 }
 0x811   :  { %3026 = vsyncpa [#allocation15], 1 }
 0x812   :  { %3027 = vsyncpa [#allocation18], 1 }
 0x813   :  { %3028 = vsyncpa [#allocation4], 1 }
 0x814   :  { %3030 = vsyncpa [#allocation4 + $0x1], 1 }
 0x815   :  { %3031 = vsyncpa [#allocation22], 1 }
 0x816   :  { %3033 = vsyncpa [#allocation22 + $0x1], 1 }
 0x817   :  { %3034 = vsyncpa [#allocation25], 1 }
 0x818   :  { %3036 = vsyncpa [#allocation25 + $0x1], 1 }

</bundles_post_ra>
